<compile_context>
chip_gen: v6e
topology: v6e:2x2x1
jax: 0.10.0
libtpu: 0.0.40
codegen_flags: <defaults>
</compile_context>

<pallas_src>
import jax
import jax.numpy as jnp
import numpy as np
from jax.experimental import pallas as pl
from jax.experimental.pallas import tpu as pltpu

EPS = 1e-5


def _tap_masks(N, D, H, W):
    """(27, N*D*H*W) f32 0/1 masks: 1 where tap (kd,kh,kw) reads in-bounds."""
    d = np.arange(D)[:, None, None]
    h = np.arange(H)[None, :, None]
    w = np.arange(W)[None, None, :]
    rows = []
    for kd in range(3):
        for kh in range(3):
            for kw in range(3):
                ok = ((d + kd - 1 >= 0) & (d + kd - 1 < D) &
                      (h + kh - 1 >= 0) & (h + kh - 1 < H) &
                      (w + kw - 1 >= 0) & (w + kw - 1 < W))
                rows.append(np.broadcast_to(ok, (D, H, W)).reshape(-1))
    m = np.stack(rows, axis=0).astype(np.float32)        # (27, D*H*W)
    return jnp.asarray(np.tile(m, (1, N)))               # (27, N*D*H*W)


def _make_double_conv_kernel(N, Cin, Cout, D, H, W):
    M = D * H * W
    NM = N * M
    inv_cnt = 1.0 / float(NM)
    # Flat-index offset of tap (kd,kh,kw) relative to the output position.
    shifts = [(kd - 1) * H * W + (kh - 1) * W + (kw - 1)
              for kd in range(3) for kh in range(3) for kw in range(3)]

    def shift_lanes(x, delta):
        # y[:, m] = x[:, (m + delta) mod NM]  (wrapped / leaked entries are
        # killed by the boundary mask).  Lane rotation via static slices.
        d = delta % NM
        if d == 0:
            return x
        return jnp.concatenate([x[:, d:], x[:, :d]], axis=1)

    def conv27(xc, wmat, masks):
        # xc: (C, NM); wmat: (Cout, 27*C).  One im2col matmul, K = 27*C.
        rows = []
        for t in range(27):
            rows.append(shift_lanes(xc, shifts[t]) * masks[t:t + 1, :])
        rhs = jnp.concatenate(rows, axis=0)               # (27*C, NM)
        return jnp.dot(wmat, rhs, preferred_element_type=jnp.float32)

    def bn_relu(y, gamma, beta):
        # Training-mode BN: one-pass batch stats (biased variance) per channel.
        s = jnp.sum(y, axis=1, keepdims=True)             # (Cout, 1)
        ss = jnp.sum(y * y, axis=1, keepdims=True)
        mu = s * inv_cnt
        var = ss * inv_cnt - mu * mu
        yhat = (y - mu) * jax.lax.rsqrt(var + EPS)
        return jnp.maximum(yhat * gamma + beta, 0.0)

    def kernel(x_ref, w1_ref, w2_ref, g1_ref, b1_ref, g2_ref, b2_ref,
               mask_ref, o_ref):
        # x_ref: (N, Cin, M)   o_ref: (N, Cout, M)   mask_ref: (27, N*M)
        masks = mask_ref[...]
        # Gather batch into one channel-major, lane-dense slab (Cin, N*M).
        x = jnp.concatenate([x_ref[n, :, :] for n in range(N)], axis=-1)
        # Stage 1: conv1 (bias cancels under BN) -> BN -> ReLU.
        h = bn_relu(conv27(x, w1_ref[...], masks), g1_ref[...], b1_ref[...])
        # Stage 2 (intermediate h stays in VMEM/vregs).
        out = bn_relu(conv27(h, w2_ref[...], masks), g2_ref[...], b2_ref[...])
        # Lane-dense stores: each write is a (Cout, M) slab, last dim M>=128.
        for n in range(N):
            o_ref[n, :, :] = out[:, n * M:(n + 1) * M]

    return kernel


def double_conv(x_ncdhw, params):
    """Forward of DoubleConv. Input/output in PyTorch NCDHW layout (f32)."""
    N, Cin, D, H, W = x_ncdhw.shape
    Cout = params["w1"].shape[0]
    M = D * H * W

    # Free (contiguous) reshape to the kernel's flat layout — no transpose,
    # no jnp.pad round trip through HBM.
    x_flat = x_ncdhw.reshape(N, Cin, M).astype(jnp.float32)

    # (Cout, Cin, 3,3,3) -> (Cout, 27*Cin) with rows matching tap order.
    w1 = jnp.transpose(params["w1"], (0, 2, 3, 4, 1)).reshape(Cout, 27 * Cin)
    w2 = jnp.transpose(params["w2"], (0, 2, 3, 4, 1)).reshape(Cout, 27 * Cout)
    g1 = params["g1"].reshape(Cout, 1).astype(jnp.float32)
    b1 = params["beta1"].reshape(Cout, 1).astype(jnp.float32)
    g2 = params["g2"].reshape(Cout, 1).astype(jnp.float32)
    b2 = params["beta2"].reshape(Cout, 1).astype(jnp.float32)
    masks = _tap_masks(N, D, H, W)

    kernel = _make_double_conv_kernel(N, Cin, Cout, D, H, W)

    flops = 2 * N * M * 27 * Cin * Cout + 2 * N * M * 27 * Cout * Cout
    bytes_accessed = 4 * (x_flat.size + w1.size + w2.size + masks.size
                          + 4 * Cout + N * Cout * M)

    vmem = pltpu.MemorySpace.VMEM
    out_flat = pl.pallas_call(
        kernel,
        out_shape=jax.ShapeDtypeStruct((N, Cout, M), jnp.float32),
        in_specs=[pl.BlockSpec(memory_space=vmem) for _ in range(8)],
        out_specs=pl.BlockSpec(memory_space=vmem),
        compiler_params=pltpu.CompilerParams(
            vmem_limit_bytes=32 * 1024 * 1024),
        cost_estimate=pl.CostEstimate(flops=flops,
                                      transcendentals=2 * Cout,
                                      bytes_accessed=bytes_accessed),
    )(x_flat, w1.astype(jnp.float32), w2.astype(jnp.float32),
      g1, b1, g2, b2, masks)

    return out_flat.reshape(N, Cout, D, H, W)


def _ref_double_conv(x, params):
    """Pure-JAX reference in NCDHW (includes the conv bias)."""
    def block(x, w, b, g, beta):
        y = jax.lax.conv_general_dilated(
            x, w, window_strides=(1, 1, 1), padding="SAME",
            dimension_numbers=("NCDHW", "OIDHW", "NCDHW"))
        y = y + b.reshape(1, -1, 1, 1, 1)
        mu = jnp.mean(y, axis=(0, 2, 3, 4), keepdims=True)
        var = jnp.mean((y - mu) ** 2, axis=(0, 2, 3, 4), keepdims=True)
        y = ((y - mu) * jax.lax.rsqrt(var + EPS) * g.reshape(1, -1, 1, 1, 1)
             + beta.reshape(1, -1, 1, 1, 1))
        return jnp.maximum(y, 0.0)

    h = block(x, params["w1"], params["b1"], params["g1"], params["beta1"])
    return block(h, params["w2"], params["b2"], params["g2"], params["beta2"])


if __name__ == "__main__":
    N, Cin, Cout, D, H, W = 2, 4, 8, 8, 8, 8
    key = jax.random.PRNGKey(0)
    ks = jax.random.split(key, 8)

    # Shapes match nn.Conv3d / nn.BatchNorm3d (PyTorch weight layout).
    fan1 = Cin * 27
    w1 = jax.random.uniform(ks[0], (Cout, Cin, 3, 3, 3), jnp.float32,
                            -1.0 / np.sqrt(fan1), 1.0 / np.sqrt(fan1))
    b1 = jax.random.uniform(ks[1], (Cout,), jnp.float32,
                            -1.0 / np.sqrt(fan1), 1.0 / np.sqrt(fan1))
    fan2 = Cout * 27
    w2 = jax.random.uniform(ks[2], (Cout, Cout, 3, 3, 3), jnp.float32,
                            -1.0 / np.sqrt(fan2), 1.0 / np.sqrt(fan2))
    b2 = jax.random.uniform(ks[3], (Cout,), jnp.float32,
                            -1.0 / np.sqrt(fan2), 1.0 / np.sqrt(fan2))
    g1 = 1.0 + 0.1 * jax.random.normal(ks[4], (Cout,), jnp.float32)
    beta1 = 0.1 * jax.random.normal(ks[5], (Cout,), jnp.float32)
    g2 = 1.0 + 0.1 * jax.random.normal(ks[6], (Cout,), jnp.float32)
    beta2 = 0.1 * jax.random.normal(ks[7], (Cout,), jnp.float32)
    params = dict(w1=w1, b1=b1, g1=g1, beta1=beta1,
                  w2=w2, b2=b2, g2=g2, beta2=beta2)

    x = jax.random.normal(jax.random.fold_in(key, 123),
                          (N, Cin, D, H, W), jnp.float32)   # NCDHW

    out = jax.block_until_ready(double_conv(x, params))
    assert out.shape == (N, Cout, D, H, W)

    ref = _ref_double_conv(x, params)
    np.testing.assert_allclose(np.asarray(out), np.asarray(ref),
                               atol=1e-4, rtol=1e-4)
    print("KERNEL_OK")
</pallas_src>

<mosaic_0001>
module attributes {stable_mosaic.version = 11 : i64} {
  func.func @kernel(%arg0: memref<2x4x512xf32, #tpu.memory_space<vmem>>, %arg1: memref<8x108xf32, #tpu.memory_space<vmem>>, %arg2: memref<8x216xf32, #tpu.memory_space<vmem>>, %arg3: memref<8x1xf32, #tpu.memory_space<vmem>>, %arg4: memref<8x1xf32, #tpu.memory_space<vmem>>, %arg5: memref<8x1xf32, #tpu.memory_space<vmem>>, %arg6: memref<8x1xf32, #tpu.memory_space<vmem>>, %arg7: memref<27x1024xf32, #tpu.memory_space<vmem>>, %arg8: memref<2x8x512xf32, #tpu.memory_space<vmem>>) attributes {dimension_semantics = [], scalar_prefetch = 0 : i64, scratch_operands = 0 : i64, tpu.core_type = #tpu.core_type<tc>} {
    %c0 = arith.constant 0 : index
    %c0_0 = arith.constant 0 : index
    %0 = vector.load %arg7[%c0, %c0_0] : memref<27x1024xf32, #tpu.memory_space<vmem>>, vector<27x1024xf32>
    %c0_1 = arith.constant 0 : index
    %c0_2 = arith.constant 0 : index
    %c0_3 = arith.constant 0 : index
    %1 = vector.load %arg0[%c0_1, %c0_2, %c0_3] : memref<2x4x512xf32, #tpu.memory_space<vmem>>, vector<1x4x512xf32>
    %2 = vector.shape_cast %1 : vector<1x4x512xf32> to vector<4x512xf32>
    %c1 = arith.constant 1 : index
    %c0_4 = arith.constant 0 : index
    %c0_5 = arith.constant 0 : index
    %3 = vector.load %arg0[%c1, %c0_4, %c0_5] : memref<2x4x512xf32, #tpu.memory_space<vmem>>, vector<1x4x512xf32>
    %4 = vector.shape_cast %3 : vector<1x4x512xf32> to vector<4x512xf32>
    %5 = tpu.concatenate %2, %4 in 1 : vector<4x512xf32>, vector<4x512xf32> -> vector<4x1024xf32>
    %c0_6 = arith.constant 0 : index
    %c0_7 = arith.constant 0 : index
    %6 = vector.load %arg1[%c0_6, %c0_7] : memref<8x108xf32, #tpu.memory_space<vmem>>, vector<8x108xf32>
    %7 = vector.extract_strided_slice %5 {offsets = [0, 951], sizes = [4, 73], strides = [1, 1]} : vector<4x1024xf32> to vector<4x73xf32>
    %8 = vector.extract_strided_slice %5 {offsets = [0, 0], sizes = [4, 951], strides = [1, 1]} : vector<4x1024xf32> to vector<4x951xf32>
    %9 = tpu.concatenate %7, %8 in 1 : vector<4x73xf32>, vector<4x951xf32> -> vector<4x1024xf32>
    %10 = vector.extract_strided_slice %0 {offsets = [0, 0], sizes = [1, 1024], strides = [1, 1]} : vector<27x1024xf32> to vector<1x1024xf32>
    %11 = vector.broadcast %10 : vector<1x1024xf32> to vector<4x1024xf32>
    %12 = arith.mulf %9, %11 : vector<4x1024xf32>
    %13 = vector.extract_strided_slice %5 {offsets = [0, 952], sizes = [4, 72], strides = [1, 1]} : vector<4x1024xf32> to vector<4x72xf32>
    %14 = vector.extract_strided_slice %5 {offsets = [0, 0], sizes = [4, 952], strides = [1, 1]} : vector<4x1024xf32> to vector<4x952xf32>
    %15 = tpu.concatenate %13, %14 in 1 : vector<4x72xf32>, vector<4x952xf32> -> vector<4x1024xf32>
    %16 = vector.extract_strided_slice %0 {offsets = [1, 0], sizes = [1, 1024], strides = [1, 1]} : vector<27x1024xf32> to vector<1x1024xf32>
    %17 = vector.broadcast %16 : vector<1x1024xf32> to vector<4x1024xf32>
    %18 = arith.mulf %15, %17 : vector<4x1024xf32>
    %19 = vector.extract_strided_slice %5 {offsets = [0, 953], sizes = [4, 71], strides = [1, 1]} : vector<4x1024xf32> to vector<4x71xf32>
    %20 = vector.extract_strided_slice %5 {offsets = [0, 0], sizes = [4, 953], strides = [1, 1]} : vector<4x1024xf32> to vector<4x953xf32>
    %21 = tpu.concatenate %19, %20 in 1 : vector<4x71xf32>, vector<4x953xf32> -> vector<4x1024xf32>
    %22 = vector.extract_strided_slice %0 {offsets = [2, 0], sizes = [1, 1024], strides = [1, 1]} : vector<27x1024xf32> to vector<1x1024xf32>
    %23 = vector.broadcast %22 : vector<1x1024xf32> to vector<4x1024xf32>
    %24 = arith.mulf %21, %23 : vector<4x1024xf32>
    %25 = vector.extract_strided_slice %5 {offsets = [0, 959], sizes = [4, 65], strides = [1, 1]} : vector<4x1024xf32> to vector<4x65xf32>
    %26 = vector.extract_strided_slice %5 {offsets = [0, 0], sizes = [4, 959], strides = [1, 1]} : vector<4x1024xf32> to vector<4x959xf32>
    %27 = tpu.concatenate %25, %26 in 1 : vector<4x65xf32>, vector<4x959xf32> -> vector<4x1024xf32>
    %28 = vector.extract_strided_slice %0 {offsets = [3, 0], sizes = [1, 1024], strides = [1, 1]} : vector<27x1024xf32> to vector<1x1024xf32>
    %29 = vector.broadcast %28 : vector<1x1024xf32> to vector<4x1024xf32>
    %30 = arith.mulf %27, %29 : vector<4x1024xf32>
    %31 = vector.extract_strided_slice %5 {offsets = [0, 960], sizes = [4, 64], strides = [1, 1]} : vector<4x1024xf32> to vector<4x64xf32>
    %32 = vector.extract_strided_slice %5 {offsets = [0, 0], sizes = [4, 960], strides = [1, 1]} : vector<4x1024xf32> to vector<4x960xf32>
    %33 = tpu.concatenate %31, %32 in 1 : vector<4x64xf32>, vector<4x960xf32> -> vector<4x1024xf32>
    %34 = vector.extract_strided_slice %0 {offsets = [4, 0], sizes = [1, 1024], strides = [1, 1]} : vector<27x1024xf32> to vector<1x1024xf32>
    %35 = vector.broadcast %34 : vector<1x1024xf32> to vector<4x1024xf32>
    %36 = arith.mulf %33, %35 : vector<4x1024xf32>
    %37 = vector.extract_strided_slice %5 {offsets = [0, 961], sizes = [4, 63], strides = [1, 1]} : vector<4x1024xf32> to vector<4x63xf32>
    %38 = vector.extract_strided_slice %5 {offsets = [0, 0], sizes = [4, 961], strides = [1, 1]} : vector<4x1024xf32> to vector<4x961xf32>
    %39 = tpu.concatenate %37, %38 in 1 : vector<4x63xf32>, vector<4x961xf32> -> vector<4x1024xf32>
    %40 = vector.extract_strided_slice %0 {offsets = [5, 0], sizes = [1, 1024], strides = [1, 1]} : vector<27x1024xf32> to vector<1x1024xf32>
    %41 = vector.broadcast %40 : vector<1x1024xf32> to vector<4x1024xf32>
    %42 = arith.mulf %39, %41 : vector<4x1024xf32>
    %43 = vector.extract_strided_slice %5 {offsets = [0, 967], sizes = [4, 57], strides = [1, 1]} : vector<4x1024xf32> to vector<4x57xf32>
    %44 = vector.extract_strided_slice %5 {offsets = [0, 0], sizes = [4, 967], strides = [1, 1]} : vector<4x1024xf32> to vector<4x967xf32>
    %45 = tpu.concatenate %43, %44 in 1 : vector<4x57xf32>, vector<4x967xf32> -> vector<4x1024xf32>
    %46 = vector.extract_strided_slice %0 {offsets = [6, 0], sizes = [1, 1024], strides = [1, 1]} : vector<27x1024xf32> to vector<1x1024xf32>
    %47 = vector.broadcast %46 : vector<1x1024xf32> to vector<4x1024xf32>
    %48 = arith.mulf %45, %47 : vector<4x1024xf32>
    %49 = vector.extract_strided_slice %5 {offsets = [0, 968], sizes = [4, 56], strides = [1, 1]} : vector<4x1024xf32> to vector<4x56xf32>
    %50 = vector.extract_strided_slice %5 {offsets = [0, 0], sizes = [4, 968], strides = [1, 1]} : vector<4x1024xf32> to vector<4x968xf32>
    %51 = tpu.concatenate %49, %50 in 1 : vector<4x56xf32>, vector<4x968xf32> -> vector<4x1024xf32>
    %52 = vector.extract_strided_slice %0 {offsets = [7, 0], sizes = [1, 1024], strides = [1, 1]} : vector<27x1024xf32> to vector<1x1024xf32>
    %53 = vector.broadcast %52 : vector<1x1024xf32> to vector<4x1024xf32>
    %54 = arith.mulf %51, %53 : vector<4x1024xf32>
    %55 = vector.extract_strided_slice %5 {offsets = [0, 969], sizes = [4, 55], strides = [1, 1]} : vector<4x1024xf32> to vector<4x55xf32>
    %56 = vector.extract_strided_slice %5 {offsets = [0, 0], sizes = [4, 969], strides = [1, 1]} : vector<4x1024xf32> to vector<4x969xf32>
    %57 = tpu.concatenate %55, %56 in 1 : vector<4x55xf32>, vector<4x969xf32> -> vector<4x1024xf32>
    %58 = vector.extract_strided_slice %0 {offsets = [8, 0], sizes = [1, 1024], strides = [1, 1]} : vector<27x1024xf32> to vector<1x1024xf32>
    %59 = vector.broadcast %58 : vector<1x1024xf32> to vector<4x1024xf32>
    %60 = arith.mulf %57, %59 : vector<4x1024xf32>
    %61 = vector.extract_strided_slice %5 {offsets = [0, 1015], sizes = [4, 9], strides = [1, 1]} : vector<4x1024xf32> to vector<4x9xf32>
    %62 = vector.extract_strided_slice %5 {offsets = [0, 0], sizes = [4, 1015], strides = [1, 1]} : vector<4x1024xf32> to vector<4x1015xf32>
    %63 = tpu.concatenate %61, %62 in 1 : vector<4x9xf32>, vector<4x1015xf32> -> vector<4x1024xf32>
    %64 = vector.extract_strided_slice %0 {offsets = [9, 0], sizes = [1, 1024], strides = [1, 1]} : vector<27x1024xf32> to vector<1x1024xf32>
    %65 = vector.broadcast %64 : vector<1x1024xf32> to vector<4x1024xf32>
    %66 = arith.mulf %63, %65 : vector<4x1024xf32>
    %67 = vector.extract_strided_slice %5 {offsets = [0, 1016], sizes = [4, 8], strides = [1, 1]} : vector<4x1024xf32> to vector<4x8xf32>
    %68 = vector.extract_strided_slice %5 {offsets = [0, 0], sizes = [4, 1016], strides = [1, 1]} : vector<4x1024xf32> to vector<4x1016xf32>
    %69 = tpu.concatenate %67, %68 in 1 : vector<4x8xf32>, vector<4x1016xf32> -> vector<4x1024xf32>
    %70 = vector.extract_strided_slice %0 {offsets = [10, 0], sizes = [1, 1024], strides = [1, 1]} : vector<27x1024xf32> to vector<1x1024xf32>
    %71 = vector.broadcast %70 : vector<1x1024xf32> to vector<4x1024xf32>
    %72 = arith.mulf %69, %71 : vector<4x1024xf32>
    %73 = vector.extract_strided_slice %5 {offsets = [0, 1017], sizes = [4, 7], strides = [1, 1]} : vector<4x1024xf32> to vector<4x7xf32>
    %74 = vector.extract_strided_slice %5 {offsets = [0, 0], sizes = [4, 1017], strides = [1, 1]} : vector<4x1024xf32> to vector<4x1017xf32>
    %75 = tpu.concatenate %73, %74 in 1 : vector<4x7xf32>, vector<4x1017xf32> -> vector<4x1024xf32>
    %76 = vector.extract_strided_slice %0 {offsets = [11, 0], sizes = [1, 1024], strides = [1, 1]} : vector<27x1024xf32> to vector<1x1024xf32>
    %77 = vector.broadcast %76 : vector<1x1024xf32> to vector<4x1024xf32>
    %78 = arith.mulf %75, %77 : vector<4x1024xf32>
    %79 = vector.extract_strided_slice %5 {offsets = [0, 1023], sizes = [4, 1], strides = [1, 1]} : vector<4x1024xf32> to vector<4x1xf32>
    %80 = vector.extract_strided_slice %5 {offsets = [0, 0], sizes = [4, 1023], strides = [1, 1]} : vector<4x1024xf32> to vector<4x1023xf32>
    %81 = tpu.concatenate %79, %80 in 1 : vector<4x1xf32>, vector<4x1023xf32> -> vector<4x1024xf32>
    %82 = vector.extract_strided_slice %0 {offsets = [12, 0], sizes = [1, 1024], strides = [1, 1]} : vector<27x1024xf32> to vector<1x1024xf32>
    %83 = vector.broadcast %82 : vector<1x1024xf32> to vector<4x1024xf32>
    %84 = arith.mulf %81, %83 : vector<4x1024xf32>
    %85 = vector.extract_strided_slice %0 {offsets = [13, 0], sizes = [1, 1024], strides = [1, 1]} : vector<27x1024xf32> to vector<1x1024xf32>
    %86 = vector.broadcast %85 : vector<1x1024xf32> to vector<4x1024xf32>
    %87 = arith.mulf %5, %86 : vector<4x1024xf32>
    %88 = vector.extract_strided_slice %5 {offsets = [0, 1], sizes = [4, 1023], strides = [1, 1]} : vector<4x1024xf32> to vector<4x1023xf32>
    %89 = vector.extract_strided_slice %5 {offsets = [0, 0], sizes = [4, 1], strides = [1, 1]} : vector<4x1024xf32> to vector<4x1xf32>
    %90 = tpu.concatenate %88, %89 in 1 : vector<4x1023xf32>, vector<4x1xf32> -> vector<4x1024xf32>
    %91 = vector.extract_strided_slice %0 {offsets = [14, 0], sizes = [1, 1024], strides = [1, 1]} : vector<27x1024xf32> to vector<1x1024xf32>
    %92 = vector.broadcast %91 : vector<1x1024xf32> to vector<4x1024xf32>
    %93 = arith.mulf %90, %92 : vector<4x1024xf32>
    %94 = vector.extract_strided_slice %5 {offsets = [0, 7], sizes = [4, 1017], strides = [1, 1]} : vector<4x1024xf32> to vector<4x1017xf32>
    %95 = vector.extract_strided_slice %5 {offsets = [0, 0], sizes = [4, 7], strides = [1, 1]} : vector<4x1024xf32> to vector<4x7xf32>
    %96 = tpu.concatenate %94, %95 in 1 : vector<4x1017xf32>, vector<4x7xf32> -> vector<4x1024xf32>
    %97 = vector.extract_strided_slice %0 {offsets = [15, 0], sizes = [1, 1024], strides = [1, 1]} : vector<27x1024xf32> to vector<1x1024xf32>
    %98 = vector.broadcast %97 : vector<1x1024xf32> to vector<4x1024xf32>
    %99 = arith.mulf %96, %98 : vector<4x1024xf32>
    %100 = vector.extract_strided_slice %5 {offsets = [0, 8], sizes = [4, 1016], strides = [1, 1]} : vector<4x1024xf32> to vector<4x1016xf32>
    %101 = vector.extract_strided_slice %5 {offsets = [0, 0], sizes = [4, 8], strides = [1, 1]} : vector<4x1024xf32> to vector<4x8xf32>
    %102 = tpu.concatenate %100, %101 in 1 : vector<4x1016xf32>, vector<4x8xf32> -> vector<4x1024xf32>
    %103 = vector.extract_strided_slice %0 {offsets = [16, 0], sizes = [1, 1024], strides = [1, 1]} : vector<27x1024xf32> to vector<1x1024xf32>
    %104 = vector.broadcast %103 : vector<1x1024xf32> to vector<4x1024xf32>
    %105 = arith.mulf %102, %104 : vector<4x1024xf32>
    %106 = vector.extract_strided_slice %5 {offsets = [0, 9], sizes = [4, 1015], strides = [1, 1]} : vector<4x1024xf32> to vector<4x1015xf32>
    %107 = vector.extract_strided_slice %5 {offsets = [0, 0], sizes = [4, 9], strides = [1, 1]} : vector<4x1024xf32> to vector<4x9xf32>
    %108 = tpu.concatenate %106, %107 in 1 : vector<4x1015xf32>, vector<4x9xf32> -> vector<4x1024xf32>
    %109 = vector.extract_strided_slice %0 {offsets = [17, 0], sizes = [1, 1024], strides = [1, 1]} : vector<27x1024xf32> to vector<1x1024xf32>
    %110 = vector.broadcast %109 : vector<1x1024xf32> to vector<4x1024xf32>
    %111 = arith.mulf %108, %110 : vector<4x1024xf32>
    %112 = vector.extract_strided_slice %5 {offsets = [0, 55], sizes = [4, 969], strides = [1, 1]} : vector<4x1024xf32> to vector<4x969xf32>
    %113 = vector.extract_strided_slice %5 {offsets = [0, 0], sizes = [4, 55], strides = [1, 1]} : vector<4x1024xf32> to vector<4x55xf32>
    %114 = tpu.concatenate %112, %113 in 1 : vector<4x969xf32>, vector<4x55xf32> -> vector<4x1024xf32>
    %115 = vector.extract_strided_slice %0 {offsets = [18, 0], sizes = [1, 1024], strides = [1, 1]} : vector<27x1024xf32> to vector<1x1024xf32>
    %116 = vector.broadcast %115 : vector<1x1024xf32> to vector<4x1024xf32>
    %117 = arith.mulf %114, %116 : vector<4x1024xf32>
    %118 = vector.extract_strided_slice %5 {offsets = [0, 56], sizes = [4, 968], strides = [1, 1]} : vector<4x1024xf32> to vector<4x968xf32>
    %119 = vector.extract_strided_slice %5 {offsets = [0, 0], sizes = [4, 56], strides = [1, 1]} : vector<4x1024xf32> to vector<4x56xf32>
    %120 = tpu.concatenate %118, %119 in 1 : vector<4x968xf32>, vector<4x56xf32> -> vector<4x1024xf32>
    %121 = vector.extract_strided_slice %0 {offsets = [19, 0], sizes = [1, 1024], strides = [1, 1]} : vector<27x1024xf32> to vector<1x1024xf32>
    %122 = vector.broadcast %121 : vector<1x1024xf32> to vector<4x1024xf32>
    %123 = arith.mulf %120, %122 : vector<4x1024xf32>
    %124 = vector.extract_strided_slice %5 {offsets = [0, 57], sizes = [4, 967], strides = [1, 1]} : vector<4x1024xf32> to vector<4x967xf32>
    %125 = vector.extract_strided_slice %5 {offsets = [0, 0], sizes = [4, 57], strides = [1, 1]} : vector<4x1024xf32> to vector<4x57xf32>
    %126 = tpu.concatenate %124, %125 in 1 : vector<4x967xf32>, vector<4x57xf32> -> vector<4x1024xf32>
    %127 = vector.extract_strided_slice %0 {offsets = [20, 0], sizes = [1, 1024], strides = [1, 1]} : vector<27x1024xf32> to vector<1x1024xf32>
    %128 = vector.broadcast %127 : vector<1x1024xf32> to vector<4x1024xf32>
    %129 = arith.mulf %126, %128 : vector<4x1024xf32>
    %130 = vector.extract_strided_slice %5 {offsets = [0, 63], sizes = [4, 961], strides = [1, 1]} : vector<4x1024xf32> to vector<4x961xf32>
    %131 = vector.extract_strided_slice %5 {offsets = [0, 0], sizes = [4, 63], strides = [1, 1]} : vector<4x1024xf32> to vector<4x63xf32>
    %132 = tpu.concatenate %130, %131 in 1 : vector<4x961xf32>, vector<4x63xf32> -> vector<4x1024xf32>
    %133 = vector.extract_strided_slice %0 {offsets = [21, 0], sizes = [1, 1024], strides = [1, 1]} : vector<27x1024xf32> to vector<1x1024xf32>
    %134 = vector.broadcast %133 : vector<1x1024xf32> to vector<4x1024xf32>
    %135 = arith.mulf %132, %134 : vector<4x1024xf32>
    %136 = vector.extract_strided_slice %5 {offsets = [0, 64], sizes = [4, 960], strides = [1, 1]} : vector<4x1024xf32> to vector<4x960xf32>
    %137 = vector.extract_strided_slice %5 {offsets = [0, 0], sizes = [4, 64], strides = [1, 1]} : vector<4x1024xf32> to vector<4x64xf32>
    %138 = tpu.concatenate %136, %137 in 1 : vector<4x960xf32>, vector<4x64xf32> -> vector<4x1024xf32>
    %139 = vector.extract_strided_slice %0 {offsets = [22, 0], sizes = [1, 1024], strides = [1, 1]} : vector<27x1024xf32> to vector<1x1024xf32>
    %140 = vector.broadcast %139 : vector<1x1024xf32> to vector<4x1024xf32>
    %141 = arith.mulf %138, %140 : vector<4x1024xf32>
    %142 = vector.extract_strided_slice %5 {offsets = [0, 65], sizes = [4, 959], strides = [1, 1]} : vector<4x1024xf32> to vector<4x959xf32>
    %143 = vector.extract_strided_slice %5 {offsets = [0, 0], sizes = [4, 65], strides = [1, 1]} : vector<4x1024xf32> to vector<4x65xf32>
    %144 = tpu.concatenate %142, %143 in 1 : vector<4x959xf32>, vector<4x65xf32> -> vector<4x1024xf32>
    %145 = vector.extract_strided_slice %0 {offsets = [23, 0], sizes = [1, 1024], strides = [1, 1]} : vector<27x1024xf32> to vector<1x1024xf32>
    %146 = vector.broadcast %145 : vector<1x1024xf32> to vector<4x1024xf32>
    %147 = arith.mulf %144, %146 : vector<4x1024xf32>
    %148 = vector.extract_strided_slice %5 {offsets = [0, 71], sizes = [4, 953], strides = [1, 1]} : vector<4x1024xf32> to vector<4x953xf32>
    %149 = vector.extract_strided_slice %5 {offsets = [0, 0], sizes = [4, 71], strides = [1, 1]} : vector<4x1024xf32> to vector<4x71xf32>
    %150 = tpu.concatenate %148, %149 in 1 : vector<4x953xf32>, vector<4x71xf32> -> vector<4x1024xf32>
    %151 = vector.extract_strided_slice %0 {offsets = [24, 0], sizes = [1, 1024], strides = [1, 1]} : vector<27x1024xf32> to vector<1x1024xf32>
    %152 = vector.broadcast %151 : vector<1x1024xf32> to vector<4x1024xf32>
    %153 = arith.mulf %150, %152 : vector<4x1024xf32>
    %154 = vector.extract_strided_slice %5 {offsets = [0, 72], sizes = [4, 952], strides = [1, 1]} : vector<4x1024xf32> to vector<4x952xf32>
    %155 = vector.extract_strided_slice %5 {offsets = [0, 0], sizes = [4, 72], strides = [1, 1]} : vector<4x1024xf32> to vector<4x72xf32>
    %156 = tpu.concatenate %154, %155 in 1 : vector<4x952xf32>, vector<4x72xf32> -> vector<4x1024xf32>
    %157 = vector.extract_strided_slice %0 {offsets = [25, 0], sizes = [1, 1024], strides = [1, 1]} : vector<27x1024xf32> to vector<1x1024xf32>
    %158 = vector.broadcast %157 : vector<1x1024xf32> to vector<4x1024xf32>
    %159 = arith.mulf %156, %158 : vector<4x1024xf32>
    %160 = vector.extract_strided_slice %5 {offsets = [0, 73], sizes = [4, 951], strides = [1, 1]} : vector<4x1024xf32> to vector<4x951xf32>
    %161 = vector.extract_strided_slice %5 {offsets = [0, 0], sizes = [4, 73], strides = [1, 1]} : vector<4x1024xf32> to vector<4x73xf32>
    %162 = tpu.concatenate %160, %161 in 1 : vector<4x951xf32>, vector<4x73xf32> -> vector<4x1024xf32>
    %163 = vector.extract_strided_slice %0 {offsets = [26, 0], sizes = [1, 1024], strides = [1, 1]} : vector<27x1024xf32> to vector<1x1024xf32>
    %164 = vector.broadcast %163 : vector<1x1024xf32> to vector<4x1024xf32>
    %165 = arith.mulf %162, %164 : vector<4x1024xf32>
    %166 = tpu.concatenate %12, %18, %24, %30, %36, %42, %48, %54, %60, %66, %72, %78, %84, %87, %93, %99 in 0 : vector<4x1024xf32>, vector<4x1024xf32>, vector<4x1024xf32>, vector<4x1024xf32>, vector<4x1024xf32>, vector<4x1024xf32>, vector<4x1024xf32>, vector<4x1024xf32>, vector<4x1024xf32>, vector<4x1024xf32>, vector<4x1024xf32>, vector<4x1024xf32>, vector<4x1024xf32>, vector<4x1024xf32>, vector<4x1024xf32>, vector<4x1024xf32> -> vector<64x1024xf32>
    %167 = tpu.concatenate %105, %111, %117, %123, %129, %135, %141, %147, %153, %159, %165 in 0 : vector<4x1024xf32>, vector<4x1024xf32>, vector<4x1024xf32>, vector<4x1024xf32>, vector<4x1024xf32>, vector<4x1024xf32>, vector<4x1024xf32>, vector<4x1024xf32>, vector<4x1024xf32>, vector<4x1024xf32>, vector<4x1024xf32> -> vector<44x1024xf32>
    %168 = tpu.concatenate %166, %167 in 0 : vector<64x1024xf32>, vector<44x1024xf32> -> vector<108x1024xf32>
    %cst = arith.constant dense<0.000000e+00> : vector<8x1024xf32>
    %169 = tpu.matmul %6, %168, %cst {dimension_numbers = #tpu.dot_dimension_numbers<[1], [0], [0], [1], [0, 0, 1, 1], [], []>} : vector<8x108xf32>, vector<108x1024xf32>, vector<8x1024xf32> -> vector<8x1024xf32>
    %c0_8 = arith.constant 0 : index
    %c0_9 = arith.constant 0 : index
    %170 = vector.load %arg3[%c0_8, %c0_9] : memref<8x1xf32, #tpu.memory_space<vmem>>, vector<8x1xf32>
    %c0_10 = arith.constant 0 : index
    %c0_11 = arith.constant 0 : index
    %171 = vector.load %arg4[%c0_10, %c0_11] : memref<8x1xf32, #tpu.memory_space<vmem>>, vector<8x1xf32>
    %cst_12 = arith.constant dense<0.000000e+00> : vector<8xf32>
    %172 = vector.multi_reduction <add>, %169, %cst_12 [1] : vector<8x1024xf32> to vector<8xf32>
    %173 = vector.shape_cast %172 : vector<8xf32> to vector<8x1xf32>
    %174 = arith.mulf %169, %169 : vector<8x1024xf32>
    %cst_13 = arith.constant dense<0.000000e+00> : vector<8xf32>
    %175 = vector.multi_reduction <add>, %174, %cst_13 [1] : vector<8x1024xf32> to vector<8xf32>
    %176 = vector.shape_cast %175 : vector<8xf32> to vector<8x1xf32>
    %cst_14 = arith.constant 9.765625E-4 : f32
    %177 = vector.broadcast %cst_14 : f32 to vector<8x1xf32>
    %178 = arith.mulf %173, %177 : vector<8x1xf32>
    %cst_15 = arith.constant 9.765625E-4 : f32
    %179 = vector.broadcast %cst_15 : f32 to vector<8x1xf32>
    %180 = arith.mulf %176, %179 : vector<8x1xf32>
    %181 = arith.mulf %178, %178 : vector<8x1xf32>
    %182 = arith.subf %180, %181 : vector<8x1xf32>
    %183 = vector.broadcast %178 : vector<8x1xf32> to vector<8x1024xf32>
    %184 = arith.subf %169, %183 : vector<8x1024xf32>
    %cst_16 = arith.constant 9.99999974E-6 : f32
    %185 = vector.broadcast %cst_16 : f32 to vector<8x1xf32>
    %186 = arith.addf %182, %185 : vector<8x1xf32>
    %187 = math.rsqrt %186 : vector<8x1xf32>
    %188 = vector.broadcast %187 : vector<8x1xf32> to vector<8x1024xf32>
    %189 = arith.mulf %184, %188 : vector<8x1024xf32>
    %190 = vector.broadcast %170 : vector<8x1xf32> to vector<8x1024xf32>
    %191 = arith.mulf %189, %190 : vector<8x1024xf32>
    %192 = vector.broadcast %171 : vector<8x1xf32> to vector<8x1024xf32>
    %193 = arith.addf %191, %192 : vector<8x1024xf32>
    %cst_17 = arith.constant 0.000000e+00 : f32
    %194 = vector.broadcast %cst_17 : f32 to vector<8x1024xf32>
    %195 = arith.maximumf %193, %194 : vector<8x1024xf32>
    %c0_18 = arith.constant 0 : index
    %c0_19 = arith.constant 0 : index
    %196 = vector.load %arg2[%c0_18, %c0_19] : memref<8x216xf32, #tpu.memory_space<vmem>>, vector<8x216xf32>
    %197 = vector.extract_strided_slice %195 {offsets = [0, 951], sizes = [8, 73], strides = [1, 1]} : vector<8x1024xf32> to vector<8x73xf32>
    %198 = vector.extract_strided_slice %195 {offsets = [0, 0], sizes = [8, 951], strides = [1, 1]} : vector<8x1024xf32> to vector<8x951xf32>
    %199 = tpu.concatenate %197, %198 in 1 : vector<8x73xf32>, vector<8x951xf32> -> vector<8x1024xf32>
    %200 = vector.extract_strided_slice %0 {offsets = [0, 0], sizes = [1, 1024], strides = [1, 1]} : vector<27x1024xf32> to vector<1x1024xf32>
    %201 = vector.broadcast %200 : vector<1x1024xf32> to vector<8x1024xf32>
    %202 = arith.mulf %199, %201 : vector<8x1024xf32>
    %203 = vector.extract_strided_slice %195 {offsets = [0, 952], sizes = [8, 72], strides = [1, 1]} : vector<8x1024xf32> to vector<8x72xf32>
    %204 = vector.extract_strided_slice %195 {offsets = [0, 0], sizes = [8, 952], strides = [1, 1]} : vector<8x1024xf32> to vector<8x952xf32>
    %205 = tpu.concatenate %203, %204 in 1 : vector<8x72xf32>, vector<8x952xf32> -> vector<8x1024xf32>
    %206 = vector.extract_strided_slice %0 {offsets = [1, 0], sizes = [1, 1024], strides = [1, 1]} : vector<27x1024xf32> to vector<1x1024xf32>
    %207 = vector.broadcast %206 : vector<1x1024xf32> to vector<8x1024xf32>
    %208 = arith.mulf %205, %207 : vector<8x1024xf32>
    %209 = vector.extract_strided_slice %195 {offsets = [0, 953], sizes = [8, 71], strides = [1, 1]} : vector<8x1024xf32> to vector<8x71xf32>
    %210 = vector.extract_strided_slice %195 {offsets = [0, 0], sizes = [8, 953], strides = [1, 1]} : vector<8x1024xf32> to vector<8x953xf32>
    %211 = tpu.concatenate %209, %210 in 1 : vector<8x71xf32>, vector<8x953xf32> -> vector<8x1024xf32>
    %212 = vector.extract_strided_slice %0 {offsets = [2, 0], sizes = [1, 1024], strides = [1, 1]} : vector<27x1024xf32> to vector<1x1024xf32>
    %213 = vector.broadcast %212 : vector<1x1024xf32> to vector<8x1024xf32>
    %214 = arith.mulf %211, %213 : vector<8x1024xf32>
    %215 = vector.extract_strided_slice %195 {offsets = [0, 959], sizes = [8, 65], strides = [1, 1]} : vector<8x1024xf32> to vector<8x65xf32>
    %216 = vector.extract_strided_slice %195 {offsets = [0, 0], sizes = [8, 959], strides = [1, 1]} : vector<8x1024xf32> to vector<8x959xf32>
    %217 = tpu.concatenate %215, %216 in 1 : vector<8x65xf32>, vector<8x959xf32> -> vector<8x1024xf32>
    %218 = vector.extract_strided_slice %0 {offsets = [3, 0], sizes = [1, 1024], strides = [1, 1]} : vector<27x1024xf32> to vector<1x1024xf32>
    %219 = vector.broadcast %218 : vector<1x1024xf32> to vector<8x1024xf32>
    %220 = arith.mulf %217, %219 : vector<8x1024xf32>
    %221 = vector.extract_strided_slice %195 {offsets = [0, 960], sizes = [8, 64], strides = [1, 1]} : vector<8x1024xf32> to vector<8x64xf32>
    %222 = vector.extract_strided_slice %195 {offsets = [0, 0], sizes = [8, 960], strides = [1, 1]} : vector<8x1024xf32> to vector<8x960xf32>
    %223 = tpu.concatenate %221, %222 in 1 : vector<8x64xf32>, vector<8x960xf32> -> vector<8x1024xf32>
    %224 = vector.extract_strided_slice %0 {offsets = [4, 0], sizes = [1, 1024], strides = [1, 1]} : vector<27x1024xf32> to vector<1x1024xf32>
    %225 = vector.broadcast %224 : vector<1x1024xf32> to vector<8x1024xf32>
    %226 = arith.mulf %223, %225 : vector<8x1024xf32>
    %227 = vector.extract_strided_slice %195 {offsets = [0, 961], sizes = [8, 63], strides = [1, 1]} : vector<8x1024xf32> to vector<8x63xf32>
    %228 = vector.extract_strided_slice %195 {offsets = [0, 0], sizes = [8, 961], strides = [1, 1]} : vector<8x1024xf32> to vector<8x961xf32>
    %229 = tpu.concatenate %227, %228 in 1 : vector<8x63xf32>, vector<8x961xf32> -> vector<8x1024xf32>
    %230 = vector.extract_strided_slice %0 {offsets = [5, 0], sizes = [1, 1024], strides = [1, 1]} : vector<27x1024xf32> to vector<1x1024xf32>
    %231 = vector.broadcast %230 : vector<1x1024xf32> to vector<8x1024xf32>
    %232 = arith.mulf %229, %231 : vector<8x1024xf32>
    %233 = vector.extract_strided_slice %195 {offsets = [0, 967], sizes = [8, 57], strides = [1, 1]} : vector<8x1024xf32> to vector<8x57xf32>
    %234 = vector.extract_strided_slice %195 {offsets = [0, 0], sizes = [8, 967], strides = [1, 1]} : vector<8x1024xf32> to vector<8x967xf32>
    %235 = tpu.concatenate %233, %234 in 1 : vector<8x57xf32>, vector<8x967xf32> -> vector<8x1024xf32>
    %236 = vector.extract_strided_slice %0 {offsets = [6, 0], sizes = [1, 1024], strides = [1, 1]} : vector<27x1024xf32> to vector<1x1024xf32>
    %237 = vector.broadcast %236 : vector<1x1024xf32> to vector<8x1024xf32>
    %238 = arith.mulf %235, %237 : vector<8x1024xf32>
    %239 = vector.extract_strided_slice %195 {offsets = [0, 968], sizes = [8, 56], strides = [1, 1]} : vector<8x1024xf32> to vector<8x56xf32>
    %240 = vector.extract_strided_slice %195 {offsets = [0, 0], sizes = [8, 968], strides = [1, 1]} : vector<8x1024xf32> to vector<8x968xf32>
    %241 = tpu.concatenate %239, %240 in 1 : vector<8x56xf32>, vector<8x968xf32> -> vector<8x1024xf32>
    %242 = vector.extract_strided_slice %0 {offsets = [7, 0], sizes = [1, 1024], strides = [1, 1]} : vector<27x1024xf32> to vector<1x1024xf32>
    %243 = vector.broadcast %242 : vector<1x1024xf32> to vector<8x1024xf32>
    %244 = arith.mulf %241, %243 : vector<8x1024xf32>
    %245 = vector.extract_strided_slice %195 {offsets = [0, 969], sizes = [8, 55], strides = [1, 1]} : vector<8x1024xf32> to vector<8x55xf32>
    %246 = vector.extract_strided_slice %195 {offsets = [0, 0], sizes = [8, 969], strides = [1, 1]} : vector<8x1024xf32> to vector<8x969xf32>
    %247 = tpu.concatenate %245, %246 in 1 : vector<8x55xf32>, vector<8x969xf32> -> vector<8x1024xf32>
    %248 = vector.extract_strided_slice %0 {offsets = [8, 0], sizes = [1, 1024], strides = [1, 1]} : vector<27x1024xf32> to vector<1x1024xf32>
    %249 = vector.broadcast %248 : vector<1x1024xf32> to vector<8x1024xf32>
    %250 = arith.mulf %247, %249 : vector<8x1024xf32>
    %251 = vector.extract_strided_slice %195 {offsets = [0, 1015], sizes = [8, 9], strides = [1, 1]} : vector<8x1024xf32> to vector<8x9xf32>
    %252 = vector.extract_strided_slice %195 {offsets = [0, 0], sizes = [8, 1015], strides = [1, 1]} : vector<8x1024xf32> to vector<8x1015xf32>
    %253 = tpu.concatenate %251, %252 in 1 : vector<8x9xf32>, vector<8x1015xf32> -> vector<8x1024xf32>
    %254 = vector.extract_strided_slice %0 {offsets = [9, 0], sizes = [1, 1024], strides = [1, 1]} : vector<27x1024xf32> to vector<1x1024xf32>
    %255 = vector.broadcast %254 : vector<1x1024xf32> to vector<8x1024xf32>
    %256 = arith.mulf %253, %255 : vector<8x1024xf32>
    %257 = vector.extract_strided_slice %195 {offsets = [0, 1016], sizes = [8, 8], strides = [1, 1]} : vector<8x1024xf32> to vector<8x8xf32>
    %258 = vector.extract_strided_slice %195 {offsets = [0, 0], sizes = [8, 1016], strides = [1, 1]} : vector<8x1024xf32> to vector<8x1016xf32>
    %259 = tpu.concatenate %257, %258 in 1 : vector<8x8xf32>, vector<8x1016xf32> -> vector<8x1024xf32>
    %260 = vector.extract_strided_slice %0 {offsets = [10, 0], sizes = [1, 1024], strides = [1, 1]} : vector<27x1024xf32> to vector<1x1024xf32>
    %261 = vector.broadcast %260 : vector<1x1024xf32> to vector<8x1024xf32>
    %262 = arith.mulf %259, %261 : vector<8x1024xf32>
    %263 = vector.extract_strided_slice %195 {offsets = [0, 1017], sizes = [8, 7], strides = [1, 1]} : vector<8x1024xf32> to vector<8x7xf32>
    %264 = vector.extract_strided_slice %195 {offsets = [0, 0], sizes = [8, 1017], strides = [1, 1]} : vector<8x1024xf32> to vector<8x1017xf32>
    %265 = tpu.concatenate %263, %264 in 1 : vector<8x7xf32>, vector<8x1017xf32> -> vector<8x1024xf32>
    %266 = vector.extract_strided_slice %0 {offsets = [11, 0], sizes = [1, 1024], strides = [1, 1]} : vector<27x1024xf32> to vector<1x1024xf32>
    %267 = vector.broadcast %266 : vector<1x1024xf32> to vector<8x1024xf32>
    %268 = arith.mulf %265, %267 : vector<8x1024xf32>
    %269 = vector.extract_strided_slice %195 {offsets = [0, 1023], sizes = [8, 1], strides = [1, 1]} : vector<8x1024xf32> to vector<8x1xf32>
    %270 = vector.extract_strided_slice %195 {offsets = [0, 0], sizes = [8, 1023], strides = [1, 1]} : vector<8x1024xf32> to vector<8x1023xf32>
    %271 = tpu.concatenate %269, %270 in 1 : vector<8x1xf32>, vector<8x1023xf32> -> vector<8x1024xf32>
    %272 = vector.extract_strided_slice %0 {offsets = [12, 0], sizes = [1, 1024], strides = [1, 1]} : vector<27x1024xf32> to vector<1x1024xf32>
    %273 = vector.broadcast %272 : vector<1x1024xf32> to vector<8x1024xf32>
    %274 = arith.mulf %271, %273 : vector<8x1024xf32>
    %275 = vector.extract_strided_slice %0 {offsets = [13, 0], sizes = [1, 1024], strides = [1, 1]} : vector<27x1024xf32> to vector<1x1024xf32>
    %276 = vector.broadcast %275 : vector<1x1024xf32> to vector<8x1024xf32>
    %277 = arith.mulf %195, %276 : vector<8x1024xf32>
    %278 = vector.extract_strided_slice %195 {offsets = [0, 1], sizes = [8, 1023], strides = [1, 1]} : vector<8x1024xf32> to vector<8x1023xf32>
    %279 = vector.extract_strided_slice %195 {offsets = [0, 0], sizes = [8, 1], strides = [1, 1]} : vector<8x1024xf32> to vector<8x1xf32>
    %280 = tpu.concatenate %278, %279 in 1 : vector<8x1023xf32>, vector<8x1xf32> -> vector<8x1024xf32>
    %281 = vector.extract_strided_slice %0 {offsets = [14, 0], sizes = [1, 1024], strides = [1, 1]} : vector<27x1024xf32> to vector<1x1024xf32>
    %282 = vector.broadcast %281 : vector<1x1024xf32> to vector<8x1024xf32>
    %283 = arith.mulf %280, %282 : vector<8x1024xf32>
    %284 = vector.extract_strided_slice %195 {offsets = [0, 7], sizes = [8, 1017], strides = [1, 1]} : vector<8x1024xf32> to vector<8x1017xf32>
    %285 = vector.extract_strided_slice %195 {offsets = [0, 0], sizes = [8, 7], strides = [1, 1]} : vector<8x1024xf32> to vector<8x7xf32>
    %286 = tpu.concatenate %284, %285 in 1 : vector<8x1017xf32>, vector<8x7xf32> -> vector<8x1024xf32>
    %287 = vector.extract_strided_slice %0 {offsets = [15, 0], sizes = [1, 1024], strides = [1, 1]} : vector<27x1024xf32> to vector<1x1024xf32>
    %288 = vector.broadcast %287 : vector<1x1024xf32> to vector<8x1024xf32>
    %289 = arith.mulf %286, %288 : vector<8x1024xf32>
    %290 = vector.extract_strided_slice %195 {offsets = [0, 8], sizes = [8, 1016], strides = [1, 1]} : vector<8x1024xf32> to vector<8x1016xf32>
    %291 = vector.extract_strided_slice %195 {offsets = [0, 0], sizes = [8, 8], strides = [1, 1]} : vector<8x1024xf32> to vector<8x8xf32>
    %292 = tpu.concatenate %290, %291 in 1 : vector<8x1016xf32>, vector<8x8xf32> -> vector<8x1024xf32>
    %293 = vector.extract_strided_slice %0 {offsets = [16, 0], sizes = [1, 1024], strides = [1, 1]} : vector<27x1024xf32> to vector<1x1024xf32>
    %294 = vector.broadcast %293 : vector<1x1024xf32> to vector<8x1024xf32>
    %295 = arith.mulf %292, %294 : vector<8x1024xf32>
    %296 = vector.extract_strided_slice %195 {offsets = [0, 9], sizes = [8, 1015], strides = [1, 1]} : vector<8x1024xf32> to vector<8x1015xf32>
    %297 = vector.extract_strided_slice %195 {offsets = [0, 0], sizes = [8, 9], strides = [1, 1]} : vector<8x1024xf32> to vector<8x9xf32>
    %298 = tpu.concatenate %296, %297 in 1 : vector<8x1015xf32>, vector<8x9xf32> -> vector<8x1024xf32>
    %299 = vector.extract_strided_slice %0 {offsets = [17, 0], sizes = [1, 1024], strides = [1, 1]} : vector<27x1024xf32> to vector<1x1024xf32>
    %300 = vector.broadcast %299 : vector<1x1024xf32> to vector<8x1024xf32>
    %301 = arith.mulf %298, %300 : vector<8x1024xf32>
    %302 = vector.extract_strided_slice %195 {offsets = [0, 55], sizes = [8, 969], strides = [1, 1]} : vector<8x1024xf32> to vector<8x969xf32>
    %303 = vector.extract_strided_slice %195 {offsets = [0, 0], sizes = [8, 55], strides = [1, 1]} : vector<8x1024xf32> to vector<8x55xf32>
    %304 = tpu.concatenate %302, %303 in 1 : vector<8x969xf32>, vector<8x55xf32> -> vector<8x1024xf32>
    %305 = vector.extract_strided_slice %0 {offsets = [18, 0], sizes = [1, 1024], strides = [1, 1]} : vector<27x1024xf32> to vector<1x1024xf32>
    %306 = vector.broadcast %305 : vector<1x1024xf32> to vector<8x1024xf32>
    %307 = arith.mulf %304, %306 : vector<8x1024xf32>
    %308 = vector.extract_strided_slice %195 {offsets = [0, 56], sizes = [8, 968], strides = [1, 1]} : vector<8x1024xf32> to vector<8x968xf32>
    %309 = vector.extract_strided_slice %195 {offsets = [0, 0], sizes = [8, 56], strides = [1, 1]} : vector<8x1024xf32> to vector<8x56xf32>
    %310 = tpu.concatenate %308, %309 in 1 : vector<8x968xf32>, vector<8x56xf32> -> vector<8x1024xf32>
    %311 = vector.extract_strided_slice %0 {offsets = [19, 0], sizes = [1, 1024], strides = [1, 1]} : vector<27x1024xf32> to vector<1x1024xf32>
    %312 = vector.broadcast %311 : vector<1x1024xf32> to vector<8x1024xf32>
    %313 = arith.mulf %310, %312 : vector<8x1024xf32>
    %314 = vector.extract_strided_slice %195 {offsets = [0, 57], sizes = [8, 967], strides = [1, 1]} : vector<8x1024xf32> to vector<8x967xf32>
    %315 = vector.extract_strided_slice %195 {offsets = [0, 0], sizes = [8, 57], strides = [1, 1]} : vector<8x1024xf32> to vector<8x57xf32>
    %316 = tpu.concatenate %314, %315 in 1 : vector<8x967xf32>, vector<8x57xf32> -> vector<8x1024xf32>
    %317 = vector.extract_strided_slice %0 {offsets = [20, 0], sizes = [1, 1024], strides = [1, 1]} : vector<27x1024xf32> to vector<1x1024xf32>
    %318 = vector.broadcast %317 : vector<1x1024xf32> to vector<8x1024xf32>
    %319 = arith.mulf %316, %318 : vector<8x1024xf32>
    %320 = vector.extract_strided_slice %195 {offsets = [0, 63], sizes = [8, 961], strides = [1, 1]} : vector<8x1024xf32> to vector<8x961xf32>
    %321 = vector.extract_strided_slice %195 {offsets = [0, 0], sizes = [8, 63], strides = [1, 1]} : vector<8x1024xf32> to vector<8x63xf32>
    %322 = tpu.concatenate %320, %321 in 1 : vector<8x961xf32>, vector<8x63xf32> -> vector<8x1024xf32>
    %323 = vector.extract_strided_slice %0 {offsets = [21, 0], sizes = [1, 1024], strides = [1, 1]} : vector<27x1024xf32> to vector<1x1024xf32>
    %324 = vector.broadcast %323 : vector<1x1024xf32> to vector<8x1024xf32>
    %325 = arith.mulf %322, %324 : vector<8x1024xf32>
    %326 = vector.extract_strided_slice %195 {offsets = [0, 64], sizes = [8, 960], strides = [1, 1]} : vector<8x1024xf32> to vector<8x960xf32>
    %327 = vector.extract_strided_slice %195 {offsets = [0, 0], sizes = [8, 64], strides = [1, 1]} : vector<8x1024xf32> to vector<8x64xf32>
    %328 = tpu.concatenate %326, %327 in 1 : vector<8x960xf32>, vector<8x64xf32> -> vector<8x1024xf32>
    %329 = vector.extract_strided_slice %0 {offsets = [22, 0], sizes = [1, 1024], strides = [1, 1]} : vector<27x1024xf32> to vector<1x1024xf32>
    %330 = vector.broadcast %329 : vector<1x1024xf32> to vector<8x1024xf32>
    %331 = arith.mulf %328, %330 : vector<8x1024xf32>
    %332 = vector.extract_strided_slice %195 {offsets = [0, 65], sizes = [8, 959], strides = [1, 1]} : vector<8x1024xf32> to vector<8x959xf32>
    %333 = vector.extract_strided_slice %195 {offsets = [0, 0], sizes = [8, 65], strides = [1, 1]} : vector<8x1024xf32> to vector<8x65xf32>
    %334 = tpu.concatenate %332, %333 in 1 : vector<8x959xf32>, vector<8x65xf32> -> vector<8x1024xf32>
    %335 = vector.extract_strided_slice %0 {offsets = [23, 0], sizes = [1, 1024], strides = [1, 1]} : vector<27x1024xf32> to vector<1x1024xf32>
    %336 = vector.broadcast %335 : vector<1x1024xf32> to vector<8x1024xf32>
    %337 = arith.mulf %334, %336 : vector<8x1024xf32>
    %338 = vector.extract_strided_slice %195 {offsets = [0, 71], sizes = [8, 953], strides = [1, 1]} : vector<8x1024xf32> to vector<8x953xf32>
    %339 = vector.extract_strided_slice %195 {offsets = [0, 0], sizes = [8, 71], strides = [1, 1]} : vector<8x1024xf32> to vector<8x71xf32>
    %340 = tpu.concatenate %338, %339 in 1 : vector<8x953xf32>, vector<8x71xf32> -> vector<8x1024xf32>
    %341 = vector.extract_strided_slice %0 {offsets = [24, 0], sizes = [1, 1024], strides = [1, 1]} : vector<27x1024xf32> to vector<1x1024xf32>
    %342 = vector.broadcast %341 : vector<1x1024xf32> to vector<8x1024xf32>
    %343 = arith.mulf %340, %342 : vector<8x1024xf32>
    %344 = vector.extract_strided_slice %195 {offsets = [0, 72], sizes = [8, 952], strides = [1, 1]} : vector<8x1024xf32> to vector<8x952xf32>
    %345 = vector.extract_strided_slice %195 {offsets = [0, 0], sizes = [8, 72], strides = [1, 1]} : vector<8x1024xf32> to vector<8x72xf32>
    %346 = tpu.concatenate %344, %345 in 1 : vector<8x952xf32>, vector<8x72xf32> -> vector<8x1024xf32>
    %347 = vector.extract_strided_slice %0 {offsets = [25, 0], sizes = [1, 1024], strides = [1, 1]} : vector<27x1024xf32> to vector<1x1024xf32>
    %348 = vector.broadcast %347 : vector<1x1024xf32> to vector<8x1024xf32>
    %349 = arith.mulf %346, %348 : vector<8x1024xf32>
    %350 = vector.extract_strided_slice %195 {offsets = [0, 73], sizes = [8, 951], strides = [1, 1]} : vector<8x1024xf32> to vector<8x951xf32>
    %351 = vector.extract_strided_slice %195 {offsets = [0, 0], sizes = [8, 73], strides = [1, 1]} : vector<8x1024xf32> to vector<8x73xf32>
    %352 = tpu.concatenate %350, %351 in 1 : vector<8x951xf32>, vector<8x73xf32> -> vector<8x1024xf32>
    %353 = vector.extract_strided_slice %0 {offsets = [26, 0], sizes = [1, 1024], strides = [1, 1]} : vector<27x1024xf32> to vector<1x1024xf32>
    %354 = vector.broadcast %353 : vector<1x1024xf32> to vector<8x1024xf32>
    %355 = arith.mulf %352, %354 : vector<8x1024xf32>
    %356 = tpu.concatenate %202, %208, %214, %220, %226, %232, %238, %244, %250, %256, %262, %268, %274, %277, %283, %289 in 0 : vector<8x1024xf32>, vector<8x1024xf32>, vector<8x1024xf32>, vector<8x1024xf32>, vector<8x1024xf32>, vector<8x1024xf32>, vector<8x1024xf32>, vector<8x1024xf32>, vector<8x1024xf32>, vector<8x1024xf32>, vector<8x1024xf32>, vector<8x1024xf32>, vector<8x1024xf32>, vector<8x1024xf32>, vector<8x1024xf32>, vector<8x1024xf32> -> vector<128x1024xf32>
    %357 = tpu.concatenate %295, %301, %307, %313, %319, %325, %331, %337, %343, %349, %355 in 0 : vector<8x1024xf32>, vector<8x1024xf32>, vector<8x1024xf32>, vector<8x1024xf32>, vector<8x1024xf32>, vector<8x1024xf32>, vector<8x1024xf32>, vector<8x1024xf32>, vector<8x1024xf32>, vector<8x1024xf32>, vector<8x1024xf32> -> vector<88x1024xf32>
    %358 = tpu.concatenate %356, %357 in 0 : vector<128x1024xf32>, vector<88x1024xf32> -> vector<216x1024xf32>
    %cst_20 = arith.constant dense<0.000000e+00> : vector<8x1024xf32>
    %359 = tpu.matmul %196, %358, %cst_20 {dimension_numbers = #tpu.dot_dimension_numbers<[1], [0], [0], [1], [0, 0, 1, 1], [], []>} : vector<8x216xf32>, vector<216x1024xf32>, vector<8x1024xf32> -> vector<8x1024xf32>
    %c0_21 = arith.constant 0 : index
    %c0_22 = arith.constant 0 : index
    %360 = vector.load %arg5[%c0_21, %c0_22] : memref<8x1xf32, #tpu.memory_space<vmem>>, vector<8x1xf32>
    %c0_23 = arith.constant 0 : index
    %c0_24 = arith.constant 0 : index
    %361 = vector.load %arg6[%c0_23, %c0_24] : memref<8x1xf32, #tpu.memory_space<vmem>>, vector<8x1xf32>
    %cst_25 = arith.constant dense<0.000000e+00> : vector<8xf32>
    %362 = vector.multi_reduction <add>, %359, %cst_25 [1] : vector<8x1024xf32> to vector<8xf32>
    %363 = vector.shape_cast %362 : vector<8xf32> to vector<8x1xf32>
    %364 = arith.mulf %359, %359 : vector<8x1024xf32>
    %cst_26 = arith.constant dense<0.000000e+00> : vector<8xf32>
    %365 = vector.multi_reduction <add>, %364, %cst_26 [1] : vector<8x1024xf32> to vector<8xf32>
    %366 = vector.shape_cast %365 : vector<8xf32> to vector<8x1xf32>
    %cst_27 = arith.constant 9.765625E-4 : f32
    %367 = vector.broadcast %cst_27 : f32 to vector<8x1xf32>
    %368 = arith.mulf %363, %367 : vector<8x1xf32>
    %cst_28 = arith.constant 9.765625E-4 : f32
    %369 = vector.broadcast %cst_28 : f32 to vector<8x1xf32>
    %370 = arith.mulf %366, %369 : vector<8x1xf32>
    %371 = arith.mulf %368, %368 : vector<8x1xf32>
    %372 = arith.subf %370, %371 : vector<8x1xf32>
    %373 = vector.broadcast %368 : vector<8x1xf32> to vector<8x1024xf32>
    %374 = arith.subf %359, %373 : vector<8x1024xf32>
    %cst_29 = arith.constant 9.99999974E-6 : f32
    %375 = vector.broadcast %cst_29 : f32 to vector<8x1xf32>
    %376 = arith.addf %372, %375 : vector<8x1xf32>
    %377 = math.rsqrt %376 : vector<8x1xf32>
    %378 = vector.broadcast %377 : vector<8x1xf32> to vector<8x1024xf32>
    %379 = arith.mulf %374, %378 : vector<8x1024xf32>
    %380 = vector.broadcast %360 : vector<8x1xf32> to vector<8x1024xf32>
    %381 = arith.mulf %379, %380 : vector<8x1024xf32>
    %382 = vector.broadcast %361 : vector<8x1xf32> to vector<8x1024xf32>
    %383 = arith.addf %381, %382 : vector<8x1024xf32>
    %cst_30 = arith.constant 0.000000e+00 : f32
    %384 = vector.broadcast %cst_30 : f32 to vector<8x1024xf32>
    %385 = arith.maximumf %383, %384 : vector<8x1024xf32>
    %386 = vector.extract_strided_slice %385 {offsets = [0, 0], sizes = [8, 512], strides = [1, 1]} : vector<8x1024xf32> to vector<8x512xf32>
    %c0_31 = arith.constant 0 : index
    %c0_32 = arith.constant 0 : index
    %c0_33 = arith.constant 0 : index
    %387 = vector.load %arg8[%c0_31, %c0_32, %c0_33] : memref<2x8x512xf32, #tpu.memory_space<vmem>>, vector<1x8x512xf32>
    %388 = vector.shape_cast %387 : vector<1x8x512xf32> to vector<8x512xf32>
    %389 = vector.shape_cast %386 : vector<8x512xf32> to vector<1x8x512xf32>
    tpu.vector_store %arg8[%c0_31, %c0_32, %c0_33], %389 {strides = array<i32>} : memref<2x8x512xf32, #tpu.memory_space<vmem>>, vector<1x8x512xf32>,
    %390 = vector.extract_strided_slice %385 {offsets = [0, 512], sizes = [8, 512], strides = [1, 1]} : vector<8x1024xf32> to vector<8x512xf32>
    %c1_34 = arith.constant 1 : index
    %c0_35 = arith.constant 0 : index
    %c0_36 = arith.constant 0 : index
    %391 = vector.load %arg8[%c1_34, %c0_35, %c0_36] : memref<2x8x512xf32, #tpu.memory_space<vmem>>, vector<1x8x512xf32>
    %392 = vector.shape_cast %391 : vector<1x8x512xf32> to vector<8x512xf32>
    %393 = vector.shape_cast %390 : vector<8x512xf32> to vector<1x8x512xf32>
    tpu.vector_store %arg8[%c1_34, %c0_35, %c0_36], %393 {strides = array<i32>} : memref<2x8x512xf32, #tpu.memory_space<vmem>>, vector<1x8x512xf32>,
    return
  }
}

</mosaic_0001>

<bundles_post_ra>
// kernel: tpu_custom_call.1
= control target key start
LH: loop header
LB: loop body
LE: loop exit
PB: predicated region body
PF: predicated region fallthrough
CT: control target
= control target key end

     0   :  { %13 = vsyncpa [#allocation3], 0  ;;  %s7483_s0 = inlined_call_operand.vmem [shape: f32[2,4,512], index: 0, kind: input, shape index: {}]   ;;  %s7484_s1 = inlined_call_operand.hbm [shape: f32[8,108], index: 1, kind: input, shape index: {}]   ;;  %s7485_s2 = inlined_call_operand.hbm [shape: f32[8,216], index: 2, kind: input, shape index: {}]   ;;  %s7486_s3 = inlined_call_operand.vmem [shape: f32[8,1], index: 3, kind: input, shape index: {}]   ;;  %s7487_s4 = inlined_call_operand.vmem [shape: f32[8,1], index: 4, kind: input, shape index: {}]   ;;  %s7488_s5 = inlined_call_operand.vmem [shape: f32[8,1], index: 5, kind: input, shape index: {}]   ;;  %s7489_s6 = inlined_call_operand.vmem [shape: f32[8,1], index: 6, kind: input, shape index: {}]   ;;  %s7490_s7 = inlined_call_operand.hbm [shape: f32[27,1024], index: 7, kind: input, shape index: {}]   ;;  %s7491_s8 = inlined_call_operand.hbm [shape: f32[2,8,512], index: 8, kind: output, shape index: {}]  }
   0x1   :  { %14 = vsyncpa [#allocation6], 0 }
   0x2   :  { %15 = vsyncpa [#allocation4], 0  ;;  %s3918_s27 = smov [#allocation5]   ;;  %s3919_s29 = smov [#allocation2]  }
   0x3   :  { %s34_s28 = sshll.u32 %s3918_s27, 4  ;;  %s24_s30 = sshll.u32 %s3919_s29, 4  ;;  %s35_s28 = int_to_ptr.vmem [resolvable:$true] %s34_s28  ;;  %s25_s30 = int_to_ptr.vmem [resolvable:$true] %s24_s30 }
   0x4   :  { %s3840_s9 = scalar_lea.vmem %s35_s28, 256  ;;  %p3845_p1 = scmp.lt.s32.totalorder %s35_s28, %s35_s28 }
   0x5   :  { %p3841_p0 = scmp.ne.s32.totalorder %s35_s28, %s3840_s9  ;;  %p3846_p2 = scmp.lt.s32.totalorder %s3840_s9, %s3840_s9 }
   0x7   :  { %p3847_p3 = por %p3846_p2, %p3845_p1 }
   0x9   :  { %p3848_p4 = pnand %p3847_p3, %p3841_p0 }
   0xb   :  { %3851 = shalt.err (!%p3848_p4)
}
   0xc   :  { %37 = dma.hbm_to_vmem [thread:$0]  %s7485_s2, 256, %s35_s28, [#allocation6]  }
   0xd   :  { %s3860_s12 = scalar_lea.vmem %s25_s30, 128  ;;  %p3865_p6 = scmp.lt.s32.totalorder %s25_s30, %s25_s30 }
   0xe   :  { %p3861_p5 = scmp.ne.s32.totalorder %s25_s30, %s3860_s12  ;;  %p3866_p7 = scmp.lt.s32.totalorder %s3860_s12, %s3860_s12 }
  0x10   :  { %p3867_p8 = por %p3866_p7, %p3865_p6 }
  0x12   :  { %p3868_p9 = pnand %p3867_p8, %p3861_p5 }
  0x14   :  { %3871 = shalt.err (!%p3868_p9)
}
  0x15   :  { %27 = dma.hbm_to_vmem [thread:$0]  %s7484_s1, 128, %s25_s30, [#allocation3]  }
  0x16   :  { %s3920_s15 = smov [#allocation7]  }
  0x17   :  { %s51_s16 = sshll.u32 %s3920_s15, 4  ;;  %s52_s16 = int_to_ptr.vmem [resolvable:$true] %s51_s16 }
  0x18   :  { %s3880_s17 = scalar_lea.vmem %s52_s16, 4096  ;;  %p3885_p11 = scmp.lt.s32.totalorder %s52_s16, %s52_s16 }
  0x19   :  { %p3881_p10 = scmp.ne.s32.totalorder %s52_s16, %s3880_s17  ;;  %p3886_p12 = scmp.lt.s32.totalorder %s3880_s17, %s3880_s17 }
  0x1b   :  { %p3887_p13 = por %p3886_p12, %p3885_p11 }
  0x1d   :  { %p3888_p0 = pnand %p3887_p13, %p3881_p10 }
  0x1f   :  { %3891 = shalt.err (!%p3888_p0)
}
  0x20   :  { %s3921_s2 = smov 1024   ;;  %s3922_s18 = smov 64  }
  0x21   :  { %57 = dma.hbm_to_vmem [thread:$0]  %s7490_s7, 4096, %s52_s16, [#allocation6], %s3921_s2, %s3921_s2, %s3922_s18  }
  0x22   :  { %3912 = dma.done.wait [#allocation3], 128  }
  0x23   :  { %3913 = vsyncadd [#allocation3], 4294967168 }
  0x24   :  { %3914 = dma.done.wait [#allocation6], 4352  }
  0x25   :  { %3915 = vsyncadd [#allocation6], 4294962944  ;;  %v4002_v0 = vld [vmem:[%s7483_s0 + $0x8] sm:$0xff]  ;;  %v4007_v1 = vld [vmem:[%s7483_s0] sm:$0xff]  ;;  %s3923_s24 = smov 56   ;;  %s3924_s7 = smov 55   ;;  %v151_v5 = vlaneseq }
  0x26   :  { %642 = vrot.lane.b32.xlu0 %v4002_v0, %s3923_s24  ;;  %638 = vrot.lane.b32.xlu1 %v4007_v1, %s3923_s24  ;;  %v4015_v2 = vcombine.high %v4007_v1, %v4007_v1  ;;  %s3925_s25 = smov 63   ;;  %s3926_s26 = smov 57   ;;  %v4047_v3 = vcombine.high %v4002_v0, %v4002_v0  ;;  %v4052_v4 = vld [vmem:[%s7483_s0 + $0x10] sm:$0xff]  ;;  %v92_v8 = vld [vmem:[#allocation7 + $0xc8] sm:$0x7]  ;;  %vm726_vm0 = vcmask 449536  }
  0x27   :  { %s3927_s27 = smov 65   ;;  %s3928_s30 = smov 72   ;;  %v4134_v6 = vshrl.u32 %v151_v5, 7  ;;  %vm1967_vm1 = vcmask 1043456   ;;  %v4170_v17 = vld [vmem:[#allocation7 + $0x10] sm:$0xff]  ;;  %vm652_vm2 = vcmask 457728  }
  0x28   :  { %s3929_s9 = smov 71   ;;  %s3930_s10 = smov 73   ;;  %v4177_v21 = vld [vmem:[#allocation7 + $0x8] sm:$0xff]  ;;  %v91_v22 = vld [vmem:[#allocation7 + $0xc0] sm:$0x7]  ;;  %vm578_vm3 = vcmask 465920  }
  0x29   :  { %s3931_s11 = smov 119   ;;  %s3932_s12 = smov 121   ;;  %v4141_v7 = vsub.s32 2, %v4134_v6  ;;  %v4157_v14 = vsub.s32 7, %v4134_v6  ;;  %v4168_v16 = vsub.s32 1, %v4134_v6  ;;  %v4191_v26 = vsub.s32 6, %v4134_v6 }
  0x2a   :  { %716 = vrot.lane.b32.xlu0 %v4002_v0, %s3924_s7  ;;  %714 = vrot.lane.b32.xlu1 %v4015_v2, %s3924_s7  ;;  %s3933_s13 = smov 120   ;;  %s3934_s14 = smov 127   ;;  %v4194_v27 = vsub.s32 0, %v4134_v6  ;;  %v4201_v28 = vld [vmem:[%s7483_s0 + $0x18] sm:$0xff]  ;;  %v4236_v41 = vsub.s32 5, %v4134_v6  ;;  %v4256_v51 = vld [vmem:[#allocation7 + $0x88] sm:$0xff] }
  0x2b   :  { %7807 = vst [vmem:[#allocation12_spill] sm:$0xff] %v4141_v7  ;;  %s3935_s15 = smov 7   ;;  %v4152_v11 = vrot.slane %v92_v8, %v4141_v7  ;;  %7809 = vst [vmem:[#allocation14_spill] sm:$0xff] %v4157_v14  ;;  %s3936_s16 = smov 1   ;;  %v4181_v23 = vrot.slane %v4170_v17, %v4157_v14  ;;  %v4186_v25 = vrot.slane %v92_v8, %v4168_v16  ;;  %vm504_vm4 = vcmask 515072  }
  0x2c   :  { %7810 = vst [vmem:[#allocation15_spill] sm:$0xff] %v4168_v16  ;;  %7813 = vst [vmem:[#allocation18_spill] sm:$0xff] %v4191_v26  ;;  %v4205_v29 = vrot.slane %v4177_v21, %v4157_v14  ;;  %v4208_v30 = vrot.slane %v91_v22, %v4168_v16  ;;  %v4216_v35 = vrot.slane %v92_v8, %v4194_v27  ;;  %v4286_v62 = vsub.s32 4, %v4134_v6  ;;  %s3937_s19 = smov 9   ;;  %s3938_s20 = smov 8  }
  0x2d   :  { %7808 = vst [vmem:[#allocation13_spill] sm:$0xff] %v4152_v11  ;;  %7811 = vst [vmem:[#allocation16_spill] sm:$0xff] %v4181_v23  ;;  %v4223_v37 = vrot.slane %v4170_v17, %v4191_v26  ;;  %v4227_v38 = vcombine.high %v4201_v28, %v4201_v28  ;;  %v4230_v39 = vrot.slane %v91_v22, %v4141_v7  ;;  %vm430_vm5 = vcmask 523264  }
  0x2e   :  { %492 = vrot.lane.b32.xlu1 %v4015_v2, %s3925_s25  ;;  %640 = vrot.lane.b32.xlu0 %v4015_v2, %s3923_s24  ;;  %7812 = vst [vmem:[#allocation17_spill] sm:$0xff] %v4186_v25  ;;  %7814 = vst [vmem:[#allocation19_spill] sm:$0xff] %v4194_v27  ;;  %v4244_v44 = vrot.slane %v4177_v21, %v4191_v26  ;;  %v4247_v45 = vrot.slane %v91_v22, %v4194_v27  ;;  %vm356_vm6 = vcmask 531456   ;;  %vm282_vm7 = vcmask 580608  }
  0x2f   :  { %7815 = vst [vmem:[#allocation20_spill] sm:$0xff] %v4205_v29  ;;  %7816 = vst [vmem:[#allocation21_spill] sm:$0xff] %v4208_v30  ;;  %v4277_v59 = vrot.slane %v4170_v17, %v4236_v41  ;;  %v4281_v60 = vrot.slane %v4256_v51, %v4157_v14  ;;  %vm7698_vm8 = vcmask 588800   ;;  %vm7697_vm9 = vcmask 596992  }
  0x30   :  { %7817 = vst [vmem:[#allocation22_spill] sm:$0xff] %v4216_v35  ;;  %7818 = vst [vmem:[#allocation23_spill] sm:$0xff] %v4223_v37  ;;  %vm7588_vm10 = vcmask 973824   ;;  %vm7587_vm11 = vcmask 982016   ;;  %vm1209_vm12 = vcmask 990208   ;;  %vm1135_vm13 = vcmask 1039360  }
  0x31   :  { %7819 = vst [vmem:[#allocation24_spill] sm:$0xff] %v4227_v38  ;;  %7820 = vst [vmem:[#allocation25_spill] sm:$0xff] %v4230_v39  ;;  %vm1022_vm14 = vcmask 7168   ;;  %vm948_vm15 = vcmask 56320  }
  0x32   :  { %566 = vrot.lane.b32.xlu1 %v4015_v2, %s3926_s26  ;;  %494 = vrot.lane.b32.xlu0 %v4002_v0, %s3925_s25  ;;  %7821 = vst [vmem:[#allocation26_spill] sm:$0xff] %v4236_v41  ;;  %7822 = vst [vmem:[#allocation27_spill] sm:$0xff] %v4244_v44 }
  0x33   :  { %7823 = vst [vmem:[#allocation28_spill] sm:$0xff] %v4247_v45  ;;  %7825 = vst [vmem:[#allocation30_spill] sm:$0xff] %v4277_v59 }
  0x34   :  { %7826 = vst [vmem:[#allocation31_spill] sm:$0xff] %v4281_v60  ;;  %7827 = vst [vmem:[#allocation32_spill] sm:$0xff] %v4286_v62 }
  0x36   :  { %712 = vrot.lane.b32.xlu1 %v4007_v1, %s3924_s7  ;;  %568 = vrot.lane.b32.xlu0 %v4002_v0, %s3926_s26 }
  0x3a   :  { %564 = vrot.lane.b32.xlu1 %v4007_v1, %s3926_s26  ;;  %490 = vrot.lane.b32.xlu0 %v4007_v1, %s3925_s25 }
  0x3e   :  { %346 = vrot.lane.b32.xlu1 %v4002_v0, %s3927_s27  ;;  %344 = vrot.lane.b32.xlu0 %v4015_v2, %s3927_s27 }
  0x42   :  { %420 = vrot.lane.b32.xlu1 %v4002_v0, %s3922_s18  ;;  %418 = vrot.lane.b32.xlu0 %v4015_v2, %s3922_s18 }
  0x46   :  { %646 = vrot.lane.b32.xlu1 %v4052_v4, %s3923_s24  ;;  %644 = vrot.lane.b32.xlu0 %v4047_v3, %s3923_s24 }
  0x4a   :  { %416 = vrot.lane.b32.xlu1 %v4007_v1, %s3922_s18  ;;  %342 = vrot.lane.b32.xlu0 %v4007_v1, %s3927_s27 }
  0x4e   :  { %720 = vrot.lane.b32.xlu1 %v4052_v4, %s3924_s7  ;;  %718 = vrot.lane.b32.xlu0 %v4047_v3, %s3924_s7 }
  0x52   :  { %198 = vrot.lane.b32.xlu1 %v4002_v0, %s3928_s30  ;;  %196 = vrot.lane.b32.xlu0 %v4015_v2, %s3928_s30 }
  0x56   :  { %272 = vrot.lane.b32.xlu1 %v4002_v0, %s3929_s9  ;;  %270 = vrot.lane.b32.xlu0 %v4015_v2, %s3929_s9 }
  0x5a   :  { %498 = vrot.lane.b32.xlu1 %v4052_v4, %s3925_s25  ;;  %496 = vrot.lane.b32.xlu0 %v4047_v3, %s3925_s25 }
  0x5e   :  { %572 = vrot.lane.b32.xlu1 %v4052_v4, %s3926_s26  ;;  %570 = vrot.lane.b32.xlu0 %v4047_v3, %s3926_s26 }
  0x62   :  { %268 = vrot.lane.b32.xlu1 %v4007_v1, %s3929_s9  ;;  %194 = vrot.lane.b32.xlu0 %v4007_v1, %s3928_s30 }
  0x66   :  { %124 = vrot.lane.b32.xlu1 %v4002_v0, %s3930_s10  ;;  %122 = vrot.lane.b32.xlu0 %v4015_v2, %s3930_s10 }
  0x6a   :  { %350 = vrot.lane.b32.xlu1 %v4052_v4, %s3927_s27  ;;  %348 = vrot.lane.b32.xlu0 %v4047_v3, %s3927_s27 }
  0x6e   :  { %424 = vrot.lane.b32.xlu1 %v4052_v4, %s3922_s18  ;;  %422 = vrot.lane.b32.xlu0 %v4047_v3, %s3922_s18 }
  0x72   :  { %1345 = vrot.lane.b32.xlu1 %v4002_v0, %s3931_s11  ;;  %1343 = vrot.lane.b32.xlu0 %v4015_v2, %s3931_s11 }
  0x76   :  { %1341 = vrot.lane.b32.xlu1 %v4007_v1, %s3931_s11  ;;  %120 = vrot.lane.b32.xlu0 %v4007_v1, %s3930_s10 }
  0x7a   :  { %202 = vrot.lane.b32.xlu1 %v4052_v4, %s3928_s30  ;;  %200 = vrot.lane.b32.xlu0 %v4047_v3, %s3928_s30 }
  0x7e   :  { %276 = vrot.lane.b32.xlu1 %v4052_v4, %s3929_s9  ;;  %274 = vrot.lane.b32.xlu0 %v4047_v3, %s3929_s9 }
  0x82   :  { %1197 = vrot.lane.b32.xlu1 %v4002_v0, %s3932_s12  ;;  %1195 = vrot.lane.b32.xlu0 %v4015_v2, %s3932_s12 }
  0x86   :  { %1271 = vrot.lane.b32.xlu1 %v4002_v0, %s3933_s13  ;;  %1269 = vrot.lane.b32.xlu0 %v4015_v2, %s3933_s13 }
  0x8a   :  { %1267 = vrot.lane.b32.xlu1 %v4007_v1, %s3933_s13  ;;  %1193 = vrot.lane.b32.xlu0 %v4007_v1, %s3932_s12 }
  0x8e   :  { %128 = vrot.lane.b32.xlu1 %v4052_v4, %s3930_s10  ;;  %126 = vrot.lane.b32.xlu0 %v4047_v3, %s3930_s10 }
  0x92   :  { %1123 = vrot.lane.b32.xlu1 %v4002_v0, %s3934_s14  ;;  %1121 = vrot.lane.b32.xlu0 %v4015_v2, %s3934_s14 }
  0x96   :  { %1349 = vrot.lane.b32.xlu1 %v4052_v4, %s3931_s11  ;;  %1347 = vrot.lane.b32.xlu0 %v4047_v3, %s3931_s11 }
  0x98   :  { %v4143_v9 = vpop.permute.xlu0 %642  ;;  %v4145_v10 = vpop.permute.xlu1 %638 }
  0x9a   :  { %934 = vrot.lane.b32.xlu1 %v4007_v1, %s3935_s15  ;;  %1119 = vrot.lane.b32.xlu0 %v4007_v1, %s3934_s14 }
  0x9c   :  { %v4154_v12 = vpop.permute.xlu0 %716  ;;  %v715_v13 = vpop.permute.xlu1 %714 }
  0x9d   :  { %v4161_v15 = vsel %vm726_vm0, %v715_v13, %v4154_v12 }
  0x9e   :  { %1008 = vrot.lane.b32.xlu1 %v4007_v1, %s3936_s16  ;;  %936 = vrot.lane.b32.xlu0 %v4015_v2, %s3935_s15  ;;  %v1768_v18 = vmul.f32 %v4152_v11, %v4161_v15  ;;  %v4442_v11 = vrot.slane %v4256_v51, %v4286_v62 }
  0xa0   :  { %v4174_v19 = vpop.permute.xlu1 %492  ;;  %v641_v20 = vpop.permute.xlu0 %640  ;;  %3776 = vmatprep.subr.msk.mxu0 %vm1967_vm1, %v1768_v18  ;;  %7845 = vst [vmem:[#allocation50_spill] sm:$0xff] %v4442_v11 }
  0xa1   :  { %v654_v24 = vsel %vm652_vm2, %v641_v20, %v4143_v9  ;;  %v653_v33 = vsel %vm652_vm2, %v4145_v10, %v641_v20 }
  0xa2   :  { %1199 = vrot.lane.b32.xlu1 %v4047_v3, %s3932_s12  ;;  %1010 = vrot.lane.b32.xlu0 %v4015_v2, %s3936_s16  ;;  %v703_v34 = vmul.f32 %v4181_v23, %v654_v24  ;;  %v1728_v36 = vmul.f32 %v4186_v25, %v654_v24  ;;  %v702_v40 = vmul.f32 %v4205_v29, %v653_v33 }
  0xa3   :  { %v1727_v46 = vmul.f32 %v4208_v30, %v653_v33 }
  0xa4   :  { %v567_v31 = vpop.permute.xlu1 %566  ;;  %v4210_v32 = vpop.permute.xlu0 %494  ;;  %v1857_v47 = vrot.slane %v703_v34, 4  ;;  %v2137_v50 = vrot.slane %v1728_v36, 4  ;;  %v1856_v63 = vrot.slane %v702_v40, 4  ;;  %v4307_v36 = vld [vmem:[#allocation7 + $0x80] sm:$0xff]  ;;  %v4313_v40 = vrot.slane %v4170_v17, %v4286_v62 }
  0xa5   :  { %v2136_v5 = vrot.slane %v1727_v46, 4  ;;  %v506_v18 = vsel %vm504_vm4, %v4174_v19, %v4210_v32  ;;  %v4317_v46 = vrot.slane %v4256_v51, %v4191_v26 }
  0xa6   :  { %1273 = vrot.lane.b32.xlu1 %v4047_v3, %s3933_s13  ;;  %1201 = vrot.lane.b32.xlu0 %v4052_v4, %s3932_s12  ;;  %v555_v33 = vmul.f32 %v4277_v59, %v506_v18  ;;  %v1648_v34 = vmul.f32 %v4281_v60, %v506_v18  ;;  %7828 = vst [vmem:[#allocation33_spill] sm:$0xff] %v4313_v40 }
  0xa7   :  { %7829 = vst [vmem:[#allocation34_spill] sm:$0xff] %v4317_v46 }
  0xa8   :  { %v4238_v42 = vpop.permute.xlu1 %712  ;;  %v4240_v43 = vpop.permute.xlu0 %568 }
  0xa9   :  { %v4252_v48 = vsel %vm726_vm0, %v4238_v42, %v715_v13  ;;  %v580_v49 = vsel %vm578_vm3, %v567_v31, %v4240_v43 }
  0xaa   :  { %v629_v52 = vmul.f32 %v4223_v37, %v580_v49  ;;  %v1688_v53 = vmul.f32 %v4216_v35, %v580_v49  ;;  %931 = vrot.lane.b32.xlu1 %v4227_v38, %s3935_s15  ;;  %v1767_v54 = vmul.f32 %v4230_v39, %v4252_v48  ;;  %1275 = vrot.lane.b32.xlu0 %v4052_v4, %s3933_s13 }
  0xab   :  { %v4438_v39 = vrot.slane %v4170_v17, %v4141_v7 }
  0xac   :  { %v4266_v55 = vpop.permute.xlu1 %564  ;;  %v4268_v56 = vpop.permute.xlu0 %490  ;;  %3777 = vmatpush1.msk.msra.mxu0 %vm1967_vm1, %v1767_v54  ;;  %v2185_v57 = vsel %vm1967_vm1, %v1688_v53, %v2137_v50  ;;  %v4273_v58 = vsel %vm1967_vm1, %v629_v52, %v1857_v47  ;;  %v4325_v50 = vrot.slane %v4177_v21, %v4236_v41  ;;  %v1833_v53 = vrot.slane %v555_v33, 4 }
  0xad   :  { %7824 = vst [vmem:[#allocation29_spill] sm:$0xff] %v4273_v58  ;;  %v579_v61 = vsel %vm578_vm3, %v4266_v55, %v567_v31  ;;  %2226 = vmatprep.subr.mxu0 %v2185_v57  ;;  %v2113_v54 = vrot.slane %v1648_v34, 4  ;;  %v4358_v34 = vrot.slane %v4307_v36, %v4191_v26  ;;  %7844 = vst [vmem:[#allocation49_spill] sm:$0xff] %v4438_v39 }
  0xae   :  { %v628_v8 = vmul.f32 %v4244_v44, %v579_v61  ;;  %v1687_v13 = vmul.f32 %v4247_v45, %v579_v61  ;;  %786 = vrot.lane.b32.xlu1 %v4007_v1, %s3937_s19  ;;  %1005 = vrot.lane.b32.xlu0 %v4227_v38, %s3936_s16  ;;  %7830 = vst [vmem:[#allocation35_spill] sm:$0xff] %v4325_v50 }
  0xaf   :  { %7835 = vst [vmem:[#allocation40_spill] sm:$0xff] %v4358_v34 }
  0xb0   :  { %v4297_v20 = vpop.permute.xlu1 %346  ;;  %v4299_v22 = vpop.permute.xlu0 %344  ;;  %v2184_v24 = vsel %vm1967_vm1, %v1687_v13, %v2136_v5  ;;  %v4303_v31 = vsel %vm1967_vm1, %v628_v8, %v1856_v63  ;;  %v505_v63 = vsel %vm504_vm4, %v4268_v56, %v4174_v19  ;;  %v4354_v19 = vrot.slane %v4177_v21, %v4286_v62 }
  0xb1   :  { %2227 = vmatpush1.msra.mxu0 %v2184_v24  ;;  %v554_v24 = vmul.f32 %v4325_v50, %v505_v63 }
  0xb2   :  { %860 = vrot.lane.b32.xlu1 %v4007_v1, %s3938_s20  ;;  %788 = vrot.lane.b32.xlu0 %v4015_v2, %s3937_s19  ;;  %v4329_v1 = vrot.slane %v4307_v36, %v4157_v14  ;;  %7834 = vst [vmem:[#allocation39_spill] sm:$0xff] %v4354_v19 }
  0xb4   :  { %v4321_v47 = vpop.permute.xlu1 %420  ;;  %v419_v49 = vpop.permute.xlu0 %418  ;;  %7831 = vst [vmem:[#allocation36_spill] sm:$0xff] %v4329_v1  ;;  %v1647_v33 = vmul.f32 %v4329_v1, %v505_v63  ;;  %v1832_v1 = vrot.slane %v554_v24, 4 }
  0xb5   :  { %v432_v52 = vsel %vm430_vm5, %v419_v49, %v4321_v47 }
  0xb6   :  { %v481_v57 = vmul.f32 %v4313_v40, %v432_v52  ;;  %v1608_v61 = vmul.f32 %v4317_v46, %v432_v52  ;;  %1125 = vrot.lane.b32.xlu1 %v4047_v3, %s3934_s14  ;;  %862 = vrot.lane.b32.xlu0 %v4015_v2, %s3938_s20  ;;  %v4362_v52 = vld [vmem:[#allocation7 + $0xd0] sm:$0x7]  ;;  %v2112_v60 = vrot.slane %v1647_v33, 4 }
  0xb7   :  { %v4381_v46 = vrot.slane %v4362_v52, %v4141_v7 }
  0xb8   :  { %v4342_v5 = vpop.permute.xlu1 %646  ;;  %v645_v8 = vpop.permute.xlu0 %644  ;;  %v2177_v13 = vsel %vm1967_vm1, %v1608_v61, %v2113_v54  ;;  %v4346_v18 = vsel %vm1967_vm1, %v481_v57, %v1833_v53  ;;  %v4364_v53 = vld [vmem:[#allocation7 + $0xd8] sm:$0x7]  ;;  %v4371_v61 = vsub.s32 3, %v4134_v6 }
  0xb9   :  { %7832 = vst [vmem:[#allocation37_spill] sm:$0xff] %v4342_v5  ;;  %7833 = vst [vmem:[#allocation38_spill] sm:$0xff] %v4346_v18  ;;  %2228 = vmatprep.subr.mxu0 %v2177_v13  ;;  %v4377_v13 = vrot.slane %v4364_v53, %v4141_v7  ;;  %v4464_v40 = vrot.slane %v4364_v53, %v4168_v16 }
  0xba   :  { %783 = vrot.lane.b32.xlu1 %v4227_v38, %s3937_s19  ;;  %1127 = vrot.lane.b32.xlu0 %v4052_v4, %s3934_s14  ;;  %7836 = vst [vmem:[#allocation41_spill] sm:$0xff] %v4371_v61  ;;  %7838 = vst [vmem:[#allocation43_spill] sm:$0xff] %v4381_v46 }
  0xbb   :  { %7837 = vst [vmem:[#allocation42_spill] sm:$0xff] %v4377_v13  ;;  %7849 = vst [vmem:[#allocation54_spill] sm:$0xff] %v4464_v40 }
  0xbc   :  { %v4366_v54 = vpop.permute.xlu1 %416  ;;  %v4368_v57 = vpop.permute.xlu0 %342 }
  0xbd   :  { %v431_v63 = vsel %vm430_vm5, %v4366_v54, %v419_v49 }
  0xbe   :  { %v480_v45 = vmul.f32 %v4354_v19, %v431_v63  ;;  %v1607_v35 = vmul.f32 %v4358_v34, %v431_v63  ;;  %938 = vrot.lane.b32.xlu1 %v4002_v0, %s3935_s15  ;;  %857 = vrot.lane.b32.xlu0 %v4227_v38, %s3938_s20  ;;  %v4405_v63 = vrot.slane %v4170_v17, %v4371_v61 }
  0xbf   :  { %v4409_v34 = vrot.slane %v4256_v51, %v4236_v41 }
  0xc0   :  { %v4389_v6 = vpop.permute.xlu1 %720  ;;  %v719_v49 = vpop.permute.xlu0 %718  ;;  %v2176_v30 = vsel %vm1967_vm1, %v1607_v35, %v2112_v60  ;;  %v4393_v25 = vsel %vm1967_vm1, %v480_v45, %v1832_v1  ;;  %7842 = vst [vmem:[#allocation47_spill] sm:$0xff] %v4405_v63  ;;  %v358_v35 = vsel %vm356_vm6, %v4299_v22, %v4297_v20  ;;  %v4422_v45 = vld [vmem:[#allocation7 + $0x18] sm:$0xff]  ;;  %v4424_v60 = vld [vmem:[#allocation7 + $0x20] sm:$0xff] }
  0xc1   :  { %7839 = vst [vmem:[#allocation44_spill] sm:$0xff] %v4389_v6  ;;  %7840 = vst [vmem:[#allocation45_spill] sm:$0xff] %v4393_v25  ;;  %v4397_v24 = vsel %vm726_vm0, %v4154_v12, %v719_v49  ;;  %2229 = vmatpush1.msra.mxu0 %v2176_v30  ;;  %v4401_v33 = vsel %vm726_vm0, %v719_v49, %v4389_v6 }
  0xc2   :  { %7841 = vst [vmem:[#allocation46_spill] sm:$0xff] %v4401_v33  ;;  %7843 = vst [vmem:[#allocation48_spill] sm:$0xff] %v4409_v34  ;;  %1012 = vrot.lane.b32.xlu1 %v4002_v0, %s3936_s16  ;;  %v1770_v12 = vmul.f32 %v4377_v13, %v4401_v33  ;;  %v1769_v30 = vmul.f32 %v4381_v46, %v4397_v24  ;;  %940 = vrot.lane.b32.xlu0 %v4047_v3, %s3935_s15 }
  0xc3   :  { %v407_v46 = vmul.f32 %v4405_v63, %v358_v35  ;;  %v1568_v13 = vmul.f32 %v4409_v34, %v358_v35  ;;  %v655_v35 = vsel %vm652_vm2, %v4143_v9, %v645_v8  ;;  %v656_v34 = vsel %vm652_vm2, %v645_v8, %v4342_v5 }
  0xc4   :  { %v4426_v1 = vpop.permute.xlu1 %198  ;;  %v4428_v49 = vpop.permute.xlu0 %196  ;;  %3779 = vmatprep.subr.msk.mxu1 %vm1967_vm1, %v1770_v12  ;;  %v4446_v12 = vrot.slane %v4422_v45, %v4157_v14  ;;  %v4460_v63 = vrot.slane %v4362_v52, %v4168_v16  ;;  %v4478_v33 = vrot.slane %v4177_v21, %v4371_v61  ;;  %v4497_v5 = vrot.slane %v4307_v36, %v4236_v41 }
  0xc5   :  { %3780 = vmatpush1.msk.msra.mxu1 %vm1967_vm1, %v1769_v30  ;;  %v4450_v30 = vrot.slane %v4424_v60, %v4157_v14  ;;  %v1809_v23 = vrot.slane %v407_v46, 4  ;;  %v2089_v50 = vrot.slane %v1568_v13, 4  ;;  %v1730_v13 = vmul.f32 %v4464_v40, %v656_v34 }
  0xc6   :  { %635 = vrot.lane.b32.xlu1 %v4227_v38, %s3923_s24  ;;  %7846 = vst [vmem:[#allocation51_spill] sm:$0xff] %v4446_v12  ;;  %1014 = vrot.lane.b32.xlu0 %v4047_v3, %s3936_s16  ;;  %7848 = vst [vmem:[#allocation53_spill] sm:$0xff] %v4460_v63  ;;  %v704_v44 = vmul.f32 %v4446_v12, %v655_v35  ;;  %v1729_v46 = vmul.f32 %v4460_v63, %v655_v35 }
  0xc7   :  { %7847 = vst [vmem:[#allocation52_spill] sm:$0xff] %v4450_v30  ;;  %v705_v29 = vmul.f32 %v4450_v30, %v656_v34  ;;  %7850 = vst [vmem:[#allocation55_spill] sm:$0xff] %v4478_v33  ;;  %v357_v30 = vsel %vm356_vm6, %v4368_v57, %v4299_v22  ;;  %v4501_v34 = vrot.slane %v4170_v17, %v4168_v16 }
  0xc8   :  { %v4466_v59 = vpop.permute.xlu1 %272  ;;  %v271_v37 = vpop.permute.xlu0 %270  ;;  %7853 = vst [vmem:[#allocation58_spill] sm:$0xff] %v4497_v5  ;;  %v4511_v22 = vrot.slane %v4424_v60, %v4191_v26  ;;  %v4519_v35 = vrot.slane %v4364_v53, %v4194_v27  ;;  %v2138_v63 = vrot.slane %v1729_v46, 4  ;;  %v2139_v53 = vrot.slane %v1730_v13, 4 }
  0xc9   :  { %v284_v19 = vsel %vm282_vm7, %v271_v37, %v4466_v59  ;;  %7854 = vst [vmem:[#allocation59_spill] sm:$0xff] %v4501_v34  ;;  %v210_v18 = vsel %vm7698_vm8, %v4428_v49, %v4426_v1 }
  0xca   :  { %v333_v9 = vmul.f32 %v4438_v39, %v284_v19  ;;  %v1528_v8 = vmul.f32 %v4442_v11, %v284_v19  ;;  %790 = vrot.lane.b32.xlu1 %v4002_v0, %s3937_s19  ;;  %709 = vrot.lane.b32.xlu0 %v4227_v38, %s3924_s7  ;;  %7856 = vst [vmem:[#allocation61_spill] sm:$0xff] %v4511_v22  ;;  %7858 = vst [vmem:[#allocation63_spill] sm:$0xff] %v4519_v35 }
  0xcc   :  { %v4484_v39 = vpop.permute.xlu1 %498  ;;  %v4486_v19 = vpop.permute.xlu0 %496  ;;  %v2169_v11 = vsel %vm1967_vm1, %v1528_v8, %v2089_v50  ;;  %v4490_v12 = vsel %vm1967_vm1, %v333_v9, %v1809_v23  ;;  %v4507_v23 = vrot.slane %v4422_v45, %v4191_v26  ;;  %v4515_v50 = vrot.slane %v4362_v52, %v4194_v27 }
  0xcd   :  { %7851 = vst [vmem:[#allocation56_spill] sm:$0xff] %v4484_v39  ;;  %7852 = vst [vmem:[#allocation57_spill] sm:$0xff] %v4490_v12  ;;  %2230 = vmatprep.subr.mxu0 %v2169_v11  ;;  %v1858_v11 = vrot.slane %v704_v44, 4  ;;  %v4529_v9 = vrot.slane %v4177_v21, %v4141_v7  ;;  %v4533_v52 = vrot.slane %v4307_v36, %v4286_v62  ;;  %v1859_v8 = vrot.slane %v705_v29, 4 }
  0xce   :  { %864 = vrot.lane.b32.xlu1 %v4002_v0, %s3938_s20  ;;  %7855 = vst [vmem:[#allocation60_spill] sm:$0xff] %v4507_v23  ;;  %7857 = vst [vmem:[#allocation62_spill] sm:$0xff] %v4515_v50  ;;  %v4523_v0 = vrot.slane %v4256_v51, %v4371_v61  ;;  %792 = vrot.lane.b32.xlu0 %v4047_v3, %s3937_s19  ;;  %v406_v44 = vmul.f32 %v4478_v33, %v357_v30 }
  0xcf   :  { %7860 = vst [vmem:[#allocation65_spill] sm:$0xff] %v4529_v9  ;;  %7861 = vst [vmem:[#allocation66_spill] sm:$0xff] %v4533_v52  ;;  %v1567_v12 = vmul.f32 %v4497_v5, %v357_v30  ;;  %v259_v5 = vmul.f32 %v4501_v34, %v210_v18  ;;  %v4665_v34 = vrot.slane %v4177_v21, %v4168_v16 }
  0xd0   :  { %7859 = vst [vmem:[#allocation64_spill] sm:$0xff] %v4523_v0  ;;  %v4536_v40 = vpop.permute.xlu1 %572  ;;  %v571_v6 = vpop.permute.xlu0 %570 }
  0xd1   :  { %7862 = vst [vmem:[#allocation67_spill] sm:$0xff] %v4536_v40  ;;  %v581_v58 = vsel %vm578_vm3, %v4240_v43, %v571_v6  ;;  %v582_v25 = vsel %vm578_vm3, %v571_v6, %v4536_v40  ;;  %v4556_v43 = vrot.slane %v4170_v17, %v4194_v27  ;;  %7876 = vst [vmem:[#allocation81_spill] sm:$0xff] %v4665_v34 }
  0xd2   :  { %v630_v29 = vmul.f32 %v4507_v23, %v581_v58  ;;  %v631_v46 = vmul.f32 %v4511_v22, %v582_v25  ;;  %v1689_v13 = vmul.f32 %v4515_v50, %v581_v58  ;;  %v1690_v33 = vmul.f32 %v4519_v35, %v582_v25  ;;  %487 = vrot.lane.b32.xlu1 %v4227_v38, %s3925_s25  ;;  %v4571_v23 = vld [vmem:[#allocation7 + $0x90] sm:$0xff] }
  0xd3   :  { %866 = vrot.lane.b32.xlu0 %v4047_v3, %s3938_s20  ;;  %7863 = vst [vmem:[#allocation68_spill] sm:$0xff] %v4556_v43  ;;  %v1808_v35 = vrot.slane %v406_v44, 4 }
  0xd4   :  { %v4558_v6 = vpop.permute.xlu1 %268  ;;  %v4560_v30 = vpop.permute.xlu0 %194  ;;  %v2187_v22 = vsel %vm1967_vm1, %v1690_v33, %v2139_v53  ;;  %v2186_v58 = vsel %vm1967_vm1, %v1689_v13, %v2138_v63  ;;  %v4565_v25 = vsel %vm1967_vm1, %v630_v29, %v1858_v11  ;;  %v4568_v50 = vsel %vm1967_vm1, %v631_v46, %v1859_v8  ;;  %v4580_v53 = vld [vmem:[#allocation7 + $0x98] sm:$0xff] }
  0xd5   :  { %7864 = vst [vmem:[#allocation69_spill] sm:$0xff] %v4568_v50  ;;  %v283_v17 = vsel %vm282_vm7, %v4558_v6, %v271_v37  ;;  %2297 = vmatprep.subr.mxu1 %v2187_v22  ;;  %v4577_v33 = vrot.slane %v4256_v51, %v4141_v7  ;;  %v2088_v63 = vrot.slane %v1567_v12, 4  ;;  %v1488_v11 = vmul.f32 %v4523_v0, %v210_v18 }
  0xd6   :  { %v332_v8 = vmul.f32 %v4529_v9, %v283_v17  ;;  %v1527_v44 = vmul.f32 %v4533_v52, %v283_v17  ;;  %339 = vrot.lane.b32.xlu1 %v4227_v38, %s3927_s27  ;;  %v4588_v37 = vrot.slane %v4422_v45, %v4236_v41  ;;  %2298 = vmatpush1.msra.mxu1 %v2186_v58  ;;  %v1785_v17 = vrot.slane %v259_v5, 4 }
  0xd7   :  { %7865 = vst [vmem:[#allocation70_spill] sm:$0xff] %v4577_v33  ;;  %561 = vrot.lane.b32.xlu0 %v4227_v38, %s3926_s26  ;;  %v507_v18 = vsel %vm504_vm4, %v4210_v32, %v4486_v19  ;;  %v4597_v12 = vrot.slane %v4571_v23, %v4157_v14  ;;  %v4609_v58 = vrot.slane %v4580_v53, %v4157_v14  ;;  %v2065_v0 = vrot.slane %v1488_v11, 4 }
  0xd8   :  { %7866 = vst [vmem:[#allocation71_spill] sm:$0xff] %v4588_v37  ;;  %v4599_v22 = vpop.permute.xlu1 %124  ;;  %v4601_v29 = vpop.permute.xlu0 %122  ;;  %v2168_v46 = vsel %vm1967_vm1, %v1527_v44, %v2088_v63  ;;  %v4605_v13 = vsel %vm1967_vm1, %v332_v8, %v1808_v35  ;;  %v508_v52 = vsel %vm504_vm4, %v4486_v19, %v4484_v39  ;;  %v4623_v5 = vrot.slane %v4424_v60, %v4236_v41 }
  0xd9   :  { %7867 = vst [vmem:[#allocation72_spill] sm:$0xff] %v4597_v12  ;;  %7868 = vst [vmem:[#allocation73_spill] sm:$0xff] %v4609_v58  ;;  %v136_v32 = vsel %vm7697_vm9, %v4601_v29, %v4599_v22  ;;  %2231 = vmatpush1.msra.mxu0 %v2168_v46  ;;  %v556_v8 = vmul.f32 %v4588_v37, %v507_v18  ;;  %v1649_v11 = vmul.f32 %v4597_v12, %v507_v18 }
  0xda   :  { %v185_v63 = vmul.f32 %v4556_v43, %v136_v32  ;;  %v1448_v35 = vmul.f32 %v4577_v33, %v136_v32  ;;  %191 = vrot.lane.b32.xlu1 %v4227_v38, %s3928_s30  ;;  %7869 = vst [vmem:[#allocation74_spill] sm:$0xff] %v4623_v5  ;;  %v1650_v33 = vmul.f32 %v4609_v58, %v508_v52  ;;  %v7539_v43 = vmov 0.0  }
  0xdb   :  { %413 = vrot.lane.b32.xlu0 %v4227_v38, %s3922_s18  ;;  %2355 = vmatprep.mubr.f32.mxu1 %v7539_v43  ;;  %v4641_v18 = vrot.slane %v4422_v45, %v4286_v62  ;;  %v4645_v12 = vrot.slane %v4424_v60, %v4286_v62  ;;  %v2114_v58 = vrot.slane %v1649_v11, 4  ;;  %v4669_v9 = vrot.slane %v4307_v36, %v4371_v61 }
  0xdc   :  { %v4629_v44 = vpop.permute.xlu1 %350  ;;  %v349_v19 = vpop.permute.xlu0 %348  ;;  %v2161_v46 = vsel %vm1967_vm1, %v1448_v35, %v2065_v0  ;;  %v4633_v32 = vsel %vm1967_vm1, %v185_v63, %v1785_v17  ;;  %v4649_v0 = vrot.slane %v4571_v23, %v4191_v26  ;;  %v4653_v17 = vrot.slane %v4580_v53, %v4191_v26  ;;  %2284 = vmatprep.mubr.f32.mxu0 %v7539_v43 }
  0xdd   :  { %7870 = vst [vmem:[#allocation75_spill] sm:$0xff] %v4629_v44  ;;  %2232 = vmatprep.subr.mxu0 %v2161_v46  ;;  %7871 = vst [vmem:[#allocation76_spill] sm:$0xff] %v4641_v18  ;;  %v557_v63 = vmul.f32 %v4623_v5, %v508_v52  ;;  %v4660_v35 = vcombine.high %v4052_v4, %v4052_v4  ;;  %v1834_v46 = vrot.slane %v556_v8, 4  ;;  %v2115_v37 = vrot.slane %v1650_v33, 4 }
  0xde   :  { %117 = vrot.lane.b32.xlu1 %v4227_v38, %s3930_s10  ;;  %7872 = vst [vmem:[#allocation77_spill] sm:$0xff] %v4645_v12  ;;  %7873 = vst [vmem:[#allocation78_spill] sm:$0xff] %v4649_v0  ;;  %v209_v4 = vsel %vm7698_vm8, %v4560_v30, %v4428_v49 }
  0xdf   :  { %7874 = vst [vmem:[#allocation79_spill] sm:$0xff] %v4653_v17  ;;  %265 = vrot.lane.b32.xlu0 %v4227_v38, %s3929_s9  ;;  %7875 = vst [vmem:[#allocation80_spill] sm:$0xff] %v4660_v35  ;;  %v1835_v33 = vrot.slane %v557_v63, 4  ;;  %v1487_v63 = vmul.f32 %v4669_v9, %v209_v4 }
  0xe0   :  { %7877 = vst [vmem:[#allocation82_spill] sm:$0xff] %v4669_v9  ;;  %v4671_v52 = vpop.permute.xlu1 %424  ;;  %v423_v5 = vpop.permute.xlu0 %422 }
  0xe1   :  { %7878 = vst [vmem:[#allocation83_spill] sm:$0xff] %v4671_v52  ;;  %v433_v8 = vsel %vm430_vm5, %v4321_v47, %v423_v5  ;;  %v434_v11 = vsel %vm430_vm5, %v423_v5, %v4671_v52 }
  0xe2   :  { %v482_v43 = vmul.f32 %v4641_v18, %v433_v8  ;;  %v483_v50 = vmul.f32 %v4645_v12, %v434_v11  ;;  %v1609_v39 = vmul.f32 %v4649_v0, %v433_v8  ;;  %v1610_v40 = vmul.f32 %v4653_v17, %v434_v11  ;;  %650 = vrot.lane.b32.xlu1 %v4201_v28, %s3923_s24 }
  0xe3   :  { %648 = vrot.lane.b32.xlu0 %v4660_v35, %s3923_s24  ;;  %v258_v8 = vmul.f32 %v4665_v34, %v209_v4  ;;  %v2064_v4 = vrot.slane %v1487_v63, 4  ;;  %v360_v0 = vsel %vm356_vm6, %v349_v19, %v4629_v44 }
  0xe4   :  { %v4688_v49 = vpop.permute.xlu1 %1345  ;;  %v4690_v47 = vpop.permute.xlu0 %1343  ;;  %v2179_v5 = vsel %vm1967_vm1, %v1610_v40, %v2115_v37  ;;  %v2178_v18 = vsel %vm1967_vm1, %v1609_v39, %v2114_v58  ;;  %v4695_v12 = vsel %vm1967_vm1, %v482_v43, %v1834_v46  ;;  %v4699_v11 = vsel %vm1967_vm1, %v483_v50, %v1835_v33 }
  0xe5   :  { %2299 = vmatprep.subr.mxu1 %v2179_v5  ;;  %7879 = vst [vmem:[#allocation84_spill] sm:$0xff] %v4699_v11  ;;  %v4706_v40 = vrot.slane %v4177_v21, %v4194_v27  ;;  %v4710_v39 = vrot.slane %v4307_v36, %v4141_v7  ;;  %v4716_v50 = vrot.slane %v4422_v45, %v4371_v61  ;;  %v1784_v58 = vrot.slane %v258_v8, 4 }
  0xe6   :  { %724 = vrot.lane.b32.xlu1 %v4201_v28, %s3924_s7  ;;  %2300 = vmatpush1.msra.mxu1 %v2178_v18  ;;  %v4724_v21 = vrot.slane %v4571_v23, %v4236_v41  ;;  %v4728_v18 = vrot.slane %v4580_v53, %v4236_v41  ;;  %v359_v33 = vsel %vm356_vm6, %v4297_v20, %v349_v19 }
  0xe7   :  { %7880 = vst [vmem:[#allocation85_spill] sm:$0xff] %v4706_v40  ;;  %7881 = vst [vmem:[#allocation86_spill] sm:$0xff] %v4710_v39  ;;  %722 = vrot.lane.b32.xlu0 %v4660_v35, %s3924_s7 }
  0xe8   :  { %7882 = vst [vmem:[#allocation87_spill] sm:$0xff] %v4716_v50  ;;  %v4718_v43 = vpop.permute.xlu1 %1341  ;;  %v4720_v37 = vpop.permute.xlu0 %120  ;;  %7884 = vst [vmem:[#allocation89_spill] sm:$0xff] %v4724_v21  ;;  %v1569_v9 = vmul.f32 %v4724_v21, %v359_v33  ;;  %v1570_v19 = vmul.f32 %v4728_v18, %v360_v0  ;;  %v4781_v21 = vrot.slane %v4424_v60, %v4141_v7 }
  0xe9   :  { %7883 = vst [vmem:[#allocation88_spill] sm:$0xff] %v4718_v43  ;;  %7885 = vst [vmem:[#allocation90_spill] sm:$0xff] %v4728_v18  ;;  %v135_v46 = vsel %vm7697_vm9, %v4720_v37, %v4601_v29  ;;  %v4745_v29 = vrot.slane %v4424_v60, %v4371_v61 }
  0xea   :  { %v184_v5 = vmul.f32 %v4706_v40, %v135_v46  ;;  %v1447_v8 = vmul.f32 %v4710_v39, %v135_v46  ;;  %502 = vrot.lane.b32.xlu1 %v4201_v28, %s3925_s25  ;;  %v408_v39 = vmul.f32 %v4716_v50, %v359_v33  ;;  %v4760_v40 = vrot.slane %v4422_v45, %v4141_v7 }
  0xeb   :  { %500 = vrot.lane.b32.xlu0 %v4660_v35, %s3925_s25  ;;  %7886 = vst [vmem:[#allocation91_spill] sm:$0xff] %v4745_v29  ;;  %v4775_v33 = vrot.slane %v4256_v51, %v4168_v16  ;;  %7894 = vst [vmem:[#allocation99_spill] sm:$0xff] %v4781_v21  ;;  %v2090_v50 = vrot.slane %v1569_v9, 4  ;;  %v1359_v9 = vsel %vm7588_vm10, %v4690_v47, %v4688_v49 }
  0xec   :  { %v4747_v63 = vpop.permute.xlu1 %202  ;;  %v201_v20 = vpop.permute.xlu0 %200  ;;  %v2160_v17 = vsel %vm1967_vm1, %v1447_v8, %v2064_v4  ;;  %v4751_v46 = vsel %vm1967_vm1, %v184_v5, %v1784_v58  ;;  %7889 = vst [vmem:[#allocation94_spill] sm:$0xff] %v4760_v40  ;;  %v4764_v4 = vrot.slane %v4571_v23, %v4286_v62  ;;  %v4768_v58 = vrot.slane %v4580_v53, %v4286_v62 }
  0xed   :  { %7887 = vst [vmem:[#allocation92_spill] sm:$0xff] %v4747_v63  ;;  %7888 = vst [vmem:[#allocation93_spill] sm:$0xff] %v4751_v46  ;;  %2233 = vmatpush1.msra.mxu0 %v2160_v17  ;;  %v409_v17 = vmul.f32 %v4745_v29, %v360_v0  ;;  %v1810_v18 = vrot.slane %v408_v39, 4  ;;  %v2091_v29 = vrot.slane %v1570_v19, 4 }
  0xee   :  { %576 = vrot.lane.b32.xlu1 %v4201_v28, %s3926_s26  ;;  %7890 = vst [vmem:[#allocation95_spill] sm:$0xff] %v4764_v4  ;;  %7891 = vst [vmem:[#allocation96_spill] sm:$0xff] %v4768_v58 }
  0xef   :  { %574 = vrot.lane.b32.xlu0 %v4660_v35, %s3926_s26  ;;  %7892 = vst [vmem:[#allocation97_spill] sm:$0xff] %v4775_v33 }
  0xf0   :  { %v4777_v5 = vpop.permute.xlu1 %276  ;;  %v275_v8 = vpop.permute.xlu0 %274 }
  0xf1   :  { %7893 = vst [vmem:[#allocation98_spill] sm:$0xff] %v4777_v5  ;;  %v285_v34 = vsel %vm282_vm7, %v4466_v59, %v275_v8  ;;  %v286_v0 = vsel %vm282_vm7, %v275_v8, %v4777_v5  ;;  %v1408_v5 = vmul.f32 %v4775_v33, %v1359_v9  ;;  %v4846_v9 = vrot.slane %v4580_v53, %v4371_v61 }
  0xf2   :  { %v334_v11 = vmul.f32 %v4760_v40, %v285_v34  ;;  %v1529_v44 = vmul.f32 %v4764_v4, %v285_v34  ;;  %v1530_v52 = vmul.f32 %v4768_v58, %v286_v0  ;;  %354 = vrot.lane.b32.xlu1 %v4201_v28, %s3927_s27  ;;  %v335_v59 = vmul.f32 %v4781_v21, %v286_v0 }
  0xf3   :  { %352 = vrot.lane.b32.xlu0 %v4660_v35, %s3927_s27  ;;  %v4809_v58 = vrot.slane %v4307_v36, %v4168_v16  ;;  %v1811_v40 = vrot.slane %v409_v17, 4  ;;  %v211_v17 = vsel %vm7698_vm8, %v4426_v1, %v201_v20  ;;  %v212_v0 = vsel %vm7698_vm8, %v201_v20, %v4747_v63  ;;  %7901 = vst [vmem:[#allocation106_spill] sm:$0xff] %v4846_v9 }
  0xf4   :  { %v4798_v39 = vpop.permute.xlu1 %1197  ;;  %v4800_v19 = vpop.permute.xlu0 %1195  ;;  %v2171_v34 = vsel %vm1967_vm1, %v1530_v52, %v2091_v29  ;;  %v2170_v8 = vsel %vm1967_vm1, %v1529_v44, %v2090_v50  ;;  %v4805_v4 = vsel %vm1967_vm1, %v334_v11, %v1810_v18  ;;  %v4816_v52 = vrot.slane %v4256_v51, %v4194_v27 }
  0xf5   :  { %7895 = vst [vmem:[#allocation100_spill] sm:$0xff] %v4809_v58  ;;  %2301 = vmatprep.subr.mxu1 %v2171_v34  ;;  %v1358_v44 = vsel %vm7588_vm10, %v4718_v43, %v4690_v47  ;;  %v4825_v11 = vrot.slane %v4422_v45, %v4168_v16  ;;  %v4829_v50 = vrot.slane %v4424_v60, %v4168_v16  ;;  %v2041_v21 = vrot.slane %v1408_v5, 4 }
  0xf6   :  { %428 = vrot.lane.b32.xlu1 %v4201_v28, %s3922_s18  ;;  %2302 = vmatpush1.msra.mxu1 %v2170_v8  ;;  %7896 = vst [vmem:[#allocation101_spill] sm:$0xff] %v4816_v52  ;;  %v4833_v18 = vrot.slane %v4571_v23, %v4371_v61  ;;  %v4838_v47 = vsel %vm1967_vm1, %v335_v59, %v1811_v40  ;;  %v4850_v8 = vld [vmem:[#allocation7 + $0x48] sm:$0xff] }
  0xf7   :  { %426 = vrot.lane.b32.xlu0 %v4660_v35, %s3922_s18  ;;  %7897 = vst [vmem:[#allocation102_spill] sm:$0xff] %v4825_v11  ;;  %7898 = vst [vmem:[#allocation103_spill] sm:$0xff] %v4829_v50  ;;  %v1407_v33 = vmul.f32 %v4809_v58, %v1358_v44  ;;  %v4858_v1 = vrot.slane %v4307_v36, %v4194_v27  ;;  %v4862_v20 = vrot.slane %v4850_v8, %v4157_v14 }
  0xf8   :  { %7899 = vst [vmem:[#allocation104_spill] sm:$0xff] %v4833_v18  ;;  %v4835_v51 = vpop.permute.xlu1 %1271  ;;  %v1270_v29 = vpop.permute.xlu0 %1269  ;;  %7900 = vst [vmem:[#allocation105_spill] sm:$0xff] %v4838_v47  ;;  %v4868_v5 = vrot.slane %v4422_v45, %v4194_v27  ;;  %v260_v59 = vmul.f32 %v4825_v11, %v211_v17  ;;  %v261_v44 = vmul.f32 %v4829_v50, %v212_v0 }
  0xf9   :  { %v1285_v34 = vsel %vm7587_vm11, %v1270_v29, %v4835_v51  ;;  %7902 = vst [vmem:[#allocation107_spill] sm:$0xff] %v4858_v1  ;;  %7903 = vst [vmem:[#allocation108_spill] sm:$0xff] %v4862_v20  ;;  %v1490_v47 = vmul.f32 %v4846_v9, %v212_v0  ;;  %v4883_v45 = vrot.slane %v4424_v60, %v4194_v27 }
  0xfa   :  { %v1334_v40 = vmul.f32 %v4816_v52, %v1285_v34  ;;  %206 = vrot.lane.b32.xlu1 %v4201_v28, %s3928_s30  ;;  %7904 = vst [vmem:[#allocation109_spill] sm:$0xff] %v4868_v5  ;;  %v1489_v34 = vmul.f32 %v4833_v18, %v211_v17  ;;  %v4887_v50 = vrot.slane %v4571_v23, %v4141_v7  ;;  %v2040_v17 = vrot.slane %v1407_v33, 4 }
  0xfb   :  { %204 = vrot.lane.b32.xlu0 %v4660_v35, %s3928_s30  ;;  %7907 = vst [vmem:[#allocation112_spill] sm:$0xff] %v4883_v45  ;;  %v1211_v18 = vsel %vm1209_vm12, %v4800_v19, %v4798_v39  ;;  %v4903_v60 = vrot.slane %v4850_v8, %v4191_v26  ;;  %v1786_v33 = vrot.slane %v260_v59, 4  ;;  %v2067_v9 = vrot.slane %v1490_v47, 4  ;;  %v4919_v47 = vld [vmem:[#allocation7 + $0x40] sm:$0xff] }
  0xfc   :  { %v4873_v36 = vpop.permute.xlu1 %1267  ;;  %v4875_v52 = vpop.permute.xlu0 %1193  ;;  %v2153_v58 = vsel %vm1967_vm1, %v1334_v40, %v2041_v21  ;;  %7908 = vst [vmem:[#allocation113_spill] sm:$0xff] %v4887_v50  ;;  %v2066_v0 = vrot.slane %v1489_v34, 4  ;;  %v1260_v11 = vmul.f32 %v4862_v20, %v1211_v18 }
  0xfd   :  { %7905 = vst [vmem:[#allocation110_spill] sm:$0xff] %v4873_v36  ;;  %7906 = vst [vmem:[#allocation111_spill] sm:$0xff] %v4875_v52  ;;  %v1284_v43 = vsel %vm7587_vm11, %v4873_v36, %v1270_v29  ;;  %2234 = vmatprep.subr.mxu0 %v2153_v58  ;;  %v4897_v58 = vrot.slane %v4580_v53, %v4141_v7  ;;  %v1787_v29 = vrot.slane %v261_v44, 4 }
  0xfe   :  { %v1333_v21 = vmul.f32 %v4858_v1, %v1284_v43  ;;  %280 = vrot.lane.b32.xlu1 %v4201_v28, %s3929_s9  ;;  %7910 = vst [vmem:[#allocation115_spill] sm:$0xff] %v4903_v60 }
  0xff   :  { %7909 = vst [vmem:[#allocation114_spill] sm:$0xff] %v4897_v58  ;;  %278 = vrot.lane.b32.xlu0 %v4660_v35, %s3929_s9 }
 0x100   :  { %v4905_v40 = vpop.permute.xlu1 %128  ;;  %v127_v43 = vpop.permute.xlu0 %126  ;;  %v2152_v1 = vsel %vm1967_vm1, %v1333_v21, %v2040_v17 }
 0x101   :  { %7911 = vst [vmem:[#allocation116_spill] sm:$0xff] %v4905_v40  ;;  %v137_v36 = vsel %vm7697_vm9, %v4599_v22, %v127_v43  ;;  %v138_v63 = vsel %vm7697_vm9, %v127_v43, %v4905_v40  ;;  %2235 = vmatpush1.msra.mxu0 %v2152_v1  ;;  %v1952_v43 = vrot.slane %v1260_v11, 4 }
 0x102   :  { %v186_v46 = vmul.f32 %v4868_v5, %v137_v36  ;;  %v187_v59 = vmul.f32 %v4883_v45, %v138_v63  ;;  %v1449_v44 = vmul.f32 %v4887_v50, %v137_v36  ;;  %v1450_v34 = vmul.f32 %v4897_v58, %v138_v63  ;;  %132 = vrot.lane.b32.xlu1 %v4201_v28, %s3930_s10 }
 0x103   :  { %130 = vrot.lane.b32.xlu0 %v4660_v35, %s3930_s10  ;;  %v4937_v45 = vrot.slane %v4919_v47, %v4157_v14 }
 0x104   :  { %v4923_v22 = vpop.permute.xlu1 %1123  ;;  %v1122_v18 = vpop.permute.xlu0 %1121  ;;  %v2163_v1 = vsel %vm1967_vm1, %v1450_v34, %v2067_v9  ;;  %v2162_v17 = vsel %vm1967_vm1, %v1449_v44, %v2066_v0  ;;  %v4928_v21 = vsel %vm1967_vm1, %v186_v46, %v1786_v33  ;;  %v4931_v63 = vsel %vm1967_vm1, %v187_v59, %v1787_v29 }
 0x105   :  { %7912 = vst [vmem:[#allocation117_spill] sm:$0xff] %v4931_v63  ;;  %v1137_v36 = vsel %vm1135_vm13, %v1122_v18, %v4923_v22  ;;  %2303 = vmatprep.subr.mxu1 %v2163_v1  ;;  %7913 = vst [vmem:[#allocation118_spill] sm:$0xff] %v4937_v45  ;;  %v1210_v46 = vsel %vm1209_vm12, %v4875_v52, %v4800_v19  ;;  %v4955_v0 = vrot.slane %v4919_v47, %v4191_v26 }
 0x106   :  { %v1186_v50 = vmul.f32 %v4903_v60, %v1137_v36  ;;  %1353 = vrot.lane.b32.xlu1 %v4201_v28, %s3931_s11  ;;  %2304 = vmatpush1.msra.mxu1 %v2162_v17  ;;  %v1259_v29 = vmul.f32 %v4937_v45, %v1210_v46  ;;  %v4967_v44 = vrot.slane %v4850_v8, %v4236_v41 }
 0x107   :  { %1351 = vrot.lane.b32.xlu0 %v4660_v35, %s3931_s11  ;;  %7915 = vst [vmem:[#allocation120_spill] sm:$0xff] %v4955_v0  ;;  %v4985_v46 = vrot.slane %v4850_v8, %v4286_v62 }
 0x108   :  { %v4947_v9 = vpop.permute.xlu1 %1349  ;;  %v1348_v11 = vpop.permute.xlu0 %1347  ;;  %v2025_v33 = vsel %vm1967_vm1, %v1186_v50, %v1952_v43  ;;  %7917 = vst [vmem:[#allocation122_spill] sm:$0xff] %v4967_v44  ;;  %v1951_v34 = vrot.slane %v1259_v29, 4 }
 0x109   :  { %7914 = vst [vmem:[#allocation119_spill] sm:$0xff] %v4947_v9  ;;  %2236 = vmatprep.subr.mxu0 %v2025_v33  ;;  %7918 = vst [vmem:[#allocation123_spill] sm:$0xff] %v4985_v46  ;;  %v1360_v5 = vsel %vm7588_vm10, %v4688_v49, %v1348_v11 }
 0x10a   :  { %1205 = vrot.lane.b32.xlu1 %v4201_v28, %s3932_s12 }
 0x10b   :  { %1203 = vrot.lane.b32.xlu0 %v4660_v35, %s3932_s12 }
 0x10c   :  { %v4959_v19 = vpop.permute.xlu1 %934  ;;  %v4961_v59 = vpop.permute.xlu0 %1119 }
 0x10d   :  { %7916 = vst [vmem:[#allocation121_spill] sm:$0xff] %v4961_v59  ;;  %v1136_v50 = vsel %vm1135_vm13, %v4961_v59, %v1122_v18  ;;  %v1112_v18 = vmul.f32 %v4967_v44, %v4015_v2  ;;  %v4996_v2 = vld [vmem:[%s7483_s0 + $0x10] sm:$0xff] }
 0x10e   :  { %v1185_v1 = vmul.f32 %v4955_v0, %v1136_v50  ;;  %1279 = vrot.lane.b32.xlu1 %v4201_v28, %s3933_s13  ;;  %7919 = vst [vmem:[#allocation124_spill] sm:$0xff] %v4996_v2 }
 0x10f   :  { %1277 = vrot.lane.b32.xlu0 %v4660_v35, %s3933_s13  ;;  %v1928_v50 = vrot.slane %v1112_v18, 4  ;;  %v5011_v18 = vrot.slane %v4571_v23, %v4168_v16 }
 0x110   :  { %v1009_v17 = vpop.permute.xlu1 %1008  ;;  %v4974_v36 = vpop.permute.xlu0 %936  ;;  %v2024_v43 = vsel %vm1967_vm1, %v1185_v1, %v1951_v34 }
 0x111   :  { %2237 = vmatpush1.msra.mxu0 %v2024_v43  ;;  %v1361_v43 = vsel %vm7588_vm10, %v1348_v11, %v4947_v9  ;;  %7921 = vst [vmem:[#allocation126_spill] sm:$0xff] %v5011_v18  ;;  %v5035_v11 = vrot.slane %v4580_v53, %v4194_v27  ;;  %vm800_vm10 = vcmask 72704  }
 0x112   :  { %1131 = vrot.lane.b32.xlu1 %v4201_v28, %s3934_s14  ;;  %v5002_v28 = vrot.slane %v4580_v53, %v4168_v16 }
 0x113   :  { %1129 = vrot.lane.b32.xlu0 %v4660_v35, %s3934_s14  ;;  %7925 = vst [vmem:[#allocation130_spill] sm:$0xff] %v5035_v11 }
 0x114   :  { %v4987_v33 = vpop.permute.xlu1 %1199  ;;  %v4989_v29 = vpop.permute.xlu0 %1010  ;;  %7920 = vst [vmem:[#allocation125_spill] sm:$0xff] %v5002_v28  ;;  %v1410_v60 = vmul.f32 %v5002_v28, %v1361_v43 }
 0x115   :  { %v1023_v34 = vsel %vm1022_vm14, %v1009_v17, %v4989_v29 }
 0x116   :  { %942 = vrot.lane.b32.xlu1 %v4996_v2, %s3935_s15  ;;  %v1072_v1 = vmul.f32 %v4985_v46, %v1023_v34  ;;  %v5020_v34 = vrot.slane %v4919_v47, %v4236_v41  ;;  %v5024_v46 = vrot.slane %v4571_v23, %v4194_v27  ;;  %v2043_v53 = vrot.slane %v1410_v60, 4 }
 0x117   :  { %1355 = vrot.lane.b32.xlu0 %v4227_v38, %s3931_s11  ;;  %v5065_v60 = vrot.slane %v4850_v8, %v4371_v61 }
 0x118   :  { %v1274_v58 = vpop.permute.xlu1 %1273  ;;  %v5015_v44 = vpop.permute.xlu0 %1201  ;;  %v2017_v0 = vsel %vm1967_vm1, %v1072_v1, %v1928_v50  ;;  %7923 = vst [vmem:[#allocation128_spill] sm:$0xff] %v5020_v34  ;;  %7924 = vst [vmem:[#allocation129_spill] sm:$0xff] %v5024_v46  ;;  %v1409_v50 = vmul.f32 %v5011_v18, %v1360_v5  ;;  %v3829_v1 = vld [vmem:[%s7483_s0] sm:$0xff]  ;;  %v5056_v18 = vrot.slane %v4919_v47, %v4286_v62 }
 0x119   :  { %7922 = vst [vmem:[#allocation127_spill] sm:$0xff] %v5015_v44  ;;  %2238 = vmatprep.subr.mxu0 %v2017_v0  ;;  %v1286_v49 = vsel %vm7587_vm11, %v4835_v51, %v1274_v58  ;;  %v1111_v43 = vmul.f32 %v3829_v1, %v5020_v34  ;;  %7930 = vst [vmem:[#allocation135_spill] sm:$0xff] %v5065_v60 }
 0x11a   :  { %1016 = vrot.lane.b32.xlu1 %v4996_v2, %s3936_s16  ;;  %v1335_v51 = vmul.f32 %v5024_v46, %v1286_v49  ;;  %7928 = vst [vmem:[#allocation133_spill] sm:$0xff] %v5056_v18  ;;  %v2042_v45 = vrot.slane %v1409_v50, 4 }
 0x11b   :  { %944 = vrot.lane.b32.xlu0 %v4660_v35, %s3935_s15  ;;  %v1927_v46 = vrot.slane %v1111_v43, 4 }
 0x11c   :  { %v5038_v23 = vpop.permute.xlu1 %931  ;;  %v5040_v0 = vpop.permute.xlu0 %1275  ;;  %v2154_v50 = vsel %vm1967_vm1, %v1335_v51, %v2042_v45  ;;  %v5086_v45 = vld [vmem:[#allocation7 + $0x50] sm:$0xff] }
 0x11d   :  { %7926 = vst [vmem:[#allocation131_spill] sm:$0xff] %v5038_v23  ;;  %7927 = vst [vmem:[#allocation132_spill] sm:$0xff] %v5040_v0  ;;  %v1287_v28 = vsel %vm7587_vm11, %v1274_v58, %v5040_v0  ;;  %vm7642_vm11 = vcmask 64512   ;;  %v5120_v63 = vrot.slane %v5086_v45, %v4191_v26 }
 0x11e   :  { %1207 = vrot.lane.b32.xlu1 %v4227_v38, %s3932_s12  ;;  %v1336_v5 = vmul.f32 %v5035_v11, %v1287_v28  ;;  %v949_v11 = vsel %vm948_vm15, %v4959_v19, %v4974_v36 }
 0x11f   :  { %1018 = vrot.lane.b32.xlu0 %v4660_v35, %s3936_s16  ;;  %v998_v34 = vmul.f32 %v5065_v60, %v949_v11  ;;  %v5100_v11 = vrot.slane %v5086_v45, %v4157_v14  ;;  %v5114_v60 = vrot.slane %v4850_v8, %v4168_v16  ;;  %7936 = vst [vmem:[#allocation141_spill] sm:$0xff] %v5120_v63 }
 0x120   :  { %v5058_v1 = vpop.permute.xlu1 %786  ;;  %v5060_v49 = vpop.permute.xlu0 %1005  ;;  %v2155_v58 = vsel %vm1967_vm1, %v1336_v5, %v2043_v53 }
 0x121   :  { %7929 = vst [vmem:[#allocation134_spill] sm:$0xff] %v5060_v49  ;;  %v1038_v28 = vsel %vm1022_vm14, %v5060_v49, %v1009_v17  ;;  %2305 = vmatprep.subr.mxu1 %v2155_v58  ;;  %v5081_v58 = vld [vmem:[#allocation7 + $0x58] sm:$0xff]  ;;  %7933 = vst [vmem:[#allocation138_spill] sm:$0xff] %v5100_v11  ;;  %v1904_v20 = vrot.slane %v998_v34, 4 }
 0x122   :  { %794 = vrot.lane.b32.xlu1 %v4996_v2, %s3937_s19  ;;  %v1071_v53 = vmul.f32 %v5056_v18, %v1038_v28  ;;  %2306 = vmatpush1.msra.mxu1 %v2154_v50  ;;  %v5090_v51 = vrot.slane %v5081_v58, %v4157_v14  ;;  %v1213_v28 = vsel %vm1209_vm12, %v4987_v33, %v5015_v44 }
 0x123   :  { %1281 = vrot.lane.b32.xlu0 %v4227_v38, %s3933_s13  ;;  %7935 = vst [vmem:[#allocation140_spill] sm:$0xff] %v5114_v60 }
 0x124   :  { %v861_v43 = vpop.permute.xlu1 %860  ;;  %v5078_v5 = vpop.permute.xlu0 %788  ;;  %v2016_v17 = vsel %vm1967_vm1, %v1071_v53, %v1927_v46  ;;  %7931 = vst [vmem:[#allocation136_spill] sm:$0xff] %v5090_v51  ;;  %v5096_v46 = vrot.slane %v4850_v8, %v4141_v7  ;;  %v1212_v53 = vsel %vm1209_vm12, %v4798_v39, %v4987_v33  ;;  %v5128_v39 = vrot.slane %v5081_v58, %v4191_v26 }
 0x125   :  { %2239 = vmatpush1.msra.mxu0 %v2016_v17  ;;  %v5110_v17 = vrot.slane %v4919_v47, %v4371_v61  ;;  %v1262_v33 = vmul.f32 %v5090_v51, %v1213_v28  ;;  %v801_v34 = vsel %vm800_vm10, %v5058_v1, %v5078_v5 }
 0x126   :  { %868 = vrot.lane.b32.xlu1 %v4996_v2, %s3938_s20  ;;  %7932 = vst [vmem:[#allocation137_spill] sm:$0xff] %v5096_v46  ;;  %7937 = vst [vmem:[#allocation142_spill] sm:$0xff] %v5128_v39  ;;  %v964_v2 = vsel %vm948_vm15, %v5038_v23, %v4959_v19  ;;  %v850_v44 = vmul.f32 %v5114_v60, %v801_v34 }
 0x127   :  { %796 = vrot.lane.b32.xlu0 %v4660_v35, %s3937_s19  ;;  %7934 = vst [vmem:[#allocation139_spill] sm:$0xff] %v5110_v17  ;;  %v1954_v19 = vrot.slane %v1262_v33, 4 }
 0x128   :  { %v1126_v50 = vpop.permute.xlu1 %1125  ;;  %v5116_v18 = vpop.permute.xlu0 %862 }
 0x129   :  { %v875_v49 = vsel %vm7642_vm11, %v861_v43, %v5116_v18  ;;  %v1138_v59 = vsel %vm1135_vm13, %v4923_v22, %v1126_v50 }
 0x12a   :  { %1133 = vrot.lane.b32.xlu1 %v4227_v38, %s3934_s14  ;;  %v924_v52 = vmul.f32 %v5096_v46, %v875_v49  ;;  %v1261_v38 = vmul.f32 %v5100_v11, %v1212_v53  ;;  %v1187_v22 = vmul.f32 %v5120_v63, %v1138_v59  ;;  %v5155_v53 = vld [vmem:[%s7483_s0 + $0x18] sm:$0xff]  ;;  %v997_v46 = vmul.f32 %v5110_v17, %v964_v2  ;;  %v96_v11 = vld [vmem:[#allocation7 + $0xe8] sm:$0x7] }
 0x12b   :  { %870 = vrot.lane.b32.xlu0 %v4660_v35, %s3938_s20  ;;  %7940 = vst [vmem:[#allocation145_spill] sm:$0xff] %v5155_v53  ;;  %v5169_v59 = vrot.slane %v4850_v8, %v4194_v27  ;;  %v5176_v2 = vrot.slane %v5081_v58, %v4236_v41 }
 0x12c   :  { %v5143_v0 = vpop.permute.xlu1 %783  ;;  %v5145_v28 = vpop.permute.xlu0 %1127  ;;  %v2009_v51 = vsel %vm1967_vm1, %v924_v52, %v1904_v20  ;;  %v5165_v20 = vrot.slane %v4919_v47, %v4141_v7  ;;  %v1903_v17 = vrot.slane %v997_v46, 4  ;;  %v5199_v46 = vrot.slane %v5086_v45, %v4286_v62 }
 0x12d   :  { %7938 = vst [vmem:[#allocation143_spill] sm:$0xff] %v5143_v0  ;;  %7939 = vst [vmem:[#allocation144_spill] sm:$0xff] %v5145_v28  ;;  %v1139_v49 = vsel %vm1135_vm13, %v1126_v50, %v5145_v28  ;;  %2240 = vmatprep.subr.mxu0 %v2009_v51  ;;  %v1953_v51 = vrot.slane %v1261_v38, 4  ;;  %v5185_v38 = vrot.slane %v5086_v45, %v4236_v41  ;;  %v5503_v28 = vld [vmem:[#allocation2] sm:$0xff] }
 0x12e   :  { %1020 = vrot.lane.b32.xlu1 %v5155_v53, %s3936_s16  ;;  %v1188_v52 = vmul.f32 %v5128_v39, %v1139_v49  ;;  %7941 = vst [vmem:[#allocation146_spill] sm:$0xff] %v5165_v20  ;;  %7942 = vst [vmem:[#allocation147_spill] sm:$0xff] %v5169_v59  ;;  %v1880_v49 = vrot.slane %v850_v44, 4  ;;  %v776_v44 = vmul.f32 %v5169_v59, %v4252_v48 }
 0x12f   :  { %946 = vrot.lane.b32.xlu0 %v5155_v53, %s3935_s15  ;;  %7944 = vst [vmem:[#allocation149_spill] sm:$0xff] %v5176_v2  ;;  %v2026_v8 = vsel %vm1967_vm1, %v1187_v22, %v1953_v51  ;;  %7945 = vst [vmem:[#allocation150_spill] sm:$0xff] %v5185_v38  ;;  %v1114_v22 = vmul.f32 %v5176_v2, %v4047_v3  ;;  %v3831_v51 = vld [vmem:[%s7483_s0 + $0x8] sm:$0xff] }
 0x130   :  { %v939_v50 = vpop.permute.xlu1 %938  ;;  %v5171_v34 = vpop.permute.xlu0 %857  ;;  %v2027_v33 = vsel %vm1967_vm1, %v1188_v52, %v1954_v19  ;;  %7947 = vst [vmem:[#allocation152_spill] sm:$0xff] %v5199_v46  ;;  %v1113_v48 = vmul.f32 %v3831_v51, %v5185_v38  ;;  %v5230_v38 = vrot.slane %v4919_v47, %v4194_v27  ;;  %7998 = vst [vmem:[#allocation195_spill] sm:$0xff] %v5503_v28 }
 0x131   :  { %7943 = vst [vmem:[#allocation148_spill] sm:$0xff] %v5171_v34  ;;  %v890_v60 = vsel %vm7642_vm11, %v5171_v34, %v861_v43  ;;  %2307 = vmatprep.subr.mxu1 %v2027_v33  ;;  %v7986_v34 = vld [vmem:[#allocation38_spill] sm:$0xff] }
 0x132   :  { %872 = vrot.lane.b32.xlu1 %v5155_v53, %s3938_s20  ;;  %v923_v19 = vmul.f32 %v5165_v20, %v890_v60  ;;  %2308 = vmatpush1.msra.mxu1 %v2026_v8  ;;  %v2001_v60 = vsel %vm1967_vm1, %v776_v44, %v1880_v49  ;;  %v5208_v8 = vrot.slane %v4919_v47, %v4168_v16  ;;  %v5245_v47 = vld [vmem:[#allocation7] sm:$0xff] }
 0x133   :  { %798 = vrot.lane.b32.xlu0 %v5155_v53, %s3937_s19  ;;  %v816_v49 = vsel %vm800_vm10, %v5143_v0, %v5058_v1  ;;  %7951 = vst [vmem:[#allocation156_spill] sm:$0xff] %v5230_v38  ;;  %v5491_v53 = vrot.slane %v96_v11, %v4141_v7 }
 0x134   :  { %v1013_v43 = vpop.permute.xlu1 %1012  ;;  %v5192_v52 = vpop.permute.xlu0 %940  ;;  %v2008_v33 = vsel %vm1967_vm1, %v923_v19, %v1903_v17  ;;  %7948 = vst [vmem:[#allocation153_spill] sm:$0xff] %v5208_v8  ;;  %v5214_v17 = vrot.slane %v5081_v58, %v4286_v62 }
 0x135   :  { %7946 = vst [vmem:[#allocation151_spill] sm:$0xff] %v5192_v52  ;;  %2241 = vmatpush1.msra.mxu0 %v2008_v33  ;;  %v1024_v3 = vsel %vm1022_vm14, %v4989_v29, %v1013_v43  ;;  %v1930_v33 = vrot.slane %v1114_v22, 4  ;;  %v1929_v29 = vrot.slane %v1113_v48, 4  ;;  %7996 = vst [vmem:[#allocation193_spill] sm:$0xff] %v5491_v53 }
 0x136   :  { %2242 = vmatprep.subr.mxu0 %v2001_v60  ;;  %7949 = vst [vmem:[#allocation154_spill] sm:$0xff] %v5214_v17  ;;  %v1073_v51 = vmul.f32 %v5199_v46, %v1024_v3  ;;  %v849_v60 = vmul.f32 %v5208_v8, %v816_v49  ;;  %v5261_v49 = vrot.slane %v5086_v45, %v4168_v16 }
 0x137   :  { %v5276_v8 = vrot.slane %v5086_v45, %v4141_v7 }
 0x138   :  { %v5219_v19 = vpop.permute.xlu1 %635  ;;  %v5221_v44 = vpop.permute.xlu0 %1014  ;;  %v1879_v48 = vrot.slane %v849_v60, 4  ;;  %7955 = vst [vmem:[#allocation160_spill] sm:$0xff] %v5261_v49 }
 0x139   :  { %7950 = vst [vmem:[#allocation155_spill] sm:$0xff] %v5221_v44  ;;  %v1025_v59 = vsel %vm1022_vm14, %v1013_v43, %v5221_v44  ;;  %v2018_v43 = vsel %vm1967_vm1, %v1073_v51, %v1929_v29  ;;  %v950_v51 = vsel %vm948_vm15, %v4974_v36, %v939_v50  ;;  %7958 = vst [vmem:[#allocation163_spill] sm:$0xff] %v5276_v8  ;;  %v5493_v44 = vld [vmem:[#allocation7 + $0xa8] sm:$0xff] }
 0x13a   :  { %v1074_v20 = vmul.f32 %v5214_v17, %v1025_v59  ;;  %v5243_v59 = vrot.slane %v5081_v58, %v4371_v61 }
 0x13c   :  { %v791_v1 = vpop.permute.xlu1 %790  ;;  %v5232_v2 = vpop.permute.xlu0 %709  ;;  %v2019_v63 = vsel %vm1967_vm1, %v1074_v20, %v1930_v33  ;;  %7952 = vst [vmem:[#allocation157_spill] sm:$0xff] %v5243_v59  ;;  %v5251_v20 = vrot.slane %v5081_v58, %v4168_v16 }
 0x13d   :  { %v5238_v22 = vsel %vm726_vm0, %v5232_v2, %v4238_v42  ;;  %2309 = vmatprep.subr.mxu1 %v2019_v63  ;;  %v5255_v42 = vrot.slane %v5086_v45, %v4371_v61  ;;  %v951_v63 = vsel %vm948_vm15, %v939_v50, %v5192_v52  ;;  %v802_v29 = vsel %vm800_vm10, %v5078_v5, %v791_v1  ;;  %v7990_v52 = vld [vmem:[#allocation57_spill] sm:$0xff] }
 0x13e   :  { %v775_v3 = vmul.f32 %v5230_v38, %v5238_v22  ;;  %2310 = vmatpush1.msra.mxu1 %v2018_v43  ;;  %7953 = vst [vmem:[#allocation158_spill] sm:$0xff] %v5251_v20  ;;  %v5272_v38 = vrot.slane %v5245_v47, %v4157_v14  ;;  %v1000_v36 = vmul.f32 %v5243_v59, %v951_v63 }
 0x13f   :  { %7954 = vst [vmem:[#allocation159_spill] sm:$0xff] %v5255_v42  ;;  %v851_v63 = vmul.f32 %v5261_v49, %v802_v29 }
 0x140   :  { %v865_v33 = vpop.permute.xlu1 %864  ;;  %v5267_v60 = vpop.permute.xlu0 %792  ;;  %v2000_v43 = vsel %vm1967_vm1, %v775_v3, %v1879_v48  ;;  %7957 = vst [vmem:[#allocation162_spill] sm:$0xff] %v5272_v38  ;;  %v5287_v48 = vrot.slane %v5081_v58, %v4141_v7  ;;  %v999_v3 = vmul.f32 %v5255_v42, %v950_v51  ;;  %v98_v51 = vld [vmem:[#allocation7 + $0xf8] sm:$0x7]  ;;  %v1906_v49 = vrot.slane %v1000_v36, 4 }
 0x141   :  { %7956 = vst [vmem:[#allocation161_spill] sm:$0xff] %v5267_v60  ;;  %v803_v46 = vsel %vm800_vm10, %v791_v1, %v5267_v60  ;;  %2243 = vmatpush1.msra.mxu0 %v2000_v43  ;;  %v876_v5 = vsel %vm7642_vm11, %v5116_v18, %v865_v33  ;;  %v5293_v1 = vsel %vm652_vm2, %v5219_v19, %v4145_v10 }
 0x142   :  { %v852_v50 = vmul.f32 %v5251_v20, %v803_v46  ;;  %2244 = vmatprep.subr.mxu0 %v4303_v31  ;;  %7959 = vst [vmem:[#allocation164_spill] sm:$0xff] %v5287_v48  ;;  %v5300_v18 = vrot.slane %v5086_v45, %v4194_v27  ;;  %v5304_v31 = vrot.slane %v5081_v58, %v4194_v27  ;;  %v1905_v17 = vrot.slane %v999_v3, 4 }
 0x143   :  { %v925_v20 = vmul.f32 %v5276_v8, %v876_v5  ;;  %v5311_v10 = vrot.slane %v5245_v47, %v4236_v41  ;;  %v5317_v45 = vrot.slane %v5245_v47, %v4191_v26  ;;  %v701_v58 = vmul.f32 %v5272_v38, %v5293_v1 }
 0x144   :  { %v5296_v43 = vpop.permute.xlu1 %487  ;;  %7960 = vst [vmem:[#allocation165_spill] sm:$0xff] %v5300_v18  ;;  %7961 = vst [vmem:[#allocation166_spill] sm:$0xff] %v5304_v31  ;;  %v1882_v59 = vrot.slane %v852_v50, 4  ;;  %v1881_v5 = vrot.slane %v851_v63, 4  ;;  %v778_v36 = vmul.f32 %v5304_v31, %v4397_v24  ;;  %v5334_v38 = vrot.slane %v98_v51, %v4168_v16  ;;  %v5336_v50 = vld [vmem:[#allocation7 + $0xb8] sm:$0xff] }
 0x145   :  { %v5306_v46 = vpop.permute.xlu0 %866  ;;  %7963 = vst [vmem:[#allocation168_spill] sm:$0xff] %v5311_v10  ;;  %7964 = vst [vmem:[#allocation169_spill] sm:$0xff] %v5317_v45  ;;  %v5325_v8 = vsel %vm504_vm4, %v5296_v43, %v4268_v56  ;;  %v5343_v56 = vrot.slane %v5245_v47, %v4371_v61  ;;  %v2010_v24 = vsel %vm1967_vm1, %v925_v20, %v1905_v17 }
 0x146   :  { %7962 = vst [vmem:[#allocation167_spill] sm:$0xff] %v5306_v46  ;;  %v877_v29 = vsel %vm7642_vm11, %v865_v33, %v5306_v46  ;;  %v777_v33 = vmul.f32 %v5300_v18, %v4161_v15  ;;  %7965 = vst [vmem:[#allocation170_spill] sm:$0xff] %v5334_v38  ;;  %v1855_v18 = vrot.slane %v701_v58, 4  ;;  %v2003_v31 = vsel %vm1967_vm1, %v778_v36, %v1882_v59 }
 0x147   :  { %v926_v42 = vmul.f32 %v5287_v48, %v877_v29  ;;  %7966 = vst [vmem:[#allocation171_spill] sm:$0xff] %v5336_v50  ;;  %7967 = vst [vmem:[#allocation172_spill] sm:$0xff] %v5343_v56  ;;  %v5353_v29 = vrot.slane %v5245_v47, %v4286_v62  ;;  %v5365_v17 = vrot.slane %v5336_v50, %v4157_v14  ;;  %v5416_v48 = vld [vmem:[#allocation7 + $0x30] sm:$0xff]  ;;  %vm2192_vm11 = vcmask 883712  }
 0x148   :  { %v5327_v39 = vpop.permute.xlu1 %339  ;;  %v5377_v59 = vrot.slane %v5336_v50, %v4236_v41  ;;  %v5380_v36 = vrot.slane %v98_v51, %v4194_v27 }
 0x149   :  { %v5338_v3 = vpop.permute.xlu0 %561  ;;  %v2011_v63 = vsel %vm1967_vm1, %v926_v42, %v1906_v49  ;;  %7968 = vst [vmem:[#allocation173_spill] sm:$0xff] %v5353_v29  ;;  %v553_v42 = vmul.f32 %v5311_v10, %v5325_v8  ;;  %7970 = vst [vmem:[#allocation175_spill] sm:$0xff] %v5365_v17  ;;  %v5370_v20 = vsel %vm356_vm6, %v5327_v39, %v4368_v57 }
 0x14a   :  { %v5348_v15 = vsel %vm578_vm3, %v5338_v3, %v4266_v55  ;;  %2311 = vmatprep.subr.mxu1 %v2011_v63  ;;  %v5361_v55 = vrot.slane %v98_v51, %v4141_v7  ;;  %v2002_v63 = vsel %vm1967_vm1, %v777_v33, %v1881_v5  ;;  %7971 = vst [vmem:[#allocation176_spill] sm:$0xff] %v5377_v59  ;;  %7972 = vst [vmem:[#allocation177_spill] sm:$0xff] %v5380_v36  ;;  %v5403_v33 = vld [vmem:[#allocation7 + $0x38] sm:$0xff] }
 0x14b   :  { %v627_v49 = vmul.f32 %v5317_v45, %v5348_v15  ;;  %2312 = vmatpush1.msra.mxu1 %v2010_v24  ;;  %v5384_v24 = vrot.slane %v5245_v47, %v4168_v16  ;;  %v5401_v51 = vrot.slane %v5245_v47, %v4141_v7  ;;  %7976 = vst [vmem:[#allocation181_spill] sm:$0xff] %v5403_v33 }
 0x14c   :  { %7969 = vst [vmem:[#allocation174_spill] sm:$0xff] %v5361_v55  ;;  %2313 = vmatprep.subr.mxu1 %v2003_v31  ;;  %v5372_v58 = vpop.permute.xlu1 %191  ;;  %v5391_v31 = vrot.slane %v5336_v50, %v4371_v61  ;;  %v5448_v23 = vrot.slane %v5403_v33, %v4157_v14 }
 0x14d   :  { %7973 = vst [vmem:[#allocation178_spill] sm:$0xff] %v5384_v24  ;;  %v5386_v10 = vpop.permute.xlu0 %413  ;;  %2314 = vmatpush1.msra.mxu1 %v2002_v63  ;;  %v1992_v57 = vsel %vm1967_vm1, %v627_v49, %v1855_v18  ;;  %7975 = vst [vmem:[#allocation180_spill] sm:$0xff] %v5401_v51  ;;  %v97_v63 = vld [vmem:[#allocation7 + $0xf0] sm:$0x7]  ;;  %v1831_v18 = vrot.slane %v553_v42, 4  ;;  %v405_v49 = vmul.f32 %v5343_v56, %v5370_v20 }
 0x14e   :  { %7974 = vst [vmem:[#allocation179_spill] sm:$0xff] %v5391_v31  ;;  %v5396_v5 = vsel %vm430_vm5, %v5386_v10, %v4366_v54  ;;  %2245 = vmatpush1.msra.mxu0 %v1992_v57  ;;  %2315 = vmatprep.subr.mxu1 %v4565_v25  ;;  %v5410_v45 = vsel %vm7698_vm8, %v5372_v58, %v4560_v30  ;;  %v7977_v25 = vld [vmem:[#allocation45_spill] sm:$0xff]  ;;  %7987 = vst [vmem:[#allocation38_spill] sm:$0xff] %v5448_v23 }
 0x14f   :  { %v479_v54 = vmul.f32 %v5353_v29, %v5396_v5  ;;  %2246 = vmatprep.subr.mxu0 %v7977_v25  ;;  %v7978_v57 = vld [vmem:[#allocation29_spill] sm:$0xff]  ;;  %7979 = vst [vmem:[#allocation45_spill] sm:$0xff] %v5416_v48  ;;  %v5420_v42 = vrot.slane %v5336_v50, %v4191_v26  ;;  %v5427_v30 = vrot.slane %v5245_v47, %v4194_v27 }
 0x150   :  { %2316 = vmatpush1.msra.mxu1 %v7978_v57  ;;  %v5423_v56 = vpop.permute.xlu1 %117  ;;  %v5431_v29 = vrot.slane %v5336_v50, %v4141_v7  ;;  %v5435_v25 = vrot.slane %v5336_v50, %v4286_v62  ;;  %v95_v57 = vld [vmem:[#allocation7 + $0xe0] sm:$0x7]  ;;  %v5451_v46 = vrot.slane %v97_v63, %v4168_v16  ;;  %v257_v60 = vmul.f32 %v5384_v24, %v5410_v45 }
 0x151   :  { %7980 = vst [vmem:[#allocation29_spill] sm:$0xff] %v5420_v42  ;;  %2317 = vmatprep.subr.mxu1 %v4695_v12  ;;  %7981 = vst [vmem:[#allocation182_spill] sm:$0xff] %v5423_v56  ;;  %v5440_v12 = vsel %vm7697_vm9, %v5423_v56, %v4720_v37  ;;  %v5442_v0 = vpop.permute.xlu0 %265  ;;  %v1984_v47 = vsel %vm1967_vm1, %v479_v54, %v1831_v18  ;;  %v1807_v18 = vrot.slane %v405_v49, 4 }
 0x152   :  { %7982 = vst [vmem:[#allocation183_spill] sm:$0xff] %v5427_v30  ;;  %7983 = vst [vmem:[#allocation184_spill] sm:$0xff] %v5431_v29  ;;  %2318 = vmatpush1.msra.mxu1 %v7986_v34  ;;  %v5458_v37 = vsel %vm282_vm7, %v5442_v0, %v4558_v6  ;;  %2247 = vmatpush1.msra.mxu0 %v1984_v47  ;;  %v5463_v34 = vrot.slane %v5416_v48, %v4157_v14  ;;  %v5475_v47 = vld [vmem:[#allocation7 + $0xb0] sm:$0xff]  ;;  %v1783_v9 = vrot.slane %v257_v60, 4 }
 0x153   :  { %7984 = vst [vmem:[#allocation185_spill] sm:$0xff] %v5435_v25  ;;  %7985 = vst [vmem:[#allocation186_spill] sm:$0xff] %v5442_v0  ;;  %2319 = vmatprep.subr.mxu1 %v4805_v4  ;;  %v331_v54 = vmul.f32 %v5401_v51, %v5458_v37  ;;  %2248 = vmatprep.subr.mxu0 %v4605_v13  ;;  %v5470_v24 = vrot.slane %v95_v57, %v4168_v16  ;;  %v5477_v4 = vld [vmem:[#allocation7 + $0xa0] sm:$0xff] }
 0x154   :  { %7988 = vst [vmem:[#allocation187_spill] sm:$0xff] %v5451_v46  ;;  %7989 = vst [vmem:[#allocation188_spill] sm:$0xff] %v5463_v34  ;;  %2320 = vmatpush1.msra.mxu1 %v7990_v52  ;;  %v5473_v6 = vrot.slane %v96_v11, %v4168_v16  ;;  %v183_v49 = vmul.f32 %v5427_v30, %v5440_v12  ;;  %v5482_v51 = vpop.permute.xlu1 %650  ;;  %v5485_v13 = vrot.slane %v97_v63, %v4141_v7 }
 0x155   :  { %7991 = vst [vmem:[#allocation57_spill] sm:$0xff] %v5470_v24  ;;  %7993 = vst [vmem:[#allocation190_spill] sm:$0xff] %v5475_v47  ;;  %2321 = vmatprep.subr.mxu1 %v4928_v21  ;;  %v5488_v52 = vrot.slane %v95_v57, %v4141_v7  ;;  %v1774_v50 = vmul.f32 %v5361_v55, %v5238_v22  ;;  %v649_v35 = vpop.permute.xlu0 %648  ;;  %v1976_v21 = vsel %vm1967_vm1, %v331_v54, %v1807_v18  ;;  %v8006_v55 = vld [vmem:[#allocation93_spill] sm:$0xff] }
 0x156   :  { %7992 = vst [vmem:[#allocation189_spill] sm:$0xff] %v5473_v6  ;;  %7994 = vst [vmem:[#allocation191_spill] sm:$0xff] %v5485_v13  ;;  %2322 = vmatpush1.msra.mxu1 %v4633_v32  ;;  %v5501_v30 = vrot.slane %v5403_v33, %v4236_v41  ;;  %2249 = vmatpush1.msra.mxu0 %v1976_v21  ;;  %v5507_v16 = vrot.slane %v5475_v47, %v4157_v14 }
 0x157   :  { %7995 = vst [vmem:[#allocation192_spill] sm:$0xff] %v5488_v52  ;;  %v5511_v22 = vrot.slane %v5416_v48, %v4236_v41  ;;  %v5515_v32 = vrot.slane %v5477_v4, %v4157_v14  ;;  %3785 = vmatprep.subr.msk.mxu1 %vm1967_vm1, %v1774_v50  ;;  %v5520_v18 = vrot.slane %v5493_v44, %v4157_v14 }
 0x158   :  { %7997 = vst [vmem:[#allocation194_spill] sm:$0xff] %v5501_v30  ;;  %7999 = vst [vmem:[#allocation196_spill] sm:$0xff] %v5507_v16  ;;  %v5524_v60 = vrot.slane %v5403_v33, %v4191_v26  ;;  %v5527_v54 = vrot.slane %v97_v63, %v4194_v27  ;;  %v5531_v21 = vrot.slane %v5416_v48, %v4191_v26  ;;  %2250 = vmatprep.subr.mxu0 %v8006_v55  ;;  %v725_v50 = vpop.permute.xlu1 %724 }
 0x159   :  { %8000 = vst [vmem:[#allocation197_spill] sm:$0xff] %v5511_v22  ;;  %8001 = vst [vmem:[#allocation198_spill] sm:$0xff] %v5515_v32  ;;  %v1968_v40 = vsel %vm1967_vm1, %v183_v49, %v1783_v9  ;;  %3781 = vmatmul.mubr.msk.f32.vlgmr.msra.gmra.mxu1 %vm2192_vm11, %v5503_v28  ;;  %v5538_v14 = vrot.slane %v95_v57, %v4194_v27  ;;  %v5541_v56 = vrot.slane %v96_v11, %v4194_v27  ;;  %v723_v0 = vpop.permute.xlu0 %722  ;;  %v8011_v49 = vmov 0.0   ;;  %v8013_v11 = vld [vmem:[#allocation44_spill] sm:$0xff] }
 0x15a   :  { %8002 = vst [vmem:[#allocation199_spill] sm:$0xff] %v5520_v18  ;;  %8003 = vst [vmem:[#allocation200_spill] sm:$0xff] %v5524_v60  ;;  %v1734_v63 = vmul.f32 %v5334_v38, %v5293_v1  ;;  %2251 = vmatpush1.msra.mxu0 %v1968_v40  ;;  %v5547_v55 = vrot.slane %v5475_v47, %v4236_v41  ;;  %v5551_v9 = vrot.slane %v5477_v4, %v4236_v41 }
 0x15b   :  { %8004 = vst [vmem:[#allocation201_spill] sm:$0xff] %v5527_v54  ;;  %8005 = vst [vmem:[#allocation202_spill] sm:$0xff] %v5531_v21  ;;  %2497 = vmatprep.mubr.f32.mxu1 %v8011_v49  ;;  %v5556_v57 = vsel %vm726_vm0, %v725_v50, %v5232_v2  ;;  %v5560_v27 = vsel %vm726_vm0, %v8013_v11, %v723_v0  ;;  %v5563_v40 = vsel %vm726_vm0, %v723_v0, %v725_v50 }
 0x15c   :  { %8007 = vst [vmem:[#allocation93_spill] sm:$0xff] %v5538_v14  ;;  %8008 = vst [vmem:[#allocation203_spill] sm:$0xff] %v5541_v56  ;;  %3778 = vmatmul.mubr.msk.f32.vlgmr.msra.gmra.mxu0 %vm2192_vm11, %v5503_v28  ;;  %v5569_v1 = vrot.slane %v5493_v44, %v4236_v41  ;;  %v1694_v38 = vmul.f32 %v5380_v36, %v5348_v15  ;;  %v1773_v2 = vmul.f32 %v5485_v13, %v5556_v57  ;;  %v503_v13 = vpop.permute.xlu1 %502 }
 0x15d   :  { %8009 = vst [vmem:[#allocation204_spill] sm:$0xff] %v5547_v55  ;;  %8010 = vst [vmem:[#allocation205_spill] sm:$0xff] %v5551_v9  ;;  %v5577_v11 = vrot.slane %v5403_v33, %v4286_v62  ;;  %v5581_v0 = vrot.slane %v5475_v47, %v4191_v26  ;;  %2426 = vmatprep.mubr.f32.mxu0 %v8011_v49  ;;  %v659_v50 = vsel %vm652_vm2, %v5482_v51, %v5219_v19  ;;  %v501_v49 = vpop.permute.xlu0 %500 }
 0x15e   :  { %8012 = vst [vmem:[#allocation206_spill] sm:$0xff] %v5556_v57  ;;  %8014 = vst [vmem:[#allocation44_spill] sm:$0xff] %v5560_v27  ;;  %v1771_v15 = vmul.f32 %v5488_v52, %v5560_v27  ;;  %v1772_v36 = vmul.f32 %v5491_v53, %v5563_v40  ;;  %v5593_v28 = vrot.slane %v5416_v48, %v4286_v62  ;;  %v2143_v57 = vrot.slane %v1734_v63, 4  ;;  %v8022_v53 = vld [vmem:[#allocation37_spill] sm:$0xff] }
 0x15f   :  { %8015 = vst [vmem:[#allocation207_spill] sm:$0xff] %v5563_v40  ;;  %8016 = vst [vmem:[#allocation208_spill] sm:$0xff] %v5569_v1  ;;  %v1654_v33 = vmul.f32 %v5365_v17, %v5325_v8  ;;  %3786 = vmatpush1.msk.msra.mxu1 %vm1967_vm1, %v1773_v2  ;;  %v5600_v19 = vrot.slane %v5477_v4, %v4191_v26  ;;  %v5604_v52 = vrot.slane %v5493_v44, %v4191_v26 }
 0x160   :  { %8017 = vst [vmem:[#allocation209_spill] sm:$0xff] %v5577_v11  ;;  %8018 = vst [vmem:[#allocation210_spill] sm:$0xff] %v5581_v0  ;;  %v5608_v40 = vsel %vm652_vm2, %v8022_v53, %v649_v35  ;;  %3782 = vmatprep.subr.msk.mxu0 %vm1967_vm1, %v1772_v36  ;;  %v5613_v8 = vrot.slane %v5475_v47, %v4371_v61  ;;  %v5617_v63 = vrot.slane %v5477_v4, %v4371_v61  ;;  %v577_v48 = vpop.permute.xlu1 %576 }
 0x161   :  { %8019 = vst [vmem:[#allocation211_spill] sm:$0xff] %v5593_v28  ;;  %8020 = vst [vmem:[#allocation212_spill] sm:$0xff] %v5600_v19  ;;  %v5621_v2 = vrot.slane %v5493_v44, %v4371_v61  ;;  %v708_v17 = vmul.f32 %v5448_v23, %v659_v50  ;;  %v1733_v27 = vmul.f32 %v5451_v46, %v659_v50  ;;  %3783 = vmatpush1.msk.msra.mxu0 %vm1967_vm1, %v1771_v15 }
 0x162   :  { %8021 = vst [vmem:[#allocation213_spill] sm:$0xff] %v5604_v52  ;;  %8023 = vst [vmem:[#allocation37_spill] sm:$0xff] %v5608_v40  ;;  %v658_v53 = vsel %vm652_vm2, %v649_v35, %v5482_v51  ;;  %v2191_v36 = vsel %vm1967_vm1, %v1694_v38, %v2143_v57  ;;  %v5631_v26 = vrot.slane %v5475_v47, %v4286_v62  ;;  %v2119_v51 = vrot.slane %v1654_v33, 4 }
 0x163   :  { %8024 = vst [vmem:[#allocation214_spill] sm:$0xff] %v5613_v8  ;;  %8025 = vst [vmem:[#allocation215_spill] sm:$0xff] %v5617_v63  ;;  %2439 = vmatprep.subr.mxu1 %v2191_v36  ;;  %v5635_v61 = vrot.slane %v5477_v4, %v4286_v62  ;;  %v5639_v50 = vrot.slane %v5493_v44, %v4286_v62  ;;  %v5643_v35 = vrot.slane %v5475_v47, %v4141_v7  ;;  %v575_v36 = vpop.permute.xlu0 %574  ;;  %v8031_v62 = vld [vmem:[#allocation67_spill] sm:$0xff] }
 0x164   :  { %8026 = vst [vmem:[#allocation216_spill] sm:$0xff] %v5621_v2  ;;  %8027 = vst [vmem:[#allocation217_spill] sm:$0xff] %v5631_v26  ;;  %v1574_v38 = vmul.f32 %v5377_v59, %v5370_v20  ;;  %v1614_v57 = vmul.f32 %v5420_v42, %v5396_v5  ;;  %v1731_v15 = vmul.f32 %v5470_v24, %v5608_v40  ;;  %v1862_v41 = vrot.slane %v708_v17, 4 }
 0x165   :  { %8028 = vst [vmem:[#allocation218_spill] sm:$0xff] %v5635_v61  ;;  %8029 = vst [vmem:[#allocation219_spill] sm:$0xff] %v5639_v50  ;;  %v1732_v46 = vmul.f32 %v5473_v6, %v658_v53  ;;  %v585_v23 = vsel %vm578_vm3, %v577_v48, %v5338_v3  ;;  %v5656_v47 = vsel %vm578_vm3, %v8031_v62, %v575_v36  ;;  %v2142_v20 = vrot.slane %v1733_v27, 4  ;;  %v355_v62 = vpop.permute.xlu1 %354 }
 0x166   :  { %8030 = vst [vmem:[#allocation220_spill] sm:$0xff] %v5643_v35  ;;  %v584_v33 = vsel %vm578_vm3, %v575_v36, %v577_v48  ;;  %v634_v59 = vmul.f32 %v5524_v60, %v585_v23  ;;  %v1693_v5 = vmul.f32 %v5527_v54, %v585_v23  ;;  %v707_v42 = vmul.f32 %v5463_v34, %v658_v53  ;;  %v8033_v53 = vld [vmem:[#allocation56_spill] sm:$0xff]  ;;  %v8083_v60 = vld [vmem:[#allocation41_spill] sm:$0xff] }
 0x167   :  { %v511_v24 = vsel %vm504_vm4, %v503_v13, %v5296_v43  ;;  %v1691_v3 = vmul.f32 %v5538_v14, %v5656_v47  ;;  %v1692_v6 = vmul.f32 %v5541_v56, %v584_v33  ;;  %v2140_v40 = vrot.slane %v1731_v15, 4  ;;  %v353_v35 = vpop.permute.xlu0 %352  ;;  %v8091_v34 = vld [vmem:[#allocation32_spill] sm:$0xff] }
 0x168   :  { %v2190_v48 = vsel %vm1967_vm1, %v1693_v5, %v2142_v20  ;;  %v2183_v27 = vsel %vm1967_vm1, %v1614_v57, %v2119_v51  ;;  %v5670_v17 = vsel %vm1967_vm1, %v634_v59, %v1862_v41  ;;  %v2141_v23 = vrot.slane %v1732_v46, 4 }
 0x169   :  { %8032 = vst [vmem:[#allocation67_spill] sm:$0xff] %v5670_v17  ;;  %v5674_v36 = vsel %vm504_vm4, %v8033_v53, %v501_v49  ;;  %v510_v43 = vsel %vm504_vm4, %v501_v49, %v503_v13  ;;  %v633_v54 = vmul.f32 %v5531_v21, %v584_v33  ;;  %2440 = vmatpush1.msra.mxu1 %v2190_v48  ;;  %v2095_v14 = vrot.slane %v1574_v38, 4  ;;  %v429_v49 = vpop.permute.xlu1 %428  ;;  %v8102_v17 = vld [vmem:[#allocation190_spill] sm:$0xff] }
 0x16a   :  { %v560_v15 = vmul.f32 %v5501_v30, %v511_v24  ;;  %v1653_v20 = vmul.f32 %v5507_v16, %v511_v24  ;;  %2441 = vmatprep.subr.mxu1 %v2183_v27  ;;  %v5682_v41 = vrot.slane %v5477_v4, %v4141_v7  ;;  %v1534_v46 = vmul.f32 %v5435_v25, %v5458_v37  ;;  %v8035_v37 = vld [vmem:[#allocation83_spill] sm:$0xff] }
 0x16b   :  { %v1861_v59 = vrot.slane %v707_v42, 4  ;;  %v2189_v51 = vsel %vm1967_vm1, %v1692_v6, %v2141_v23  ;;  %v2188_v13 = vsel %vm1967_vm1, %v1691_v3, %v2140_v40  ;;  %v1494_v38 = vmul.f32 %v5391_v31, %v5410_v45  ;;  %v427_v5 = vpop.permute.xlu0 %426 }
 0x16c   :  { %8034 = vst [vmem:[#allocation56_spill] sm:$0xff] %v5682_v41  ;;  %v559_v57 = vmul.f32 %v5511_v22, %v510_v43  ;;  %v1651_v24 = vmul.f32 %v5515_v32, %v5674_v36  ;;  %v1652_v33 = vmul.f32 %v5520_v18, %v510_v43  ;;  %2368 = vmatprep.subr.mxu0 %v2189_v51  ;;  %v1838_v3 = vrot.slane %v560_v15, 4 }
 0x16d   :  { %2369 = vmatpush1.msra.mxu0 %v2188_v13  ;;  %v437_v42 = vsel %vm430_vm5, %v429_v49, %v5386_v10  ;;  %v5698_v6 = vsel %vm430_vm5, %v8035_v37, %v427_v5  ;;  %v436_v40 = vsel %vm430_vm5, %v427_v5, %v429_v49  ;;  %v5702_v45 = vsel %vm1967_vm1, %v633_v54, %v1861_v59  ;;  %v207_v51 = vpop.permute.xlu1 %206  ;;  %v8039_v5 = vld [vmem:[#allocation75_spill] sm:$0xff] }
 0x16e   :  { %8036 = vst [vmem:[#allocation83_spill] sm:$0xff] %v5702_v45  ;;  %v2118_v48 = vrot.slane %v1653_v20, 4  ;;  %v486_v27 = vmul.f32 %v5577_v11, %v437_v42  ;;  %v1613_v23 = vmul.f32 %v5581_v0, %v437_v42  ;;  %v5708_v53 = vsel %vm356_vm6, %v355_v62, %v5327_v39 }
 0x16f   :  { %8037 = vst [vmem:[#allocation221_spill] sm:$0xff] %v5708_v53  ;;  %v1611_v10 = vmul.f32 %v5600_v19, %v5698_v6  ;;  %v1612_v43 = vmul.f32 %v5604_v52, %v436_v40  ;;  %v2175_v13 = vsel %vm1967_vm1, %v1534_v46, %v2095_v14  ;;  %v2116_v54 = vrot.slane %v1651_v24, 4  ;;  %v205_v15 = vpop.permute.xlu0 %204  ;;  %v8079_v52 = vld [vmem:[#allocation132_spill] sm:$0xff] }
 0x170   :  { %v2117_v59 = vrot.slane %v1652_v33, 4  ;;  %v2182_v20 = vsel %vm1967_vm1, %v1613_v23, %v2118_v48  ;;  %v5716_v49 = vsel %vm1967_vm1, %v486_v27, %v1838_v3  ;;  %v5720_v39 = vsel %vm356_vm6, %v8039_v5, %v353_v35 }
 0x171   :  { %8038 = vst [vmem:[#allocation222_spill] sm:$0xff] %v5716_v49  ;;  %v5723_v42 = vsel %vm356_vm6, %v353_v35, %v355_v62  ;;  %v485_v37 = vmul.f32 %v5593_v28, %v436_v40  ;;  %v5728_v14 = vsel %vm7698_vm8, %v207_v51, %v5372_v58  ;;  %2442 = vmatpush1.msra.mxu1 %v2182_v20  ;;  %v1837_v24 = vrot.slane %v559_v57, 4  ;;  %v8043_v35 = vld [vmem:[#allocation92_spill] sm:$0xff]  ;;  %v281_v57 = vpop.permute.xlu1 %280 }
 0x172   :  { %8040 = vst [vmem:[#allocation75_spill] sm:$0xff] %v5723_v42  ;;  %8041 = vst [vmem:[#allocation223_spill] sm:$0xff] %v5728_v14  ;;  %v1454_v46 = vmul.f32 %v5431_v29, %v5440_v12  ;;  %v1573_v33 = vmul.f32 %v5547_v55, %v5708_v53  ;;  %2443 = vmatprep.subr.mxu1 %v2175_v13  ;;  %v5736_v3 = vrot.slane %v5493_v44, %v4141_v7  ;;  %v8053_v55 = vld [vmem:[#allocation116_spill] sm:$0xff] }
 0x173   :  { %v5740_v62 = vsel %vm7698_vm8, %v8043_v35, %v205_v15  ;;  %v5743_v58 = vsel %vm7698_vm8, %v205_v15, %v207_v51  ;;  %v2181_v40 = vsel %vm1967_vm1, %v1612_v43, %v2117_v59  ;;  %v2180_v12 = vsel %vm1967_vm1, %v1611_v10, %v2116_v54  ;;  %v279_v20 = vpop.permute.xlu0 %278  ;;  %v8045_v51 = vld [vmem:[#allocation186_spill] sm:$0xff] }
 0x174   :  { %8042 = vst [vmem:[#allocation224_spill] sm:$0xff] %v5736_v3  ;;  %8044 = vst [vmem:[#allocation92_spill] sm:$0xff] %v5743_v58  ;;  %v2071_v48 = vrot.slane %v1494_v38, 4  ;;  %v1571_v27 = vmul.f32 %v5551_v9, %v5720_v39  ;;  %v1572_v23 = vmul.f32 %v5569_v1, %v5723_v42  ;;  %v1493_v13 = vmul.f32 %v5613_v8, %v5728_v14  ;;  %v8047_v43 = vld [vmem:[#allocation98_spill] sm:$0xff] }
 0x175   :  { %2370 = vmatprep.subr.mxu0 %v2181_v40  ;;  %v5755_v15 = vsel %vm282_vm7, %v281_v57, %v8045_v51  ;;  %v5759_v10 = vsel %vm282_vm7, %v8047_v43, %v279_v20  ;;  %v5762_v38 = vsel %vm282_vm7, %v279_v20, %v281_v57  ;;  %v5765_v54 = vsel %vm1967_vm1, %v485_v37, %v1837_v24  ;;  %v133_v20 = vpop.permute.xlu1 %132  ;;  %v8050_v51 = vld [vmem:[#allocation182_spill] sm:$0xff] }
 0x176   :  { %2371 = vmatpush1.msra.mxu0 %v2180_v12  ;;  %8046 = vst [vmem:[#allocation186_spill] sm:$0xff] %v5755_v15  ;;  %8048 = vst [vmem:[#allocation98_spill] sm:$0xff] %v5762_v38  ;;  %v2094_v59 = vrot.slane %v1573_v33, 4  ;;  %v1491_v5 = vmul.f32 %v5617_v63, %v5740_v62  ;;  %v1492_v35 = vmul.f32 %v5621_v2, %v5743_v58  ;;  %v2092_v24 = vrot.slane %v1571_v27, 4  ;;  %v8074_v63 = vld [vmem:[#allocation26_spill] sm:$0xff] }
 0x177   :  { %8049 = vst [vmem:[#allocation225_spill] sm:$0xff] %v5765_v54  ;;  %v1533_v40 = vmul.f32 %v5631_v26, %v5755_v15  ;;  %v1531_v12 = vmul.f32 %v5635_v61, %v5759_v10  ;;  %v1532_v57 = vmul.f32 %v5639_v50, %v5762_v38  ;;  %v2167_v37 = vsel %vm1967_vm1, %v1454_v46, %v2071_v48  ;;  %v131_v29 = vpop.permute.xlu0 %130  ;;  %v8052_v26 = vld [vmem:[#allocation220_spill] sm:$0xff]  ;;  %v8076_v9 = vld [vmem:[#allocation18_spill] sm:$0xff] }
 0x178   :  { %v2093_v33 = vrot.slane %v1572_v23, 4  ;;  %v5780_v43 = vsel %vm7697_vm9, %v133_v20, %v8050_v51  ;;  %v2070_v31 = vrot.slane %v1493_v13, 4  ;;  %v5787_v0 = vsel %vm7697_vm9, %v8053_v55, %v131_v29  ;;  %v5792_v46 = vld [vmem:[#allocation7 + $0x60] sm:$0xff] }
 0x179   :  { %8051 = vst [vmem:[#allocation182_spill] sm:$0xff] %v5780_v43  ;;  %v2174_v8 = vsel %vm1967_vm1, %v1533_v40, %v2094_v59  ;;  %v1453_v25 = vmul.f32 %v8052_v26, %v5780_v43  ;;  %v5790_v16 = vsel %vm7697_vm9, %v131_v29, %v133_v20  ;;  %v2068_v48 = vrot.slane %v1491_v5, 4  ;;  %v5800_v40 = vpop.permute.xlu1 %1353  ;;  %v8055_v20 = vld [vmem:[#allocation19_spill] sm:$0xff] }
 0x17a   :  { %8054 = vst [vmem:[#allocation116_spill] sm:$0xff] %v5790_v16  ;;  %2444 = vmatpush1.msra.mxu1 %v2174_v8  ;;  %v2069_v27 = vrot.slane %v1492_v35, 4  ;;  %v1451_v23 = vmul.f32 %v5682_v41, %v5787_v0  ;;  %v1452_v13 = vmul.f32 %v5736_v3, %v5790_v16  ;;  %v2173_v59 = vsel %vm1967_vm1, %v1532_v57, %v2093_v33 }
 0x17b   :  { %2445 = vmatprep.subr.mxu1 %v2167_v37  ;;  %v2172_v55 = vsel %vm1967_vm1, %v1531_v12, %v2092_v24  ;;  %v2166_v29 = vsel %vm1967_vm1, %v1453_v25, %v2070_v31  ;;  %2372 = vmatprep.subr.mxu0 %v2173_v59  ;;  %v1352_v8 = vpop.permute.xlu0 %1351  ;;  %v5807_v51 = vrot.slane %v5792_v46, %v8055_v20  ;;  %v8057_v37 = vld [vmem:[#allocation15_spill] sm:$0xff]  ;;  %v72_v31 = vld [vmem:[#allocation7 + $0x28] sm:$0xff]  ;;  %vm8061_vm9 = vcmask 973824   ;;  %v8063_v59 = vld [vmem:[#allocation46_spill] sm:$0xff] }
 0x17c   :  { %v2165_v5 = vsel %vm1967_vm1, %v1452_v13, %v2069_v27  ;;  %2446 = vmatpush1.msra.mxu1 %v2166_v29  ;;  %v2164_v35 = vsel %vm1967_vm1, %v1451_v23, %v2068_v48  ;;  %2373 = vmatpush1.msra.mxu0 %v2172_v55  ;;  %v5811_v57 = vrot.slane %v5477_v4, %v8057_v37  ;;  %v8060_v25 = vld [vmem:[#allocation119_spill] sm:$0xff]  ;;  %vm8062_vm8 = vmmov %vm8061_vm9  ;;  %v5825_v23 = vld [vmem:[#allocation7 + $0x68] sm:$0xff] }
 0x17d   :  { %8056 = vst [vmem:[#allocation226_spill] sm:$0xff] %v5807_v51  ;;  %v5815_v12 = vrot.slane %v5493_v44, %v8057_v37  ;;  %v1362_v24 = vsel %vm8061_vm9, %v8060_v25, %v1352_v8  ;;  %v1363_v33 = vsel %vm8062_vm8, %v1352_v8, %v5800_v40  ;;  %2374 = vmatprep.subr.mxu0 %v2165_v5  ;;  %v5821_v48 = vpop.permute.xlu1 %1205  ;;  %v5823_v27 = vld [vmem:[#allocation7 + $0x78] sm:$0xff]  ;;  %v8064_v29 = vld [vmem:[#allocation14_spill] sm:$0xff]  ;;  %vm8080_vm8 = vcmask 982016  }
 0x17e   :  { %8058 = vst [vmem:[#allocation15_spill] sm:$0xff] %v5811_v57  ;;  %2375 = vmatpush1.msra.mxu0 %v2164_v35  ;;  %v5829_v55 = vmul.f32 %v5807_v51, %v8063_v59  ;;  %v5832_v26 = vrot.slane %v72_v31, %v8064_v29  ;;  %v5834_v25 = vld [vmem:[#allocation7 + $0x70] sm:$0xff]  ;;  %v1411_v8 = vmul.f32 %v5811_v57, %v1362_v24  ;;  %v8072_v57 = vld [vmem:[#allocation127_spill] sm:$0xff]  ;;  %vm8081_vm9 = vmmov %vm8080_vm8 }
 0x17f   :  { %8059 = vst [vmem:[#allocation227_spill] sm:$0xff] %v5815_v12  ;;  %v1204_v13 = vpop.permute.xlu0 %1203  ;;  %v1412_v5 = vmul.f32 %v5815_v12, %v1363_v33  ;;  %v5840_v35 = vrot.slane %v5792_v46, %v8064_v29  ;;  %v5844_v41 = vrot.slane %v5825_v23, %v8064_v29  ;;  %v5848_v59 = vrot.slane %v5477_v4, %v8055_v20 }
 0x180   :  { %8065 = vst [vmem:[#allocation119_spill] sm:$0xff] %v5832_v26  ;;  %v5852_v3 = vrot.slane %v5493_v44, %v8055_v20  ;;  %v5856_v24 = vrot.slane %v5823_v27, %v8055_v20  ;;  %v5860_v33 = vrot.slane %v5825_v23, %v8055_v20  ;;  %v1214_v12 = vsel %vm1209_vm12, %v8072_v57, %v1204_v13 }
 0x181   :  { %8066 = vst [vmem:[#allocation46_spill] sm:$0xff] %v5840_v35  ;;  %8067 = vst [vmem:[#allocation14_spill] sm:$0xff] %v5844_v41  ;;  %v1215_v2 = vsel %vm1209_vm12, %v1204_v13, %v5821_v48  ;;  %v5866_v4 = vpop.permute.xlu1 %1279  ;;  %v5870_v44 = vrot.slane %v5834_v25, %v8055_v20  ;;  %v5873_v61 = vrot.slane %v72_v31, %v8074_v63  ;;  %v2044_v19 = vrot.slane %v1411_v8, 4  ;;  %v8084_v8 = vld [vmem:[#allocation181_spill] sm:$0xff] }
 0x182   :  { %8068 = vst [vmem:[#allocation228_spill] sm:$0xff] %v5848_v59  ;;  %8069 = vst [vmem:[#allocation229_spill] sm:$0xff] %v5852_v3  ;;  %v5877_v1 = vrot.slane %v5792_v46, %v8076_v9  ;;  %v5881_v57 = vrot.slane %v5825_v23, %v8076_v9  ;;  %v2045_v13 = vrot.slane %v1412_v5, 4  ;;  %v1263_v32 = vmul.f32 %v5840_v35, %v1214_v12 }
 0x183   :  { %8070 = vst [vmem:[#allocation230_spill] sm:$0xff] %v5856_v24  ;;  %8071 = vst [vmem:[#allocation231_spill] sm:$0xff] %v5860_v33  ;;  %v1278_v50 = vpop.permute.xlu0 %1277  ;;  %v1264_v18 = vmul.f32 %v5844_v41, %v1215_v2  ;;  %v5892_v56 = vrot.slane %v72_v31, %v8076_v9  ;;  %v5896_v5 = vrot.slane %v8084_v8, %v8083_v60  ;;  %v8094_v41 = vld [vmem:[#allocation144_spill] sm:$0xff] }
 0x184   :  { %8073 = vst [vmem:[#allocation127_spill] sm:$0xff] %v5870_v44  ;;  %8075 = vst [vmem:[#allocation26_spill] sm:$0xff] %v5873_v61  ;;  %v1288_v11 = vsel %vm8080_vm8, %v8079_v52, %v1278_v50  ;;  %v1289_v28 = vsel %vm8081_vm9, %v1278_v50, %v5866_v4  ;;  %v5899_v52 = vrot.slane %v72_v31, %v8083_v60  ;;  %vm8117_vm8 = vcmask 973824  }
 0x185   :  { %8077 = vst [vmem:[#allocation18_spill] sm:$0xff] %v5877_v1  ;;  %8078 = vst [vmem:[#allocation232_spill] sm:$0xff] %v5881_v57  ;;  %v1337_v30 = vmul.f32 %v5848_v59, %v1288_v11  ;;  %v1338_v22 = vmul.f32 %v5852_v3, %v1289_v28  ;;  %v5901_v21 = vpop.permute.xlu1 %1131  ;;  %v5905_v50 = vrot.slane %v5792_v46, %v8074_v63  ;;  %v8088_v11 = vld [vmem:[#allocation45_spill] sm:$0xff] }
 0x186   :  { %8082 = vst [vmem:[#allocation132_spill] sm:$0xff] %v5892_v56  ;;  %8085 = vst [vmem:[#allocation41_spill] sm:$0xff] %v5896_v5  ;;  %v5909_v2 = vrot.slane %v8088_v11, %v8083_v60  ;;  %v5915_v3 = vrot.slane %v5825_v23, %v8074_v63  ;;  %v5918_v51 = vrot.slane %v72_v31, %v8091_v34  ;;  %v8120_v5 = vld [vmem:[#allocation24_spill] sm:$0xff] }
 0x187   :  { %8086 = vst [vmem:[#allocation233_spill] sm:$0xff] %v5899_v52  ;;  %8087 = vst [vmem:[#allocation234_spill] sm:$0xff] %v5905_v50  ;;  %v1130_v28 = vpop.permute.xlu0 %1129  ;;  %v2157_v12 = vsel %vm1967_vm1, %v1338_v22, %v2045_v13  ;;  %v2156_v59 = vsel %vm1967_vm1, %v1337_v30, %v2044_v19  ;;  %v5922_v35 = vrot.slane %v8084_v8, %v8057_v37  ;;  %v1955_v22 = vrot.slane %v1263_v32, 4  ;;  %v8098_v32 = vld [vmem:[#allocation124_spill] sm:$0xff] }
 0x188   :  { %8089 = vst [vmem:[#allocation235_spill] sm:$0xff] %v5909_v2  ;;  %8090 = vst [vmem:[#allocation236_spill] sm:$0xff] %v5915_v3  ;;  %v1140_v54 = vsel %vm1135_vm13, %v8094_v41, %v1130_v28  ;;  %v1141_v49 = vsel %vm1135_vm13, %v1130_v28, %v5901_v21  ;;  %2376 = vmatprep.subr.mxu0 %v2157_v12  ;;  %v1956_v30 = vrot.slane %v1264_v18, 4  ;;  %v8100_v12 = vld [vmem:[#allocation80_spill] sm:$0xff] }
 0x189   :  { %8092 = vst [vmem:[#allocation32_spill] sm:$0xff] %v5918_v51  ;;  %8093 = vst [vmem:[#allocation237_spill] sm:$0xff] %v5922_v35  ;;  %v1189_v19 = vmul.f32 %v5877_v1, %v1140_v54  ;;  %v1190_v13 = vmul.f32 %v5881_v57, %v1141_v49  ;;  %2377 = vmatpush1.msra.mxu0 %v2156_v59  ;;  %v5931_v16 = vrot.slane %v72_v31, %v8057_v37  ;;  %v5940_v43 = vpop.permute.xlu1 %942 }
 0x18a   :  { %v5935_v45 = vrot.slane %v8084_v8, %v4141_v7  ;;  %v5938_v41 = vrot.slane %v72_v31, %v4141_v7  ;;  %v5944_v18 = vmul.f32 %v8098_v32, %v5905_v50  ;;  %v5947_v54 = vrot.slane %v72_v31, %v8055_v20  ;;  %v8104_v32 = vld [vmem:[#allocation171_spill] sm:$0xff]  ;;  %vm8123_vm9 = vmmov %vm8117_vm8 }
 0x18b   :  { %8095 = vst [vmem:[#allocation144_spill] sm:$0xff] %v5931_v16  ;;  %v1356_v49 = vpop.permute.xlu0 %1355  ;;  %v2029_v59 = vsel %vm1967_vm1, %v1190_v13, %v1956_v30  ;;  %v2028_v28 = vsel %vm1967_vm1, %v1189_v19, %v1955_v22  ;;  %v1116_v1 = vmul.f32 %v5915_v3, %v8100_v12  ;;  %v5955_v57 = vrot.slane %v5792_v46, %v8083_v60 }
 0x18c   :  { %8096 = vst [vmem:[#allocation238_spill] sm:$0xff] %v5935_v45  ;;  %8097 = vst [vmem:[#allocation239_spill] sm:$0xff] %v5938_v41  ;;  %v5959_v38 = vrot.slane %v8102_v17, %v8057_v37  ;;  %v5963_v31 = vrot.slane %v8104_v32, %v8057_v37  ;;  %2378 = vmatprep.subr.mxu0 %v2029_v59  ;;  %v5967_v30 = vrot.slane %v5792_v46, %v8091_v34 }
 0x18d   :  { %8099 = vst [vmem:[#allocation124_spill] sm:$0xff] %v5947_v54  ;;  %8101 = vst [vmem:[#allocation80_spill] sm:$0xff] %v5955_v57  ;;  %2379 = vmatpush1.msra.mxu0 %v2028_v28  ;;  %v5971_v22 = vrot.slane %v5825_v23, %v8083_v60  ;;  %v5975_v19 = vrot.slane %v5834_v25, %v8064_v29  ;;  %v5979_v13 = vrot.slane %v5823_v27, %v8064_v29  ;;  %v1017_v12 = vpop.permute.xlu1 %1016 }
 0x18e   :  { %8103 = vst [vmem:[#allocation190_spill] sm:$0xff] %v5959_v38  ;;  %8105 = vst [vmem:[#allocation171_spill] sm:$0xff] %v5963_v31  ;;  %v5983_v59 = vrot.slane %v5823_v27, %v8074_v63  ;;  %v5987_v28 = vrot.slane %v5825_v23, %v8091_v34  ;;  %v5991_v50 = vrot.slane %v5792_v46, %v8057_v37  ;;  %v1931_v3 = vrot.slane %v5944_v18, 4 }
 0x18f   :  { %8106 = vst [vmem:[#allocation240_spill] sm:$0xff] %v5971_v22  ;;  %v5996_v58 = vrot.slane %v5834_v25, %v8074_v63  ;;  %v5998_v29 = vpop.permute.xlu0 %944  ;;  %v6002_v45 = vrot.slane %v8102_v17, %v8055_v20  ;;  %v6006_v15 = vrot.slane %v8104_v32, %v8055_v20  ;;  %v1932_v35 = vrot.slane %v1116_v1, 4  ;;  %v8122_v20 = vld [vmem:[#allocation88_spill] sm:$0xff] }
 0x190   :  { %8107 = vst [vmem:[#allocation241_spill] sm:$0xff] %v5983_v59  ;;  %8108 = vst [vmem:[#allocation242_spill] sm:$0xff] %v5987_v28  ;;  %v6010_v14 = vrot.slane %v5792_v46, %v4141_v7  ;;  %v6014_v18 = vrot.slane %v5825_v23, %v8057_v37  ;;  %v6018_v63 = vrot.slane %v5834_v25, %v8076_v9  ;;  %v8118_v46 = vld [vmem:[#allocation155_spill] sm:$0xff] }
 0x191   :  { %8109 = vst [vmem:[#allocation243_spill] sm:$0xff] %v5991_v50  ;;  %8110 = vst [vmem:[#allocation244_spill] sm:$0xff] %v5996_v58  ;;  %v6022_v17 = vrot.slane %v5823_v27, %v8076_v9  ;;  %v6026_v32 = vrot.slane %v5825_v23, %v4141_v7  ;;  %v1364_v1 = vsel %vm8117_vm8, %v5800_v40, %v1356_v49  ;;  %v8121_v9 = vld [vmem:[#allocation37_spill] sm:$0xff]  ;;  %v1208_v11 = vpop.permute.xlu1 %1207  ;;  %vm8133_vm8 = vcmask 982016  }
 0x192   :  { %8111 = vst [vmem:[#allocation245_spill] sm:$0xff] %v6002_v45  ;;  %8112 = vst [vmem:[#allocation246_spill] sm:$0xff] %v6006_v15  ;;  %v1026_v2 = vsel %vm1022_vm14, %v8118_v46, %v1017_v12  ;;  %v6034_v42 = vrot.slane %v5834_v25, %v8091_v34  ;;  %v6038_v53 = vmul.f32 %v5983_v59, %v8120_v5  ;;  %v8125_v46 = vld [vmem:[#allocation145_spill] sm:$0xff] }
 0x193   :  { %8113 = vst [vmem:[#allocation247_spill] sm:$0xff] %v6010_v14  ;;  %8114 = vst [vmem:[#allocation248_spill] sm:$0xff] %v6014_v18  ;;  %v706_v8 = vmul.f32 %v5832_v26, %v8121_v9  ;;  %v1374_v23 = vsel %vm8123_vm9, %v1356_v49, %v8122_v20  ;;  %v6046_v40 = vrot.slane %v5823_v27, %v8091_v34  ;;  %v6052_v24 = vpop.permute.xlu0 %1018 }
 0x194   :  { %8115 = vst [vmem:[#allocation249_spill] sm:$0xff] %v6022_v17  ;;  %8116 = vst [vmem:[#allocation250_spill] sm:$0xff] %v6026_v32  ;;  %v6050_v44 = vmul.f32 %v8125_v46, %v5996_v58  ;;  %v6056_v5 = vrot.slane %v5834_v25, %v8083_v60  ;;  %v6060_v9 = vrot.slane %v5823_v27, %v8083_v60 }
 0x195   :  { %8119 = vst [vmem:[#allocation155_spill] sm:$0xff] %v6034_v42  ;;  %8124 = vst [vmem:[#allocation24_spill] sm:$0xff] %v6046_v40  ;;  %v6064_v20 = vrot.slane %v5834_v25, %v4141_v7  ;;  %v6068_v34 = vrot.slane %v5823_v27, %v4141_v7  ;;  %v1413_v49 = vmul.f32 %v5959_v38, %v1364_v1  ;;  %v1860_v1 = vrot.slane %v706_v8, 4  ;;  %v795_v38 = vpop.permute.xlu1 %794 }
 0x196   :  { %8126 = vst [vmem:[#allocation37_spill] sm:$0xff] %v6056_v5  ;;  %8127 = vst [vmem:[#allocation88_spill] sm:$0xff] %v6060_v9  ;;  %v1075_v46 = vmul.f32 %v5967_v30, %v1026_v2  ;;  %v1027_v26 = vsel %vm1022_vm14, %v1017_v12, %v6052_v24  ;;  %v6076_v58 = vrot.slane %v5834_v25, %v8057_v37 }
 0x197   :  { %8128 = vst [vmem:[#allocation145_spill] sm:$0xff] %v6064_v20  ;;  %8129 = vst [vmem:[#allocation251_spill] sm:$0xff] %v6068_v34  ;;  %v1414_v60 = vmul.f32 %v5963_v31, %v1374_v23  ;;  %v1076_v59 = vmul.f32 %v5987_v28, %v1027_v26  ;;  %v6082_v54 = vrot.slane %v5823_v27, %v8057_v37  ;;  %v8132_v26 = vld [vmem:[#allocation151_spill] sm:$0xff]  ;;  %v1282_v8 = vpop.permute.xlu0 %1281 }
 0x198   :  { %8130 = vst [vmem:[#allocation252_spill] sm:$0xff] %v6076_v58  ;;  %v558_v2 = vmul.f32 %v5873_v61, %v5674_v36  ;;  %v632_v12 = vmul.f32 %v5892_v56, %v5656_v47  ;;  %v484_v23 = vmul.f32 %v5918_v51, %v5698_v6  ;;  %v952_v27 = vsel %vm948_vm15, %v8132_v26, %v5940_v43  ;;  %v8134_v61 = vld [vmem:[#allocation110_spill] sm:$0xff]  ;;  %vm8135_vm9 = vmmov %vm8133_vm8  ;;  %v8136_v56 = vld [vmem:[#allocation111_spill] sm:$0xff] }
 0x199   :  { %8131 = vst [vmem:[#allocation253_spill] sm:$0xff] %v6082_v54  ;;  %v1216_v7 = vsel %vm1209_vm12, %v5821_v48, %v1208_v11  ;;  %v2021_v31 = vsel %vm1967_vm1, %v1076_v59, %v1932_v35  ;;  %v2046_v36 = vrot.slane %v1413_v49, 4  ;;  %v1290_v47 = vsel %vm8133_vm8, %v5866_v4, %v1282_v8 }
 0x19a   :  { %v1300_v25 = vsel %vm8135_vm9, %v1282_v8, %v8134_v61  ;;  %2380 = vmatprep.subr.mxu0 %v2021_v31  ;;  %v2020_v6 = vsel %vm1967_vm1, %v1075_v46, %v1931_v3  ;;  %v2047_v51 = vrot.slane %v1414_v60, 4  ;;  %v1226_v26 = vsel %vm1209_vm12, %v1208_v11, %v8136_v56  ;;  %v869_v31 = vpop.permute.xlu1 %868  ;;  %v8137_v3 = vld [vmem:[#allocation161_spill] sm:$0xff]  ;;  %v8138_v46 = vld [vmem:[#allocation167_spill] sm:$0xff] }
 0x19b   :  { %v1339_v28 = vmul.f32 %v6002_v45, %v1290_v47  ;;  %v1340_v48 = vmul.f32 %v6006_v15, %v1300_v25  ;;  %2381 = vmatpush1.msra.mxu0 %v2020_v6  ;;  %v1836_v35 = vrot.slane %v558_v2, 4  ;;  %v1001_v59 = vmul.f32 %v5955_v57, %v952_v27  ;;  %v6116_v11 = vpop.permute.xlu0 %796  ;;  %v8140_v25 = vld [vmem:[#allocation44_spill] sm:$0xff]  ;;  %v8192_v15 = vld [vmem:[#allocation138_spill] sm:$0xff] }
 0x19c   :  { %v953_v4 = vsel %vm948_vm15, %v5940_v43, %v5998_v29  ;;  %v1265_v61 = vmul.f32 %v5975_v19, %v1216_v7  ;;  %v804_v49 = vsel %vm800_vm10, %v8137_v3, %v795_v38  ;;  %vm8139_vm8 = vcmask 64512  }
 0x19d   :  { %v878_v56 = vsel %vm8139_vm8, %v8138_v46, %v869_v31  ;;  %v2159_v60 = vsel %vm1967_vm1, %v1340_v48, %v2047_v51  ;;  %v2158_v2 = vsel %vm1967_vm1, %v1339_v28, %v2046_v36  ;;  %v780_v27 = vmul.f32 %v5860_v33, %v8140_v25  ;;  %vm8142_vm9 = vmmov %vm8139_vm8 }
 0x19e   :  { %v1266_v43 = vmul.f32 %v5979_v13, %v1226_v26  ;;  %v805_v7 = vsel %vm800_vm10, %v795_v38, %v6116_v11  ;;  %2447 = vmatprep.subr.mxu1 %v2159_v60  ;;  %v6126_v8 = vsel %vm1967_vm1, %v632_v12, %v1860_v1  ;;  %v6130_v47 = vmul.f32 %v5899_v52, %v5720_v39  ;;  %v1134_v12 = vpop.permute.xlu1 %1133 }
 0x19f   :  { %v1002_v51 = vmul.f32 %v5971_v22, %v953_v4  ;;  %v854_v28 = vmul.f32 %v6014_v18, %v805_v7  ;;  %2448 = vmatpush1.msra.mxu1 %v2158_v2  ;;  %v6135_v36 = vsel %vm1967_vm1, %v484_v23, %v1836_v35  ;;  %v6139_v6 = vmul.f32 %v5931_v16, %v5740_v62  ;;  %v8141_v23 = vld [vmem:[#allocation121_spill] sm:$0xff]  ;;  %v871_v3 = vpop.permute.xlu0 %870 }
 0x1a0   :  { %v6143_v38 = vmul.f32 %v5938_v41, %v5759_v10  ;;  %v853_v1 = vmul.f32 %v5991_v50, %v804_v49  ;;  %v927_v39 = vmul.f32 %v6010_v14, %v878_v56  ;;  %v1907_v26 = vrot.slane %v1001_v59, 4  ;;  %v2505_v59 = vld [vmem:[%s7487_s4] sm:$0xff]  ;;  %v8242_v41 = vld [vmem:[#allocation168_spill] sm:$0xff]  ;;  %v8263_v50 = vld [vmem:[#allocation47_spill] sm:$0xff] }
 0x1a1   :  { %v1957_v48 = vrot.slane %v1265_v61, 4  ;;  %v1142_v4 = vsel %vm1135_vm13, %v5901_v21, %v1134_v12  ;;  %v1152_v35 = vsel %vm1135_vm13, %v1134_v12, %v8141_v23  ;;  %v1958_v62 = vrot.slane %v1266_v43, 4  ;;  %v8275_v22 = vld [vmem:[#allocation25_spill] sm:$0xff] }
 0x1a2   :  { %v1191_v46 = vmul.f32 %v6018_v63, %v1142_v4  ;;  %v1192_v10 = vmul.f32 %v6022_v17, %v1152_v35  ;;  %v879_v60 = vsel %vm8142_vm9, %v869_v31, %v871_v3  ;;  %v1908_v49 = vrot.slane %v1002_v51, 4  ;;  %v1021_v61 = vpop.permute.xlu1 %1020  ;;  %v8143_v51 = vld [vmem:[#allocation134_spill] sm:$0xff]  ;;  %vm8148_vm9 = vmmov %vm8139_vm8  ;;  %v8279_v17 = vld [vmem:[#allocation49_spill] sm:$0xff] }
 0x1a3   :  { %v1884_v2 = vrot.slane %v854_v28, 4  ;;  %v928_v56 = vmul.f32 %v6026_v32, %v879_v60  ;;  %v1883_v21 = vrot.slane %v853_v1, 4  ;;  %v2012_v43 = vsel %vm1967_vm1, %v927_v39, %v1907_v26  ;;  %v947_v4 = vpop.permute.xlu0 %946 }
 0x1a4   :  { %v2031_v25 = vsel %vm1967_vm1, %v1192_v10, %v1958_v62  ;;  %v2030_v7 = vsel %vm1967_vm1, %v1191_v46, %v1957_v48  ;;  %v3940_v12 = vmov 0   ;;  %v1028_v31 = vsel %vm1022_vm14, %v6052_v24, %v1021_v61  ;;  %v8144_v48 = vld [vmem:[#allocation131_spill] sm:$0xff]  ;;  %v2504_v10 = vld [vmem:[%s7486_s3] sm:$0xff] }
 0x1a5   :  { %3819 = vset.pattern.permute.xlu1 %v3940_v12  ;;  %3818 = vset.pattern.permute.xlu0 %v3940_v12  ;;  %v1029_v28 = vsel %vm1022_vm14, %v1021_v61, %v8143_v51  ;;  %v2013_v23 = vsel %vm1967_vm1, %v928_v56, %v1908_v49  ;;  %v1077_v1 = vmul.f32 %v6034_v42, %v1028_v31  ;;  %v8145_v49 = vrot.slane %v6038_v53, 4  ;;  %v8150_v51 = vld [vmem:[#allocation124_spill] sm:$0xff] }
 0x1a6   :  { %2449 = vmatprep.subr.mxu1 %v2031_v25  ;;  %2569 = vperm.xlu1 %3819, %v2505_v59   ;;  %v1078_v39 = vmul.f32 %v6046_v40, %v1029_v28  ;;  %v954_v26 = vsel %vm948_vm15, %v5998_v29, %v947_v4  ;;  %v955_v35 = vsel %vm948_vm15, %v947_v4, %v8144_v48  ;;  %v873_v60 = vpop.permute.xlu1 %872  ;;  %v8146_v59 = vrot.slane %v6050_v44, 4  ;;  %v8154_v48 = vld [vmem:[#allocation207_spill] sm:$0xff] }
 0x1a7   :  { %2382 = vmatprep.subr.mxu0 %v2013_v23  ;;  %v1003_v24 = vmul.f32 %v6056_v5, %v954_v26  ;;  %v1004_v62 = vmul.f32 %v6060_v9, %v955_v35  ;;  %2450 = vmatpush1.msra.mxu1 %v2030_v7  ;;  %v2005_v46 = vsel %vm1967_vm1, %v780_v27, %v1884_v2  ;;  %v799_v12 = vpop.permute.xlu0 %798  ;;  %v8153_v26 = vld [vmem:[#allocation230_spill] sm:$0xff]  ;;  %v8155_v35 = vld [vmem:[#allocation127_spill] sm:$0xff]  ;;  %v8254_v9 = vld [vmem:[#allocation172_spill] sm:$0xff] }
 0x1a8   :  { %2383 = vmatpush1.msra.mxu0 %v2012_v43  ;;  %v2004_v29 = vsel %vm1967_vm1, %v5829_v55, %v1883_v21  ;;  %v2023_v56 = vsel %vm1967_vm1, %v1078_v39, %v8145_v49  ;;  %v2022_v61 = vsel %vm1967_vm1, %v1077_v1, %v8146_v59  ;;  %2556 = vperm.xlu0 %3818, %v2504_v10   ;;  %v8147_v43 = vld [vmem:[#allocation148_spill] sm:$0xff]  ;;  %v8149_v21 = vld [vmem:[#allocation143_spill] sm:$0xff]  ;;  %v8151_v1 = vld [vmem:[#allocation69_spill] sm:$0xff] }
 0x1a9   :  { %2384 = vmatprep.subr.mxu0 %v2005_v46  ;;  %v1909_v25 = vrot.slane %v1003_v24, 4  ;;  %v1910_v27 = vrot.slane %v1004_v62, 4  ;;  %v880_v2 = vsel %vm8139_vm8, %v871_v3, %v873_v60  ;;  %v881_v7 = vsel %vm8148_vm9, %v873_v60, %v8147_v43  ;;  %2451 = vmatprep.subr.mxu1 %v2023_v56  ;;  %v8152_v39 = vld [vmem:[#allocation206_spill] sm:$0xff]  ;;  %v8156_v10 = vld [vmem:[#allocation84_spill] sm:$0xff]  ;;  %v8161_v59 = vld [vmem:[#allocation19_spill] sm:$0xff] }
 0x1aa   :  { %2385 = vmatpush1.msra.mxu0 %v2004_v29  ;;  %v929_v55 = vmul.f32 %v6064_v20, %v880_v2  ;;  %v930_v53 = vmul.f32 %v6068_v34, %v881_v7  ;;  %v806_v44 = vsel %vm800_vm10, %v6116_v11, %v799_v12  ;;  %v807_v31 = vsel %vm800_vm10, %v799_v12, %v8149_v21  ;;  %v8157_v29 = vld [vmem:[#allocation45_spill] sm:$0xff]  ;;  %v8159_v56 = vld [vmem:[#allocation12_spill] sm:$0xff]  ;;  %v8167_v12 = vld [vmem:[#allocation75_spill] sm:$0xff] }
 0x1ab   :  { %2386 = vmatprep.subr.mxu0 %v6126_v8  ;;  %v1812_v3 = vrot.slane %v6130_v47, 4  ;;  %v188_v28 = vmul.f32 %v8150_v51, %v5787_v0  ;;  %v855_v4 = vmul.f32 %v6076_v58, %v806_v44  ;;  %v856_v23 = vmul.f32 %v6082_v54, %v807_v31  ;;  %2452 = vmatpush1.msra.mxu1 %v2022_v61  ;;  %v8162_v61 = vld [vmem:[#allocation181_spill] sm:$0xff]  ;;  %v8170_v21 = vld [vmem:[#allocation223_spill] sm:$0xff]  ;;  %v8250_v34 = vld [vmem:[#allocation30_spill] sm:$0xff] }
 0x1ac   :  { %2387 = vmatpush1.msra.mxu0 %v8151_v1  ;;  %v782_v11 = vmul.f32 %v8153_v26, %v8152_v39  ;;  %v781_v24 = vmul.f32 %v8155_v35, %v8154_v48  ;;  %v2015_v8 = vsel %vm1967_vm1, %v930_v53, %v1910_v27  ;;  %v2014_v47 = vsel %vm1967_vm1, %v929_v55, %v1909_v25  ;;  %v8165_v27 = vld [vmem:[#allocation41_spill] sm:$0xff]  ;;  %v8168_v55 = vld [vmem:[#allocation235_spill] sm:$0xff]  ;;  %v8175_v39 = vld [vmem:[#allocation92_spill] sm:$0xff] }
 0x1ad   :  { %2388 = vmatprep.subr.mxu0 %v6135_v36  ;;  %v1788_v0 = vrot.slane %v6139_v6, 4  ;;  %v1885_v62 = vrot.slane %v855_v4, 4  ;;  %v1886_v46 = vrot.slane %v856_v23, 4  ;;  %v1981_v60 = vsel %vm1967_vm1, %v6143_v38, %v1812_v3  ;;  %2453 = vmatprep.subr.mxu1 %v2015_v8  ;;  %v8164_v6 = vld [vmem:[#allocation221_spill] sm:$0xff]  ;;  %v8172_v4 = vld [vmem:[#allocation186_spill] sm:$0xff]  ;;  %v8177_v8 = vld [vmem:[#allocation195_spill] sm:$0xff] }
 0x1ae   :  { %2389 = vmatpush1.msra.mxu0 %v8156_v10  ;;  %v6215_v49 = vrot.slane %v8157_v29, %v8057_v37  ;;  %v6219_v36 = vrot.slane %v8157_v29, %v8159_v56  ;;  %v6223_v25 = vrot.slane %v8162_v61, %v8161_v59  ;;  %2454 = vmatpush1.msra.mxu1 %v2014_v47  ;;  %v8166_v43 = vld [vmem:[#allocation105_spill] sm:$0xff]  ;;  %v8173_v23 = vld [vmem:[#allocation238_spill] sm:$0xff]  ;;  %v8178_v47 = vld [vmem:[#allocation67_spill] sm:$0xff] }
 0x1af   :  { %2390 = vmatprep.subr.mxu0 %v1981_v60  ;;  %v412_v2 = vmul.f32 %v8165_v27, %v8164_v6  ;;  %v1973_v38 = vsel %vm1967_vm1, %v188_v28, %v1788_v0  ;;  %v2007_v37 = vsel %vm1967_vm1, %v782_v11, %v1886_v46  ;;  %v2006_v7 = vsel %vm1967_vm1, %v781_v24, %v1885_v62  ;;  %v8171_v31 = vld [vmem:[#allocation237_spill] sm:$0xff]  ;;  %v8176_v48 = vld [vmem:[#allocation98_spill] sm:$0xff]  ;;  %v8180_v10 = vld [vmem:[#allocation83_spill] sm:$0xff] }
 0x1b0   :  { %8158 = vst [vmem:[#allocation151_spill] sm:$0xff] %v6215_v49  ;;  %8160 = vst [vmem:[#allocation110_spill] sm:$0xff] %v6219_v36  ;;  %2391 = vmatpush1.msra.mxu0 %v8166_v43  ;;  %v411_v53 = vmul.f32 %v8168_v55, %v8167_v12  ;;  %v6235_v44 = vrot.slane %v8157_v29, %v8161_v59  ;;  %2455 = vmatprep.subr.mxu1 %v2007_v37  ;;  %v8174_v28 = vld [vmem:[#allocation117_spill] sm:$0xff]  ;;  %v8179_v62 = vld [vmem:[#allocation182_spill] sm:$0xff] }
 0x1b1   :  { %8163 = vst [vmem:[#allocation111_spill] sm:$0xff] %v6223_v25  ;;  %2392 = vmatprep.subr.mxu0 %v1973_v38  ;;  %v264_v3 = vmul.f32 %v8171_v31, %v8170_v21  ;;  %v338_v1 = vmul.f32 %v8173_v23, %v8172_v4  ;;  %2456 = vmatpush1.msra.mxu1 %v2006_v7  ;;  %v1814_v0 = vrot.slane %v412_v2, 4  ;;  %v8181_v29 = vld [vmem:[#allocation116_spill] sm:$0xff]  ;;  %v8182_v59 = vld [vmem:[#allocation222_spill] sm:$0xff]  ;;  %v8183_v6 = vld [vmem:[#allocation225_spill] sm:$0xff] }
 0x1b2   :  { %8169 = vst [vmem:[#allocation161_spill] sm:$0xff] %v6235_v44  ;;  %2393 = vmatpush1.msra.mxu0 %v8174_v28  ;;  %v263_v11 = vmul.f32 %v6215_v49, %v8175_v39  ;;  %v337_v24 = vmul.f32 %v6219_v36, %v8176_v48  ;;  %2457 = vmatprep.subr.mxu1 %v8178_v47  ;;  %v1813_v60 = vrot.slane %v411_v53, 4  ;;  %v8224_v55 = vld [vmem:[#allocation163_spill] sm:$0xff]  ;;  %v8238_v26 = vld [vmem:[#allocation16_spill] sm:$0xff] }
 0x1b3   :  { %3784 = vmatmul.mubr.msk.f32.vlgmr.msra.gmra.mxu0 %vm2192_vm11, %v8177_v8  ;;  %v190_v46 = vmul.f32 %v6223_v25, %v8179_v62  ;;  %2458 = vmatpush1.msra.mxu1 %v8180_v10  ;;  %v189_v56 = vmul.f32 %v6235_v44, %v8181_v29  ;;  %v1790_v61 = vrot.slane %v264_v3, 4  ;;  %v1983_v43 = vsel %vm1967_vm1, %v338_v1, %v1814_v0  ;;  %v8251_v20 = vld [vmem:[#allocation71_spill] sm:$0xff] }
 0x1b4   :  { %2459 = vmatprep.subr.mxu1 %v8182_v59  ;;  %v1789_v38 = vrot.slane %v263_v11, 4  ;;  %v1982_v2 = vsel %vm1967_vm1, %v337_v24, %v1813_v60 }
 0x1b5   :  { %2460 = vmatpush1.msra.mxu1 %v8183_v6  ;;  %v1975_v37 = vsel %vm1967_vm1, %v190_v46, %v1790_v61 }
 0x1b6   :  { %2461 = vmatprep.subr.mxu1 %v1983_v43  ;;  %v1974_v7 = vsel %vm1967_vm1, %v189_v56, %v1789_v38  ;;  %vm8204_vm1 = vmmov %vm8139_vm8  ;;  %vm3375_vm8 = vcmask 719872  }
 0x1b7   :  { %2462 = vmatpush1.msra.mxu1 %v1982_v2  ;;  %vm8220_vm9 = vmmov %vm8204_vm1 }
 0x1b8   :  { %2463 = vmatprep.subr.mxu1 %v1975_v37 }
 0x1b9   :  { %2464 = vmatpush1.msra.mxu1 %v1974_v7 }
 0x1ba   :  { %3787 = vmatmul.mubr.msk.f32.vlgmr.msra.gmra.mxu1 %vm2192_vm11, %v8177_v8  ;;  %vm8205_vm11 = vmmov %vm8204_vm1 }
 0x219   :  { %v2357_v4 = vpop.f32.mrf.mxu1 }
 0x21a   :  { %v2517_v39 = vmul.f32 %v2357_v4, %v2357_v4 }
 0x21b   :  { %v2359_v11 = vpop.f32.mrf.mxu1 }
 0x21c   :  { %v2286_v12 = vpop.f32.mrf.mxu0  ;;  %v2518_v47 = vmul.f32 %v2359_v11, %v2359_v11 }
 0x21d   :  { %v2515_v21 = vmul.f32 %v2286_v12, %v2286_v12 }
 0x21e   :  { %v2288_v53 = vpop.f32.mrf.mxu0 }
 0x21f   :  { %v2516_v3 = vmul.f32 %v2288_v53, %v2288_v53  ;;  %v2506_v1 = vadd.f32 %v2288_v53, %v2286_v12 }
 0x221   :  { %v2523_v28 = vadd.f32 %v2516_v3, %v2515_v21  ;;  %v2507_v48 = vadd.f32 %v2506_v1, %v2357_v4 }
 0x223   :  { %v2524_v24 = vadd.f32 %v2523_v28, %v2517_v39  ;;  %v2508_v62 = vadd.f32 %v2507_v48, %v2359_v11  ;;  %v6267_v1 = vpop.permute.xlu0 %2556  ;;  %v6269_v28 = vpop.permute.xlu1 %2569 }
 0x225   :  { %v2525_v8 = vadd.f32 %v2524_v24, %v2518_v47 }
 0x273   :  { %v6262_v0 = vpop.f32.mrf.mxu0 }
 0x274   :  { %v2519_v46 = vmul.f32 %v6262_v0, %v6262_v0  ;;  %v2509_v60 = vadd.f32 %v2508_v62, %v6262_v0 }
 0x275   :  { %v2430_v10 = vpop.f32.mrf.mxu0 }
 0x276   :  { %v2526_v29 = vadd.f32 %v2525_v8, %v2519_v46  ;;  %v2520_v56 = vmul.f32 %v2430_v10, %v2430_v10  ;;  %v2510_v59 = vadd.f32 %v2509_v60, %v2430_v10 }
 0x278   :  { %v2527_v6 = vadd.f32 %v2526_v29, %v2520_v56 }
 0x27a   :  { %v2499_v61 = vpop.f32.mrf.mxu1 }
 0x27b   :  { %v2511_v43 = vadd.f32 %v2510_v59, %v2499_v61  ;;  %v2521_v38 = vmul.f32 %v2499_v61, %v2499_v61 }
 0x27c   :  { %v2501_v2 = vpop.f32.mrf.mxu1 }
 0x27d   :  { %v2528_v37 = vadd.f32 %v2527_v6, %v2521_v38  ;;  %v2512_v7 = vadd.f32 %v2511_v43, %v2501_v2  ;;  %v2522_v21 = vmul.f32 %v2501_v2, %v2501_v2 }
 0x27f   :  { %2513 = vadd.xlane.f32.xlu0 %v2512_v7  ;;  %v2529_v3 = vadd.f32 %v2528_v37, %v2522_v21 }
 0x281   :  { %2530 = vadd.xlane.f32.xlu1 %v2529_v3 }
 0x308   :  { %v2514_v39 = vpop.xlane.xlu0 %2513 }
 0x309   :  { %v2532_v48 = vmul.f32 0.0009765625, %v2514_v39 }
 0x30a   :  { %v2531_v24 = vpop.xlane.xlu1 %2530 }
 0x30b   :  { %v2533_v47 = vmul.f32 0.0009765625, %v2531_v24  ;;  %v2534_v62 = vmul.f32 %v2532_v48, %v2532_v48  ;;  %v2536_v60 = vsub.f32 %v2286_v12, %v2532_v48  ;;  %v2537_v29 = vsub.f32 %v2288_v53, %v2532_v48 }
 0x30c   :  { %v2538_v56 = vsub.f32 %v2357_v4, %v2532_v48  ;;  %v2539_v59 = vsub.f32 %v2359_v11, %v2532_v48  ;;  %v2541_v43 = vsub.f32 %v2430_v10, %v2532_v48  ;;  %v2542_v38 = vsub.f32 %v2499_v61, %v2532_v48 }
 0x30d   :  { %v2535_v46 = vsub.f32 %v2533_v47, %v2534_v62  ;;  %v2543_v4 = vsub.f32 %v2501_v2, %v2532_v48 }
 0x30f   :  { %v2544_v8 = vadd.f32 1e-05, %v2535_v46 }
 0x311   :  { %3824 = vrsqrt.f32 %v2544_v8 }
 0x31e   :  { %v3825_v6 = vpop.eup %3824 }
 0x31f   :  { %v2549_v37 = vmul.f32 %v3825_v6, %v2539_v59  ;;  %v2547_v7 = vmul.f32 %v3825_v6, %v2537_v29  ;;  %v2548_v21 = vmul.f32 %v3825_v6, %v2538_v56  ;;  %v2546_v3 = vmul.f32 %v3825_v6, %v2536_v60 }
 0x320   :  { %v6271_v45 = vmul.f32 %v3825_v6, %v2541_v43  ;;  %v6273_v39 = vmul.f32 %v3825_v6, %v2542_v38  ;;  %v2553_v61 = vmul.f32 %v3825_v6, %v2543_v4  ;;  %v2540_v43 = vsub.f32 %v6262_v0, %v2532_v48 }
 0x321   :  { %v2562_v24 = vmul.f32 %v6267_v1, %v2549_v37  ;;  %v2560_v47 = vmul.f32 %v6267_v1, %v2547_v7  ;;  %v2561_v12 = vmul.f32 %v6267_v1, %v2548_v21  ;;  %v2559_v53 = vmul.f32 %v6267_v1, %v2546_v3 }
 0x322   :  { %v2566_v56 = vmul.f32 %v6267_v1, %v2553_v61  ;;  %v2550_v37 = vmul.f32 %v3825_v6, %v2540_v43  ;;  %v8185_v61 = vld [vmem:[#allocation118_spill] sm:$0xff] }
 0x323   :  { %v2575_v11 = vadd.f32 %v6269_v28, %v2562_v24  ;;  %v2573_v10 = vadd.f32 %v6269_v28, %v2560_v47  ;;  %v2574_v8 = vadd.f32 %v6269_v28, %v2561_v12  ;;  %v2572_v60 = vadd.f32 %v6269_v28, %v2559_v53  ;;  %v8184_v12 = vld [vmem:[#allocation108_spill] sm:$0xff] }
 0x324   :  { %v2579_v59 = vadd.f32 %v6269_v28, %v2566_v56  ;;  %v2563_v7 = vmul.f32 %v6267_v1, %v2550_v37 }
 0x325   :  { %v6281_v62 = vmax.f32 %v2575_v11, 0.0  ;;  %v6283_v46 = vmax.f32 %v2573_v10, 0.0  ;;  %v6291_v2 = vmax.f32 %v2574_v8, 0.0  ;;  %v6293_v29 = vmax.f32 %v2572_v60, 0.0 }
 0x326   :  { %v6306_v38 = vmax.f32 %v2579_v59, 0.0  ;;  %v2576_v0 = vadd.f32 %v6269_v28, %v2563_v7  ;;  %v8187_v7 = vld [vmem:[#allocation115_spill] sm:$0xff] }
 0x327   :  { %3186 = vrot.lane.b32.xlu0 %v6281_v62, %s3932_s12  ;;  %3182 = vrot.lane.b32.xlu1 %v6283_v46, %s3932_s12 }
 0x328   :  { %v6322_v48 = vmax.f32 %v2576_v0, 0.0 }
 0x32b   :  { %3184 = vrot.lane.b32.xlu1 %v6291_v2, %s3932_s12  ;;  %3093 = vrot.lane.b32.xlu0 %v6293_v29, %s3936_s16 }
 0x32f   :  { %3145 = vrot.lane.b32.xlu0 %v6281_v62, %s3934_s14  ;;  %3180 = vrot.lane.b32.xlu1 %v6293_v29, %s3932_s12 }
 0x333   :  { %3090 = vrot.lane.b32.xlu0 %v6306_v38, %s3936_s16  ;;  %3141 = vrot.lane.b32.xlu1 %v6283_v46, %s3934_s14 }
 0x337   :  { %3054 = vrot.lane.b32.xlu0 %v6283_v46, %s3935_s15  ;;  %3143 = vrot.lane.b32.xlu1 %v6291_v2, %s3934_s14 }
 0x33b   :  { %3011 = vrot.lane.b32.xlu0 %v6293_v29, %s3938_s20  ;;  %3139 = vrot.lane.b32.xlu1 %v6293_v29, %s3934_s14 }
 0x33f   :  { %3097 = vrot.lane.b32.xlu0 %v6291_v2, %s3936_s16  ;;  %3188 = vrot.lane.b32.xlu1 %v6322_v48, %s3932_s12 }
 0x343   :  { %3008 = vrot.lane.b32.xlu0 %v6306_v38, %s3938_s20  ;;  %3095 = vrot.lane.b32.xlu1 %v6283_v46, %s3936_s16 }
 0x347   :  { %2972 = vrot.lane.b32.xlu0 %v6283_v46, %s3937_s19  ;;  %3147 = vrot.lane.b32.xlu1 %v6322_v48, %s3934_s14 }
 0x34b   :  { %3058 = vrot.lane.b32.xlu0 %v6281_v62, %s3935_s15  ;;  %3052 = vrot.lane.b32.xlu1 %v6293_v29, %s3935_s15 }
 0x34f   :  { %2929 = vrot.lane.b32.xlu0 %v6293_v29, %s3924_s7  ;;  %3049 = vrot.lane.b32.xlu1 %v6306_v38, %s3935_s15 }
 0x353   :  { %3015 = vrot.lane.b32.xlu0 %v6291_v2, %s3938_s20  ;;  %3013 = vrot.lane.b32.xlu1 %v6283_v46, %s3938_s20 }
 0x357   :  { %2926 = vrot.lane.b32.xlu0 %v6306_v38, %s3924_s7  ;;  %3099 = vrot.lane.b32.xlu1 %v6281_v62, %s3936_s16 }
 0x35b   :  { %2890 = vrot.lane.b32.xlu0 %v6283_v46, %s3923_s24  ;;  %2970 = vrot.lane.b32.xlu1 %v6293_v29, %s3937_s19 }
 0x35f   :  { %2976 = vrot.lane.b32.xlu0 %v6281_v62, %s3937_s19  ;;  %3056 = vrot.lane.b32.xlu1 %v6291_v2, %s3935_s15 }
 0x363   :  { %2847 = vrot.lane.b32.xlu0 %v6293_v29, %s3926_s26  ;;  %2967 = vrot.lane.b32.xlu1 %v6306_v38, %s3937_s19 }
 0x367   :  { %2933 = vrot.lane.b32.xlu0 %v6291_v2, %s3924_s7  ;;  %2931 = vrot.lane.b32.xlu1 %v6283_v46, %s3924_s7 }
 0x36b   :  { %2844 = vrot.lane.b32.xlu0 %v6306_v38, %s3926_s26  ;;  %3017 = vrot.lane.b32.xlu1 %v6281_v62, %s3938_s20 }
 0x36f   :  { %2808 = vrot.lane.b32.xlu0 %v6283_v46, %s3925_s25  ;;  %2888 = vrot.lane.b32.xlu1 %v6293_v29, %s3923_s24 }
 0x373   :  { %2894 = vrot.lane.b32.xlu0 %v6281_v62, %s3923_s24  ;;  %2974 = vrot.lane.b32.xlu1 %v6291_v2, %s3937_s19 }
 0x377   :  { %2765 = vrot.lane.b32.xlu0 %v6293_v29, %s3922_s18  ;;  %2885 = vrot.lane.b32.xlu1 %v6306_v38, %s3923_s24 }
 0x37b   :  { %2851 = vrot.lane.b32.xlu0 %v6291_v2, %s3926_s26  ;;  %2849 = vrot.lane.b32.xlu1 %v6283_v46, %s3926_s26 }
 0x37f   :  { %2762 = vrot.lane.b32.xlu0 %v6306_v38, %s3922_s18  ;;  %2935 = vrot.lane.b32.xlu1 %v6281_v62, %s3924_s7 }
 0x383   :  { %2726 = vrot.lane.b32.xlu0 %v6283_v46, %s3927_s27  ;;  %2806 = vrot.lane.b32.xlu1 %v6293_v29, %s3925_s25 }
 0x387   :  { %2812 = vrot.lane.b32.xlu0 %v6281_v62, %s3925_s25  ;;  %2892 = vrot.lane.b32.xlu1 %v6291_v2, %s3923_s24 }
 0x38b   :  { %2683 = vrot.lane.b32.xlu0 %v6293_v29, %s3929_s9  ;;  %2803 = vrot.lane.b32.xlu1 %v6306_v38, %s3925_s25 }
 0x38f   :  { %2769 = vrot.lane.b32.xlu0 %v6291_v2, %s3922_s18  ;;  %2767 = vrot.lane.b32.xlu1 %v6283_v46, %s3922_s18 }
 0x393   :  { %2680 = vrot.lane.b32.xlu0 %v6306_v38, %s3929_s9  ;;  %2853 = vrot.lane.b32.xlu1 %v6281_v62, %s3926_s26 }
 0x397   :  { %2644 = vrot.lane.b32.xlu0 %v6283_v46, %s3928_s30  ;;  %2724 = vrot.lane.b32.xlu1 %v6293_v29, %s3927_s27 }
 0x399   :  { %v3187_v6 = vpop.permute.xlu0 %3186  ;;  %v3183_v21 = vpop.permute.xlu1 %3182 }
 0x39b   :  { %2730 = vrot.lane.b32.xlu0 %v6281_v62, %s3927_s27  ;;  %2810 = vrot.lane.b32.xlu1 %v6291_v2, %s3925_s25 }
 0x39d   :  { %v3185_v3 = vpop.permute.xlu1 %3184  ;;  %v3094_v24 = vpop.permute.xlu0 %3093 }
 0x39e   :  { %v3197_v47 = vsel %vm1209_vm12, %v3183_v21, %v3185_v3 }
 0x39f   :  { %2601 = vrot.lane.b32.xlu0 %v6293_v29, %s3930_s10  ;;  %2721 = vrot.lane.b32.xlu1 %v6306_v38, %s3927_s27  ;;  %v3214_v53 = vmul.f32 %v3197_v47, %v8184_v12 }
 0x3a1   :  { %3379 = vmatprep.subr.mxu0 %v3214_v53  ;;  %v3146_v4 = vpop.permute.xlu0 %3145  ;;  %v6426_v11 = vpop.permute.xlu1 %3180  ;;  %v8188_v53 = vld [vmem:[#allocation120_spill] sm:$0xff] }
 0x3a2   :  { %v3196_v10 = vsel %vm1209_vm12, %v6426_v11, %v3183_v21 }
 0x3a3   :  { %v3213_v8 = vmul.f32 %v3196_v10, %v8185_v61  ;;  %2687 = vrot.lane.b32.xlu0 %v6291_v2, %s3929_s9  ;;  %2685 = vrot.lane.b32.xlu1 %v6283_v46, %s3929_s9  ;;  %v8189_v61 = vld [vmem:[#allocation122_spill] sm:$0xff] }
 0x3a5   :  { %v6435_v60 = vpop.permute.xlu0 %3090  ;;  %3380 = vmatpush1.msra.mxu0 %v3213_v8  ;;  %v3142_v56 = vpop.permute.xlu1 %3141  ;;  %v3132_v8 = vmul.f32 %v6283_v46, %v8189_v61  ;;  %v8191_v61 = vld [vmem:[#allocation136_spill] sm:$0xff] }
 0x3a6   :  { %8186 = vst [vmem:[#allocation167_spill] sm:$0xff] %v6435_v60 }
 0x3a7   :  { %2591 = vrot.lane.b32.xlu0 %v6306_v38, %s3930_s10  ;;  %2771 = vrot.lane.b32.xlu1 %v6281_v62, %s3922_s18 }
 0x3a9   :  { %v6441_v59 = vpop.permute.xlu0 %3054  ;;  %v3144_v43 = vpop.permute.xlu1 %3143 }
 0x3aa   :  { %v3156_v37 = vsel %vm1135_vm13, %v3142_v56, %v3144_v43 }
 0x3ab   :  { %2648 = vrot.lane.b32.xlu0 %v6281_v62, %s3928_s30  ;;  %2642 = vrot.lane.b32.xlu1 %v6293_v29, %s3928_s30  ;;  %v3173_v0 = vmul.f32 %v3156_v37, %v8187_v7  ;;  %v3198_v37 = vsel %vm1209_vm12, %v3185_v3, %v3187_v6 }
 0x3ac   :  { %v3215_v25 = vmul.f32 %v3198_v37, %v8192_v15  ;;  %v8195_v15 = vld [vmem:[#allocation133_spill] sm:$0xff] }
 0x3ad   :  { %v6449_v21 = vpop.permute.xlu0 %3011  ;;  %3381 = vmatprep.subr.mxu0 %v3173_v0  ;;  %v6451_v47 = vpop.permute.xlu1 %3139 }
 0x3ae   :  { %v3155_v12 = vsel %vm1135_vm13, %v6451_v47, %v3142_v56 }
 0x3af   :  { %v3172_v10 = vmul.f32 %v3155_v12, %v8188_v53  ;;  %2607 = vrot.lane.b32.xlu0 %v6281_v62, %s3930_s10  ;;  %2728 = vrot.lane.b32.xlu1 %v6291_v2, %s3927_s27  ;;  %v8190_v12 = vld [vmem:[#allocation128_spill] sm:$0xff] }
 0x3b0   :  { %v3131_v53 = vmul.f32 %v6293_v29, %v8190_v12 }
 0x3b1   :  { %v6463_v7 = vpop.permute.xlu0 %3097  ;;  %3382 = vmatpush1.msra.mxu0 %v3172_v10  ;;  %v6465_v0 = vpop.permute.xlu1 %3188  ;;  %v3122_v10 = vsel %vm1022_vm14, %v6435_v60, %v3094_v24  ;;  %v8278_v60 = vld [vmem:[#allocation21_spill] sm:$0xff] }
 0x3b2   :  { %v3199_v56 = vsel %vm1209_vm12, %v3187_v6, %v6465_v0  ;;  %3383 = vmatprep.subr.mxu0 %v3132_v8  ;;  %v3123_v37 = vmul.f32 %v3122_v10, %v8195_v15  ;;  %v8197_v10 = vld [vmem:[#allocation141_spill] sm:$0xff] }
 0x3b3   :  { %2896 = vrot.lane.b32.xlu0 %v6322_v48, %s3923_s24  ;;  %2639 = vrot.lane.b32.xlu1 %v6306_v38, %s3928_s30  ;;  %v3216_v3 = vmul.f32 %v3199_v56, %v8191_v61  ;;  %v8194_v56 = vld [vmem:[#allocation123_spill] sm:$0xff] }
 0x3b4   :  { %3384 = vmatpush1.msra.mxu0 %v3131_v53  ;;  %v3157_v53 = vsel %vm1135_vm13, %v3144_v43, %v3146_v4 }
 0x3b5   :  { %v6479_v44 = vpop.permute.xlu0 %3008  ;;  %3450 = vmatprep.subr.mxu1 %v3216_v3  ;;  %v3096_v6 = vpop.permute.xlu1 %3095 }
 0x3b6   :  { %8193 = vst [vmem:[#allocation44_spill] sm:$0xff] %v6479_v44  ;;  %v3107_v8 = vsel %vm1022_vm14, %v3094_v24, %v3096_v6  ;;  %3451 = vmatpush1.msra.mxu1 %v3215_v25  ;;  %v8196_v24 = vld [vmem:[#allocation142_spill] sm:$0xff]  ;;  %v3108_v23 = vsel %vm1022_vm14, %v3096_v6, %v6463_v7 }
 0x3b7   :  { %2814 = vrot.lane.b32.xlu0 %v6322_v48, %s3925_s25  ;;  %2603 = vrot.lane.b32.xlu1 %v6283_v46, %s3930_s10  ;;  %v3124_v12 = vmul.f32 %v3107_v8, %v8194_v56  ;;  %v3174_v8 = vmul.f32 %v3157_v53, %v8197_v10 }
 0x3b9   :  { %v6489_v61 = vpop.permute.xlu0 %2972  ;;  %v6491_v49 = vpop.permute.xlu1 %3147  ;;  %3385 = vmatprep.subr.mxu0 %v3124_v12 }
 0x3ba   :  { %v3158_v25 = vsel %vm1135_vm13, %v3146_v4, %v6491_v49  ;;  %3386 = vmatpush1.msra.mxu0 %v3123_v37  ;;  %v8199_v4 = vld [vmem:[#allocation149_spill] sm:$0xff]  ;;  %v8200_v37 = vld [vmem:[#allocation150_spill] sm:$0xff] }
 0x3bb   :  { %2732 = vrot.lane.b32.xlu0 %v6322_v48, %s3927_s27  ;;  %2689 = vrot.lane.b32.xlu1 %v6281_v62, %s3929_s9  ;;  %v3175_v3 = vmul.f32 %v3158_v25, %v8196_v24  ;;  %v3134_v15 = vmul.f32 %v6281_v62, %v8199_v4  ;;  %v3133_v53 = vmul.f32 %v6291_v2, %v8200_v37  ;;  %v8201_v25 = vld [vmem:[#allocation135_spill] sm:$0xff] }
 0x3bc   :  { %v8203_v4 = vld [vmem:[#allocation139_spill] sm:$0xff] }
 0x3bd   :  { %v6501_v43 = vpop.permute.xlu0 %3058  ;;  %3452 = vmatprep.subr.mxu1 %v3175_v3  ;;  %v3053_v56 = vpop.permute.xlu1 %3052 }
 0x3be   :  { %8198 = vst [vmem:[#allocation121_spill] sm:$0xff] %v6501_v43  ;;  %v3066_v12 = vsel %vm948_vm15, %v3053_v56, %v6441_v59  ;;  %3453 = vmatpush1.msra.mxu1 %v3174_v8 }
 0x3bf   :  { %2650 = vrot.lane.b32.xlu0 %v6322_v48, %s3928_s30  ;;  %2646 = vrot.lane.b32.xlu1 %v6291_v2, %s3928_s30  ;;  %v3083_v24 = vmul.f32 %v3066_v12, %v8201_v25  ;;  %v3040_v12 = vsel %vm8204_vm1, %v6479_v44, %v6449_v21  ;;  %v8206_v25 = vld [vmem:[#allocation137_spill] sm:$0xff] }
 0x3c0   :  { %3454 = vmatprep.subr.mxu1 %v3134_v15 }
 0x3c1   :  { %3455 = vmatpush1.msra.mxu1 %v3133_v53  ;;  %v2930_v3 = vpop.permute.xlu0 %2929  ;;  %v6514_v10 = vpop.permute.xlu1 %3049  ;;  %3387 = vmatprep.subr.mxu0 %v3083_v24  ;;  %v2564_v53 = vmul.f32 %v6267_v1, %v6271_v45 }
 0x3c2   :  { %8202 = vst [vmem:[#allocation134_spill] sm:$0xff] %v6514_v10  ;;  %v3081_v8 = vsel %vm948_vm15, %v6514_v10, %v3053_v56 }
 0x3c3   :  { %v3082_v31 = vmul.f32 %v3081_v8, %v8203_v4  ;;  %3266 = vrot.lane.b32.xlu0 %v6291_v2, %s3931_s11  ;;  %2605 = vrot.lane.b32.xlu1 %v6291_v2, %s3930_s10  ;;  %v8207_v8 = vld [vmem:[#allocation146_spill] sm:$0xff]  ;;  %v2577_v45 = vadd.f32 %v6269_v28, %v2564_v53 }
 0x3c4   :  { %v3041_v4 = vmul.f32 %v3040_v12, %v8207_v8  ;;  %v8209_v12 = vld [vmem:[#allocation154_spill] sm:$0xff] }
 0x3c5   :  { %v6526_v15 = vpop.permute.xlu0 %3015  ;;  %v3014_v37 = vpop.permute.xlu1 %3013  ;;  %3388 = vmatpush1.msra.mxu0 %v3082_v31  ;;  %v6556_v53 = vmax.f32 %v2577_v45, 0.0 }
 0x3c6   :  { %v3025_v56 = vsel %vm8205_vm11, %v6449_v21, %v3014_v37  ;;  %vm8261_vm11 = vcmask 588800  }
 0x3c7   :  { %2609 = vrot.lane.b32.xlu0 %v6322_v48, %s3930_s10  ;;  %2937 = vrot.lane.b32.xlu1 %v6322_v48, %s3924_s7  ;;  %v3042_v24 = vmul.f32 %v3025_v56, %v8206_v25  ;;  %v8210_v56 = vld [vmem:[#allocation152_spill] sm:$0xff] }
 0x3c8   :  { %v3125_v25 = vmul.f32 %v3108_v23, %v8210_v56 }
 0x3c9   :  { %v6540_v31 = vpop.permute.xlu0 %2926  ;;  %v6542_v36 = vpop.permute.xlu1 %3099  ;;  %3389 = vmatprep.subr.mxu0 %v3042_v24 }
 0x3ca   :  { %8208 = vst [vmem:[#allocation131_spill] sm:$0xff] %v6540_v31  ;;  %v3109_v21 = vsel %vm1022_vm14, %v6463_v7, %v6542_v36  ;;  %3390 = vmatpush1.msra.mxu0 %v3041_v4 }
 0x3cb   :  { %3225 = vrot.lane.b32.xlu0 %v6291_v2, %s3933_s13  ;;  %2855 = vrot.lane.b32.xlu1 %v6322_v48, %s3926_s26  ;;  %v3126_v6 = vmul.f32 %v3109_v21, %v8209_v12  ;;  %v8211_v2 = vld [vmem:[#allocation140_spill] sm:$0xff] }
 0x3cd   :  { %v6554_v8 = vpop.permute.xlu0 %2890  ;;  %3456 = vmatprep.subr.mxu1 %v3126_v6  ;;  %v2971_v24 = vpop.permute.xlu1 %2970  ;;  %v8213_v6 = vld [vmem:[#allocation159_spill] sm:$0xff] }
 0x3ce   :  { %v2984_v7 = vsel %vm800_vm10, %v2971_v24, %v6489_v61  ;;  %3457 = vmatpush1.msra.mxu1 %v3125_v25  ;;  %v8214_v25 = vld [vmem:[#allocation157_spill] sm:$0xff] }
 0x3cf   :  { %3190 = vrot.lane.b32.xlu0 %v6556_v53, %s3932_s12  ;;  %2773 = vrot.lane.b32.xlu1 %v6322_v48, %s3922_s18  ;;  %v3001_v4 = vmul.f32 %v2984_v7, %v8211_v2 }
 0x3d1   :  { %v6565_v21 = vpop.permute.xlu0 %2976  ;;  %v3057_v23 = vpop.permute.xlu1 %3056  ;;  %3391 = vmatprep.subr.mxu0 %v3001_v4 }
 0x3d2   :  { %8212 = vst [vmem:[#allocation148_spill] sm:$0xff] %v6565_v21  ;;  %v3067_v45 = vsel %vm948_vm15, %v6441_v59, %v3057_v23  ;;  %v3068_v12 = vsel %vm948_vm15, %v3057_v23, %v6501_v43  ;;  %v8216_v23 = vld [vmem:[#allocation153_spill] sm:$0xff] }
 0x3d3   :  { %v3084_v56 = vmul.f32 %v3067_v45, %v8213_v6  ;;  %3268 = vrot.lane.b32.xlu0 %v6281_v62, %s3931_s11  ;;  %2691 = vrot.lane.b32.xlu1 %v6322_v48, %s3929_s9  ;;  %v3085_v7 = vmul.f32 %v3068_v12, %v8214_v25  ;;  %v6590_v45 = vsel %vm726_vm0, %v6540_v31, %v2930_v3  ;;  %v8239_v31 = vld [vmem:[#allocation51_spill] sm:$0xff] }
 0x3d4   :  { %8217 = vst [vmem:[#allocation69_spill] sm:$0xff] %v6590_v45 }
 0x3d5   :  { %v6577_v2 = vpop.permute.xlu0 %2847  ;;  %3458 = vmatprep.subr.mxu1 %v3085_v7  ;;  %v6579_v4 = vpop.permute.xlu1 %2967  ;;  %v6603_v7 = vld [vmem:[#allocation5 + $0x8] sm:$0xff] }
 0x3d6   :  { %8215 = vst [vmem:[#allocation143_spill] sm:$0xff] %v6579_v4  ;;  %v2999_v59 = vsel %vm800_vm10, %v6579_v4, %v2971_v24  ;;  %3459 = vmatpush1.msra.mxu1 %v3084_v56  ;;  %v8218_v24 = vld [vmem:[#allocation147_spill] sm:$0xff]  ;;  %3788 = vmatprep.mubr.msk.f32.mxu0 %vm3375_vm8, %v6603_v7 }
 0x3d7   :  { %v3000_v27 = vmul.f32 %v2999_v59, %v8216_v23  ;;  %3149 = vrot.lane.b32.xlu0 %v6556_v53, %s3934_s14  ;;  %3264 = vrot.lane.b32.xlu1 %v6283_v46, %s3931_s11  ;;  %v8219_v59 = vld [vmem:[#allocation156_spill] sm:$0xff] }
 0x3d8   :  { %v2959_v23 = vmul.f32 %v6590_v45, %v8219_v59  ;;  %3789 = vmatprep.mubr.msk.f32.mxu1 %vm3375_vm8, %v6603_v7 }
 0x3d9   :  { %v6592_v12 = vpop.permute.xlu0 %2933  ;;  %v2932_v6 = vpop.permute.xlu1 %2931  ;;  %3392 = vmatpush1.msra.mxu0 %v3000_v27  ;;  %v3026_v27 = vsel %vm8220_vm9, %v3014_v37, %v6526_v15  ;;  %v8223_v37 = vld [vmem:[#allocation164_spill] sm:$0xff]  ;;  %vm8266_vm9 = vmmov %vm8261_vm11 }
 0x3da   :  { %v6595_v25 = vsel %vm726_vm0, %v2930_v3, %v2932_v6  ;;  %v3043_v51 = vmul.f32 %v3026_v27, %v8224_v55  ;;  %v8226_v27 = vld [vmem:[#allocation160_spill] sm:$0xff] }
 0x3db   :  { %3227 = vrot.lane.b32.xlu0 %v6281_v62, %s3933_s13  ;;  %3262 = vrot.lane.b32.xlu1 %v6293_v29, %s3931_s11  ;;  %v2960_v56 = vmul.f32 %v6595_v25, %v8218_v24  ;;  %v2565_v24 = vmul.f32 %v6267_v1, %v6273_v39  ;;  %v3367_v40 = vmul.f32 %v6595_v25, %v8275_v22 }
 0x3dd   :  { %v6613_v62 = vpop.permute.xlu0 %2844  ;;  %v6615_v3 = vpop.permute.xlu1 %3017  ;;  %3393 = vmatprep.subr.mxu0 %v2960_v56  ;;  %v2578_v1 = vadd.f32 %v6269_v28, %v2565_v24 }
 0x3de   :  { %8221 = vst [vmem:[#allocation206_spill] sm:$0xff] %v6613_v62  ;;  %8222 = vst [vmem:[#allocation207_spill] sm:$0xff] %v6615_v3  ;;  %v3027_v59 = vsel %vm8204_vm1, %v6526_v15, %v6615_v3  ;;  %3394 = vmatpush1.msra.mxu0 %v2959_v23  ;;  %vm8269_vm1 = vcmask 596992  }
 0x3df   :  { %3194 = vrot.lane.b32.xlu0 %v6306_v38, %s3932_s12  ;;  %3223 = vrot.lane.b32.xlu1 %v6283_v46, %s3933_s13  ;;  %v3044_v45 = vmul.f32 %v3027_v59, %v8223_v37  ;;  %v8225_v46 = vld [vmem:[#allocation20_spill] sm:$0xff]  ;;  %v6643_v23 = vmax.f32 %v2578_v1, 0.0 }
 0x3e1   :  { %v6628_v16 = vpop.permute.xlu0 %2808  ;;  %3460 = vmatprep.subr.mxu1 %v3044_v45  ;;  %v2889_v56 = vpop.permute.xlu1 %2888 }
 0x3e2   :  { %v6633_v39 = vsel %vm652_vm2, %v2889_v56, %v6554_v8  ;;  %3461 = vmatpush1.msra.mxu1 %v3043_v51 }
 0x3e3   :  { %3103 = vrot.lane.b32.xlu0 %v6556_v53, %s3936_s16  ;;  %3221 = vrot.lane.b32.xlu1 %v6293_v29, %s3933_s13  ;;  %v2919_v55 = vmul.f32 %v6633_v39, %v8225_v46  ;;  %v8227_v29 = vld [vmem:[#allocation158_spill] sm:$0xff] }
 0x3e4   :  { %v8230_v46 = vld [vmem:[#allocation162_spill] sm:$0xff] }
 0x3e5   :  { %v6641_v15 = vpop.permute.xlu0 %2894  ;;  %v2975_v45 = vpop.permute.xlu1 %2974  ;;  %3395 = vmatprep.subr.mxu0 %v2919_v55 }
 0x3e6   :  { %v2985_v28 = vsel %vm800_vm10, %v6489_v61, %v2975_v45  ;;  %v2986_v51 = vsel %vm800_vm10, %v2975_v45, %v6565_v21  ;;  %v6670_v45 = vsel %vm578_vm3, %v6613_v62, %v6577_v2  ;;  %v8264_v21 = vld [vmem:[#allocation87_spill] sm:$0xff] }
 0x3e7   :  { %v3002_v24 = vmul.f32 %v2985_v28, %v8226_v27  ;;  %3060 = vrot.lane.b32.xlu0 %v6322_v48, %s3935_s15  ;;  %3192 = vrot.lane.b32.xlu1 %v6643_v23, %s3932_s12  ;;  %v3003_v59 = vmul.f32 %v2986_v51, %v8227_v29  ;;  %8231 = vst [vmem:[#allocation12_spill] sm:$0xff] %v6670_v45  ;;  %v8232_v27 = vld [vmem:[#allocation27_spill] sm:$0xff]  ;;  %v8233_v29 = vld [vmem:[#allocation169_spill] sm:$0xff] }
 0x3e9   :  { %v2766_v37 = vpop.permute.xlu0 %2765  ;;  %3462 = vmatprep.subr.mxu1 %v3003_v59  ;;  %v6655_v1 = vpop.permute.xlu1 %2885  ;;  %v2877_v59 = vmul.f32 %v6670_v45, %v8233_v29 }
 0x3ea   :  { %8228 = vst [vmem:[#allocation84_spill] sm:$0xff] %v6655_v1  ;;  %v6659_v61 = vsel %vm652_vm2, %v6655_v1, %v2889_v56  ;;  %3463 = vmatpush1.msra.mxu1 %v3002_v24 }
 0x3eb   :  { %8229 = vst [vmem:[#allocation45_spill] sm:$0xff] %v6659_v61  ;;  %v2918_v55 = vmul.f32 %v6659_v61, %v8230_v46  ;;  %3019 = vrot.lane.b32.xlu0 %v6322_v48, %s3938_s20  ;;  %3270 = vrot.lane.b32.xlu1 %v6322_v48, %s3931_s11 }
 0x3ed   :  { %v2852_v28 = vpop.permute.xlu0 %2851  ;;  %v2850_v51 = vpop.permute.xlu1 %2849  ;;  %3396 = vmatpush1.msra.mxu0 %v2918_v55 }
 0x3ee   :  { %v6674_v56 = vsel %vm578_vm3, %v6577_v2, %v2850_v51  ;;  %v6690_v2 = vsel %vm726_vm0, %v2932_v6, %v6592_v12 }
 0x3ef   :  { %3105 = vrot.lane.b32.xlu0 %v6643_v23, %s3936_s16  ;;  %3151 = vrot.lane.b32.xlu1 %v6643_v23, %s3934_s14  ;;  %v2878_v24 = vmul.f32 %v6674_v56, %v8232_v27  ;;  %v8235_v27 = vld [vmem:[#allocation166_spill] sm:$0xff] }
 0x3f1   :  { %v6684_v46 = vpop.permute.xlu0 %2762  ;;  %v6686_v61 = vpop.permute.xlu1 %2935  ;;  %3397 = vmatprep.subr.mxu0 %v2878_v24  ;;  %v8236_v24 = vld [vmem:[#allocation165_spill] sm:$0xff] }
 0x3f2   :  { %8234 = vst [vmem:[#allocation19_spill] sm:$0xff] %v6684_v46  ;;  %v6695_v55 = vsel %vm726_vm0, %v6592_v12, %v6686_v61  ;;  %3398 = vmatpush1.msra.mxu0 %v2877_v59  ;;  %v2961_v45 = vmul.f32 %v6690_v2, %v8236_v24  ;;  %v8237_v59 = vld [vmem:[#allocation35_spill] sm:$0xff] }
 0x3f3   :  { %2980 = vrot.lane.b32.xlu0 %v6556_v53, %s3937_s19  ;;  %3229 = vrot.lane.b32.xlu1 %v6322_v48, %s3933_s13  ;;  %v2962_v29 = vmul.f32 %v6695_v55, %v8235_v27 }
 0x3f5   :  { %v6705_v6 = vpop.permute.xlu0 %2726  ;;  %v2807_v62 = vpop.permute.xlu1 %2806  ;;  %3464 = vmatprep.subr.mxu1 %v2962_v29 }
 0x3f6   :  { %v6709_v12 = vsel %vm504_vm4, %v2807_v62, %v6628_v16  ;;  %3465 = vmatpush1.msra.mxu1 %v2961_v45 }
 0x3f7   :  { %2939 = vrot.lane.b32.xlu0 %v6556_v53, %s3924_s7  ;;  %v2837_v1 = vmul.f32 %v6709_v12, %v8237_v59  ;;  %3101 = vrot.lane.b32.xlu1 %v6322_v48, %s3936_s16 }
 0x3f9   :  { %v6717_v27 = vpop.permute.xlu0 %2812  ;;  %v2893_v24 = vpop.permute.xlu1 %2892  ;;  %3399 = vmatprep.subr.mxu0 %v2837_v1 }
 0x3fa   :  { %v6721_v29 = vsel %vm652_vm2, %v6554_v8, %v2893_v24  ;;  %v6725_v45 = vsel %vm652_vm2, %v2893_v24, %v6641_v15 }
 0x3fb   :  { %v2920_v35 = vmul.f32 %v6721_v29, %v8238_v26  ;;  %v2921_v59 = vmul.f32 %v6725_v45, %v8239_v31  ;;  %2898 = vrot.lane.b32.xlu0 %v6556_v53, %s3923_s24  ;;  %3153 = vrot.lane.b32.xlu1 %v6306_v38, %s3934_s14  ;;  %v6749_v31 = vsel %vm430_vm5, %v6684_v46, %v2766_v37 }
 0x3fc   :  { %8243 = vst [vmem:[#allocation105_spill] sm:$0xff] %v6749_v31  ;;  %v6763_v46 = vsel %vm578_vm3, %v2850_v51, %v2852_v28 }
 0x3fd   :  { %v2684_v1 = vpop.permute.xlu0 %2683  ;;  %3466 = vmatprep.subr.mxu1 %v2921_v59  ;;  %v6735_v8 = vpop.permute.xlu1 %2803 }
 0x3fe   :  { %8240 = vst [vmem:[#allocation181_spill] sm:$0xff] %v6735_v8  ;;  %v6739_v24 = vsel %vm504_vm4, %v6735_v8, %v2807_v62  ;;  %3467 = vmatpush1.msra.mxu1 %v2920_v35  ;;  %v8244_v35 = vld [vmem:[#allocation39_spill] sm:$0xff] }
 0x3ff   :  { %8241 = vst [vmem:[#allocation221_spill] sm:$0xff] %v6739_v24  ;;  %v2836_v26 = vmul.f32 %v6739_v24, %v8242_v41  ;;  %2857 = vrot.lane.b32.xlu0 %v6556_v53, %s3926_s26  ;;  %3062 = vrot.lane.b32.xlu1 %v6556_v53, %s3935_s15  ;;  %v8245_v41 = vld [vmem:[#allocation173_spill] sm:$0xff] }
 0x400   :  { %v2795_v24 = vmul.f32 %v6749_v31, %v8245_v41  ;;  %v8248_v41 = vld [vmem:[#allocation23_spill] sm:$0xff] }
 0x401   :  { %v2770_v59 = vpop.permute.xlu0 %2769  ;;  %v2768_v54 = vpop.permute.xlu1 %2767  ;;  %3400 = vmatpush1.msra.mxu0 %v2836_v26  ;;  %v2879_v51 = vmul.f32 %v6763_v46, %v8248_v41 }
 0x402   :  { %v6752_v62 = vsel %vm430_vm5, %v2766_v37, %v2768_v54 }
 0x403   :  { %v2796_v8 = vmul.f32 %v6752_v62, %v8244_v35  ;;  %2816 = vrot.lane.b32.xlu0 %v6556_v53, %s3925_s25  ;;  %3021 = vrot.lane.b32.xlu1 %v6556_v53, %s3938_s20  ;;  %v8247_v35 = vld [vmem:[#allocation60_spill] sm:$0xff] }
 0x405   :  { %v6765_v58 = vpop.permute.xlu0 %2680  ;;  %v6767_v26 = vpop.permute.xlu1 %2853  ;;  %3401 = vmatprep.subr.mxu0 %v2796_v8 }
 0x406   :  { %8246 = vst [vmem:[#allocation75_spill] sm:$0xff] %v6765_v58  ;;  %v6771_v37 = vsel %vm578_vm3, %v2852_v28, %v6767_v26  ;;  %3402 = vmatpush1.msra.mxu0 %v2795_v24  ;;  %v8249_v24 = vld [vmem:[#allocation55_spill] sm:$0xff] }
 0x407   :  { %v2880_v4 = vmul.f32 %v6771_v37, %v8247_v35  ;;  %2775 = vrot.lane.b32.xlu0 %v6556_v53, %s3922_s18  ;;  %2978 = vrot.lane.b32.xlu1 %v6322_v48, %s3937_s19 }
 0x409   :  { %v6781_v31 = vpop.permute.xlu0 %2644  ;;  %3468 = vmatprep.subr.mxu1 %v2880_v4  ;;  %v2725_v8 = vpop.permute.xlu1 %2724 }
 0x40a   :  { %v6785_v28 = vsel %vm356_vm6, %v2725_v8, %v6705_v6  ;;  %3469 = vmatpush1.msra.mxu1 %v2879_v51 }
 0x40b   :  { %v2755_v35 = vmul.f32 %v6785_v28, %v8249_v24  ;;  %2734 = vrot.lane.b32.xlu0 %v6556_v53, %s3927_s27  ;;  %3064 = vrot.lane.b32.xlu1 %v6643_v23, %s3935_s15 }
 0x40d   :  { %v6793_v41 = vpop.permute.xlu0 %2730  ;;  %v2811_v52 = vpop.permute.xlu1 %2810  ;;  %3403 = vmatprep.subr.mxu0 %v2755_v35 }
 0x40e   :  { %v6797_v4 = vsel %vm504_vm4, %v6628_v16, %v2811_v52  ;;  %v6801_v51 = vsel %vm504_vm4, %v2811_v52, %v6717_v27 }
 0x40f   :  { %v2838_v24 = vmul.f32 %v6797_v4, %v8250_v34  ;;  %v2839_v44 = vmul.f32 %v6801_v51, %v8251_v20  ;;  %2693 = vrot.lane.b32.xlu0 %v6556_v53, %s3929_s9  ;;  %3023 = vrot.lane.b32.xlu1 %v6643_v23, %s3938_s20  ;;  %v6825_v20 = vsel %vm282_vm7, %v6765_v58, %v2684_v1 }
 0x410   :  { %8255 = vst [vmem:[#allocation117_spill] sm:$0xff] %v6825_v20  ;;  %v6839_v58 = vsel %vm430_vm5, %v2768_v54, %v2770_v59 }
 0x411   :  { %v2602_v35 = vpop.permute.xlu0 %2601  ;;  %3470 = vmatprep.subr.mxu1 %v2839_v44  ;;  %v6811_v16 = vpop.permute.xlu1 %2721 }
 0x412   :  { %8252 = vst [vmem:[#allocation223_spill] sm:$0xff] %v6811_v16  ;;  %v6815_v52 = vsel %vm356_vm6, %v6811_v16, %v2725_v8  ;;  %3471 = vmatpush1.msra.mxu1 %v2838_v24  ;;  %v8256_v24 = vld [vmem:[#allocation65_spill] sm:$0xff] }
 0x413   :  { %8253 = vst [vmem:[#allocation186_spill] sm:$0xff] %v6815_v52  ;;  %v2754_v34 = vmul.f32 %v6815_v52, %v8254_v9  ;;  %2652 = vrot.lane.b32.xlu0 %v6556_v53, %s3928_s30  ;;  %2982 = vrot.lane.b32.xlu1 %v6643_v23, %s3937_s19  ;;  %v8257_v9 = vld [vmem:[#allocation180_spill] sm:$0xff] }
 0x414   :  { %v2713_v52 = vmul.f32 %v6825_v20, %v8257_v9  ;;  %v8260_v9 = vld [vmem:[#allocation33_spill] sm:$0xff] }
 0x415   :  { %v2688_v44 = vpop.permute.xlu0 %2687  ;;  %v2686_v5 = vpop.permute.xlu1 %2685  ;;  %3404 = vmatpush1.msra.mxu0 %v2754_v34  ;;  %v2797_v54 = vmul.f32 %v6839_v58, %v8260_v9 }
 0x416   :  { %v6828_v8 = vsel %vm282_vm7, %v2684_v1, %v2686_v5  ;;  %v2698_v42 = vsel %vm282_vm7, %v2686_v5, %v2688_v44  ;;  %v8277_v5 = vld [vmem:[#allocation94_spill] sm:$0xff] }
 0x417   :  { %v2714_v16 = vmul.f32 %v6828_v8, %v8256_v24  ;;  %2611 = vrot.lane.b32.xlu0 %v6556_v53, %s3930_s10  ;;  %2941 = vrot.lane.b32.xlu1 %v6643_v23, %s3924_s7  ;;  %v8259_v24 = vld [vmem:[#allocation76_spill] sm:$0xff] }
 0x419   :  { %v6841_v10 = vpop.permute.xlu0 %2591  ;;  %v6843_v34 = vpop.permute.xlu1 %2771  ;;  %3405 = vmatprep.subr.mxu0 %v2714_v16 }
 0x41a   :  { %8258 = vst [vmem:[#allocation92_spill] sm:$0xff] %v6841_v10  ;;  %v6847_v1 = vsel %vm430_vm5, %v2770_v59, %v6843_v34  ;;  %3406 = vmatpush1.msra.mxu0 %v2713_v52  ;;  %v8262_v52 = vld [vmem:[#allocation81_spill] sm:$0xff] }
 0x41b   :  { %v2798_v33 = vmul.f32 %v6847_v1, %v8259_v24  ;;  %2654 = vrot.lane.b32.xlu0 %v6643_v23, %s3928_s30  ;;  %2900 = vrot.lane.b32.xlu1 %v6643_v23, %s3923_s24 }
 0x41d   :  { %v6857_v20 = vpop.permute.xlu0 %2648  ;;  %3472 = vmatprep.subr.mxu1 %v2798_v33  ;;  %v2643_v16 = vpop.permute.xlu1 %2642 }
 0x41e   :  { %v6861_v59 = vsel %vm8261_vm11, %v2643_v16, %v6781_v31  ;;  %3473 = vmatpush1.msra.mxu1 %v2797_v54  ;;  %vm8271_vm11 = vmmov %vm8269_vm1 }
 0x41f   :  { %v2673_v24 = vmul.f32 %v6861_v59, %v8262_v52  ;;  %3272 = vrot.lane.b32.xlu0 %v6556_v53, %s3931_s11  ;;  %2859 = vrot.lane.b32.xlu1 %v6643_v23, %s3926_s26 }
 0x421   :  { %v6869_v9 = vpop.permute.xlu0 %2607  ;;  %v2729_v18 = vpop.permute.xlu1 %2728  ;;  %3407 = vmatprep.subr.mxu0 %v2673_v24 }
 0x422   :  { %v6873_v33 = vsel %vm356_vm6, %v6705_v6, %v2729_v18  ;;  %v6877_v54 = vsel %vm356_vm6, %v2729_v18, %v6793_v41 }
 0x423   :  { %v2756_v52 = vmul.f32 %v6873_v33, %v8263_v50  ;;  %v2757_v14 = vmul.f32 %v6877_v54, %v8264_v21  ;;  %3231 = vrot.lane.b32.xlu0 %v6556_v53, %s3933_s13  ;;  %2818 = vrot.lane.b32.xlu1 %v6643_v23, %s3925_s25  ;;  %v8268_v50 = vld [vmem:[#allocation178_spill] sm:$0xff]  ;;  %v6903_v21 = vsel %vm8269_vm1, %v6841_v10, %v2602_v35  ;;  %vm8282_vm1 = vmmov %vm8266_vm9 }
 0x424   :  { %8270 = vst [vmem:[#allocation67_spill] sm:$0xff] %v6903_v21 }
 0x425   :  { %v6887_v24 = vpop.permute.xlu0 %2896  ;;  %3474 = vmatprep.subr.mxu1 %v2757_v14  ;;  %v6889_v6 = vpop.permute.xlu1 %2639 }
 0x426   :  { %8265 = vst [vmem:[#allocation98_spill] sm:$0xff] %v6889_v6  ;;  %v6893_v18 = vsel %vm8266_vm9, %v6889_v6, %v2643_v16  ;;  %3475 = vmatpush1.msra.mxu1 %v2756_v52  ;;  %v8272_v52 = vld [vmem:[#allocation85_spill] sm:$0xff] }
 0x427   :  { %8267 = vst [vmem:[#allocation195_spill] sm:$0xff] %v6893_v18  ;;  %v2672_v32 = vmul.f32 %v6893_v18, %v8268_v50  ;;  %3276 = vrot.lane.b32.xlu0 %v6306_v38, %s3931_s11  ;;  %2777 = vrot.lane.b32.xlu1 %v6643_v23, %s3922_s18  ;;  %v8273_v18 = vld [vmem:[#allocation183_spill] sm:$0xff] }
 0x428   :  { %v2631_v6 = vmul.f32 %v6903_v21, %v8273_v18  ;;  %v8276_v18 = vld [vmem:[#allocation17_spill] sm:$0xff] }
 0x429   :  { %v6905_v14 = vpop.permute.xlu0 %2814  ;;  %v2604_v3 = vpop.permute.xlu1 %2603  ;;  %3408 = vmatpush1.msra.mxu0 %v2672_v32  ;;  %v8274_v32 = vld [vmem:[#allocation13_spill] sm:$0xff]  ;;  %v3360_v21 = vmul.f32 %v6721_v29, %v8276_v18  ;;  %v8286_v18 = vld [vmem:[#allocation36_spill] sm:$0xff] }
 0x42a   :  { %v6908_v16 = vsel %vm8271_vm11, %v2602_v35, %v2604_v3  ;;  %v3368_v35 = vmul.f32 %v6690_v2, %v8274_v32  ;;  %v2715_v2 = vmul.f32 %v2698_v42, %v8279_v17 }
 0x42b   :  { %v2632_v50 = vmul.f32 %v6908_v16, %v8272_v52  ;;  %2736 = vrot.lane.b32.xlu1 %v6643_v23, %s3927_s27 }
 0x42d   :  { %v6917_v10 = vpop.permute.xlu0 %2732  ;;  %v6919_v57 = vpop.permute.xlu1 %2689  ;;  %3409 = vmatprep.subr.mxu0 %v2632_v50  ;;  %v3359_v50 = vmul.f32 %v6633_v39, %v8278_v60  ;;  %v8284_v39 = vld [vmem:[#allocation59_spill] sm:$0xff] }
 0x42e   :  { %v6927_v52 = vsel %vm282_vm7, %v2688_v44, %v6919_v57  ;;  %3410 = vmatpush1.msra.mxu0 %v2631_v6  ;;  %v8280_v44 = vld [vmem:[#allocation22_spill] sm:$0xff]  ;;  %v8281_v6 = vld [vmem:[#allocation28_spill] sm:$0xff] }
 0x42f   :  { %v2716_v43 = vmul.f32 %v6927_v52, %v8277_v5  ;;  %3421 = vmatprep.subr.mxu0 %v3368_v35  ;;  %2695 = vrot.lane.b32.xlu1 %v6643_v23, %s3929_s9  ;;  %v3352_v29 = vmul.f32 %v6763_v46, %v8280_v44  ;;  %v3351_v32 = vmul.f32 %v6674_v56, %v8281_v6  ;;  %v8285_v35 = vld [vmem:[#allocation102_spill] sm:$0xff] }
 0x430   :  { %3422 = vmatpush2.msra.mxu0 %v3367_v40  ;;  %v8283_v40 = vld [vmem:[#allocation31_spill] sm:$0xff]  ;;  %v3343_v56 = vmul.f32 %v6709_v12, %v8286_v18 }
 0x431   :  { %v6938_v22 = vpop.permute.xlu0 %2650  ;;  %3476 = vmatprep.subr.mxu1 %v2716_v43  ;;  %v2647_v25 = vpop.permute.xlu1 %2646  ;;  %3423 = vmatprep.subr.mxu0 %v3360_v21  ;;  %v3344_v43 = vmul.f32 %v6797_v4, %v8283_v40  ;;  %v8292_v40 = vld [vmem:[#allocation109_spill] sm:$0xff] }
 0x432   :  { %v2657_v60 = vsel %vm8266_vm9, %v6781_v31, %v2647_v25  ;;  %v6948_v17 = vsel %vm8282_vm1, %v2647_v25, %v6857_v20  ;;  %3424 = vmatpush2.msra.mxu0 %v3359_v50  ;;  %3477 = vmatpush1.msra.mxu1 %v2715_v2  ;;  %v8287_v31 = vld [vmem:[#allocation34_spill] sm:$0xff]  ;;  %v8288_v2 = vld [vmem:[#allocation40_spill] sm:$0xff]  ;;  %vm8289_vm9 = vmmov %vm8271_vm11 }
 0x433   :  { %v2674_v21 = vmul.f32 %v2657_v60, %v8284_v39  ;;  %v2675_v46 = vmul.f32 %v6948_v17, %v8285_v35  ;;  %3425 = vmatprep.subr.mxu0 %v3352_v29  ;;  %2613 = vrot.lane.b32.xlu1 %v6643_v23, %s3930_s10  ;;  %v3336_v5 = vmul.f32 %v6839_v58, %v8287_v31  ;;  %v8290_v29 = vld [vmem:[#allocation48_spill] sm:$0xff] }
 0x434   :  { %3426 = vmatpush2.msra.mxu0 %v3351_v32  ;;  %v3335_v25 = vmul.f32 %v6752_v62, %v8288_v2  ;;  %v3328_v6 = vmul.f32 %v6873_v33, %v8290_v29  ;;  %v8291_v58 = vld [vmem:[#allocation68_spill] sm:$0xff]  ;;  %v8295_v33 = vld [vmem:[#allocation66_spill] sm:$0xff]  ;;  %v8298_v2 = vld [vmem:[#allocation43_spill] sm:$0xff] }
 0x435   :  { %v6961_v50 = vpop.permute.xlu0 %3266  ;;  %3478 = vmatprep.subr.mxu1 %v2675_v46  ;;  %v2606_v4 = vpop.permute.xlu1 %2605  ;;  %3427 = vmatprep.subr.mxu0 %v3344_v43  ;;  %v8293_v43 = vld [vmem:[#allocation58_spill] sm:$0xff]  ;;  %v3319_v18 = vmul.f32 %v6828_v8, %v8295_v33  ;;  %v3369_v8 = vmul.f32 %v6695_v55, %v8298_v2  ;;  %v8306_v33 = vld [vmem:[#allocation73_spill] sm:$0xff] }
 0x436   :  { %v2616_v44 = vsel %vm8271_vm11, %v2604_v3, %v2606_v4  ;;  %v6968_v12 = vsel %vm8289_vm9, %v2606_v4, %v6869_v9  ;;  %3428 = vmatpush2.msra.mxu0 %v3343_v56  ;;  %3479 = vmatpush1.msra.mxu1 %v2674_v21  ;;  %v3327_v62 = vmul.f32 %v6785_v28, %v8293_v43  ;;  %v8294_v3 = vld [vmem:[#allocation50_spill] sm:$0xff]  ;;  %vm8314_vm11 = vmmov %vm8289_vm9  ;;  %vm8316_vm9 = vcmask 973824  }
 0x437   :  { %v2633_v32 = vmul.f32 %v2616_v44, %v8291_v58  ;;  %v2634_v39 = vmul.f32 %v6968_v12, %v8292_v40  ;;  %3429 = vmatprep.subr.mxu0 %v3336_v5  ;;  %3274 = vrot.lane.b32.xlu1 %v6643_v23, %s3931_s11  ;;  %v3320_v35 = vmul.f32 %v2698_v42, %v8294_v3  ;;  %v8296_v42 = vld [vmem:[#allocation64_spill] sm:$0xff]  ;;  %v8297_v5 = vld [vmem:[#allocation42_spill] sm:$0xff] }
 0x438   :  { %3430 = vmatpush2.msra.mxu0 %v3335_v25  ;;  %v6989_v56 = vsel %vm652_vm2, %v6641_v15, %v6887_v24  ;;  %v3312_v31 = vmul.f32 %v2657_v60, %v8296_v42  ;;  %v8299_v25 = vld [vmem:[#allocation82_spill] sm:$0xff]  ;;  %v8307_v42 = vld [vmem:[#allocation72_spill] sm:$0xff] }
 0x439   :  { %v6980_v46 = vpop.permute.xlu0 %2609  ;;  %3480 = vmatprep.subr.mxu1 %v2634_v39  ;;  %v6982_v21 = vpop.permute.xlu1 %2937  ;;  %3431 = vmatprep.subr.mxu0 %v3328_v6  ;;  %v3311_v15 = vmul.f32 %v6861_v59, %v8299_v25  ;;  %v8301_v6 = vld [vmem:[#allocation70_spill] sm:$0xff]  ;;  %v8303_v39 = vld [vmem:[#allocation53_spill] sm:$0xff] }
 0x43a   :  { %v6994_v28 = vsel %vm726_vm0, %v6686_v61, %v6982_v21  ;;  %3432 = vmatpush2.msra.mxu0 %v3327_v62  ;;  %3481 = vmatpush1.msra.mxu1 %v2633_v32  ;;  %v8300_v61 = vld [vmem:[#allocation54_spill] sm:$0xff]  ;;  %v3304_v58 = vmul.f32 %v2616_v44, %v8301_v6  ;;  %v3361_v43 = vmul.f32 %v6725_v45, %v8303_v39  ;;  %v8304_v62 = vld [vmem:[#allocation63_spill] sm:$0xff]  ;;  %v8312_v6 = vld [vmem:[#allocation96_spill] sm:$0xff] }
 0x43b   :  { %v3370_v4 = vmul.f32 %v6994_v28, %v8297_v5  ;;  %3433 = vmatprep.subr.mxu0 %v3320_v35  ;;  %3233 = vrot.lane.b32.xlu1 %v6643_v23, %s3933_s13  ;;  %v3362_v29 = vmul.f32 %v6989_v56, %v8300_v61  ;;  %v8302_v40 = vld [vmem:[#allocation86_spill] sm:$0xff]  ;;  %v7024_v44 = vsel %vm504_vm4, %v6717_v27, %v6905_v14  ;;  %v8308_v5 = vld [vmem:[#allocation79_spill] sm:$0xff]  ;;  %v8311_v61 = vld [vmem:[#allocation89_spill] sm:$0xff] }
 0x43c   :  { %3434 = vmatpush2.msra.mxu0 %v3319_v18  ;;  %v3303_v55 = vmul.f32 %v6908_v16, %v8302_v40  ;;  %v3346_v27 = vmul.f32 %v7024_v44, %v8306_v33  ;;  %v8309_v2 = vld [vmem:[#allocation78_spill] sm:$0xff]  ;;  %v8313_v40 = vld [vmem:[#allocation95_spill] sm:$0xff] }
 0x43d   :  { %v7008_v60 = vpop.permute.xlu0 %3225  ;;  %3492 = vmatprep.subr.mxu1 %v3370_v4  ;;  %v7010_v32 = vpop.permute.xlu1 %2855  ;;  %3435 = vmatprep.subr.mxu0 %v3312_v31  ;;  %v3345_v31 = vmul.f32 %v6801_v51, %v8307_v42  ;;  %v8319_v33 = vld [vmem:[#allocation114_spill] sm:$0xff] }
 0x43e   :  { %v7017_v59 = vsel %vm578_vm3, %v6767_v26, %v7010_v32  ;;  %3436 = vmatpush2.msra.mxu0 %v3311_v15  ;;  %3493 = vmatpush2.msra.mxu1 %v3369_v8  ;;  %v8305_v26 = vld [vmem:[#allocation62_spill] sm:$0xff]  ;;  %v3337_v8 = vmul.f32 %v6847_v1, %v8309_v2  ;;  %v7066_v1 = vsel %vm8282_vm1, %v6857_v20, %v6938_v22  ;;  %vm8321_vm1 = vmmov %vm8316_vm9 }
 0x43f   :  { %v3354_v3 = vmul.f32 %v7017_v59, %v8304_v62  ;;  %3437 = vmatprep.subr.mxu0 %v3304_v58  ;;  %3494 = vmatprep.subr.mxu1 %v3362_v29  ;;  %v3353_v16 = vmul.f32 %v6771_v37, %v8305_v26  ;;  %v7046_v37 = vsel %vm356_vm6, %v6793_v41, %v6917_v10  ;;  %v8310_v15 = vld [vmem:[#allocation90_spill] sm:$0xff] }
 0x440   :  { %3235 = vrot.lane.b32.xlu1 %v6306_v38, %s3933_s13  ;;  %3438 = vmatpush2.msra.mxu0 %v3303_v55  ;;  %v3330_v51 = vmul.f32 %v7046_v37, %v8310_v15  ;;  %v3329_v29 = vmul.f32 %v6877_v54, %v8311_v61  ;;  %v3321_v55 = vmul.f32 %v6927_v52, %v8313_v40  ;;  %v8324_v61 = vld [vmem:[#allocation101_spill] sm:$0xff]  ;;  %v8326_v40 = vld [vmem:[#allocation107_spill] sm:$0xff] }
 0x441   :  { %3495 = vmatpush2.msra.mxu1 %v3361_v43  ;;  %v3191_v35 = vpop.permute.xlu0 %3190  ;;  %v7032_v45 = vpop.permute.xlu1 %2773  ;;  %v8315_v43 = vld [vmem:[#allocation106_spill] sm:$0xff] }
 0x442   :  { %3496 = vmatprep.subr.mxu1 %v3354_v3  ;;  %v7039_v18 = vsel %vm430_vm5, %v6843_v34, %v7032_v45  ;;  %v3314_v20 = vmul.f32 %v7066_v1, %v8315_v43  ;;  %v8317_v3 = vld [vmem:[#allocation104_spill] sm:$0xff]  ;;  %v3200_v43 = vsel %vm1209_vm12, %v6465_v0, %v3191_v35 }
 0x443   :  { %v3338_v4 = vmul.f32 %v7039_v18, %v8308_v5  ;;  %3497 = vmatpush2.msra.mxu1 %v3353_v16  ;;  %v3313_v26 = vmul.f32 %v6948_v17, %v8317_v3  ;;  %v8318_v16 = vld [vmem:[#allocation97_spill] sm:$0xff]  ;;  %v8322_v17 = vld [vmem:[#allocation100_spill] sm:$0xff] }
 0x444   :  { %3498 = vmatprep.subr.mxu1 %v3346_v27  ;;  %v8320_v27 = vld [vmem:[#allocation113_spill] sm:$0xff] }
 0x445   :  { %3499 = vmatpush2.msra.mxu1 %v3345_v31  ;;  %v3269_v25 = vpop.permute.xlu0 %3268  ;;  %v7052_v34 = vpop.permute.xlu1 %2691  ;;  %v3305_v42 = vmul.f32 %v6968_v12, %v8320_v27 }
 0x446   :  { %3500 = vmatprep.subr.mxu1 %v3338_v4  ;;  %v7059_v41 = vsel %vm282_vm7, %v6919_v57, %v7052_v34  ;;  %v7075_v57 = vsel %vm8314_vm11, %v6869_v9, %v6980_v46  ;;  %vm8323_vm11 = vcmask 982016  }
 0x447   :  { %v3322_v58 = vmul.f32 %v7059_v41, %v8312_v6  ;;  %3501 = vmatpush2.msra.mxu1 %v3337_v8  ;;  %v3306_v9 = vmul.f32 %v7075_v57, %v8319_v33 }
 0x448   :  { %3502 = vmatprep.subr.mxu1 %v3330_v51 }
 0x449   :  { %3503 = vmatpush2.msra.mxu1 %v3329_v29  ;;  %v3150_v54 = vpop.permute.xlu0 %3149  ;;  %v3265_v39 = vpop.permute.xlu1 %3264 }
 0x44a   :  { %3504 = vmatprep.subr.mxu1 %v3322_v58  ;;  %v3279_v62 = vsel %vm8316_vm9, %v3265_v39, %v6961_v50  ;;  %vm8325_vm9 = vmmov %vm8323_vm11 }
 0x44b   :  { %v3296_v52 = vmul.f32 %v3279_v62, %v8318_v16  ;;  %3505 = vmatpush2.msra.mxu1 %v3321_v55 }
 0x44c   :  { %3506 = vmatprep.subr.mxu1 %v3314_v20 }
 0x44d   :  { %3507 = vmatpush2.msra.mxu1 %v3313_v26  ;;  %v3228_v31 = vpop.permute.xlu0 %3227  ;;  %v7088_v5 = vpop.permute.xlu1 %3262  ;;  %3439 = vmatprep.subr.mxu0 %v3296_v52  ;;  %v8327_v26 = vld [vmem:[#allocation14_spill] sm:$0xff] }
 0x44e   :  { %3508 = vmatprep.subr.mxu1 %v3306_v9  ;;  %v3278_v4 = vsel %vm8321_vm1, %v7088_v5, %v3265_v39  ;;  %v7103_v39 = vld [vmem:[#allocation5] sm:$0xff]  ;;  %v3280_v9 = vsel %vm8321_vm1, %v6961_v50, %v3269_v25 }
 0x44f   :  { %v3295_v2 = vmul.f32 %v3278_v4, %v8322_v17  ;;  %3509 = vmatpush2.msra.mxu1 %v3305_v42  ;;  %v8328_v52 = vld [vmem:[#allocation46_spill] sm:$0xff]  ;;  %v8330_v42 = vld [vmem:[#allocation125_spill] sm:$0xff] }
 0x450   :  { %v3217_v33 = vmul.f32 %v3200_v43, %v8328_v52  ;;  %v8331_v17 = vld [vmem:[#allocation126_spill] sm:$0xff] }
 0x451   :  { %v3195_v8 = vpop.permute.xlu0 %3194  ;;  %v3224_v15 = vpop.permute.xlu1 %3223  ;;  %3440 = vmatpush2.msra.mxu0 %v3295_v2  ;;  %v3297_v2 = vmul.f32 %v3280_v9, %v8331_v17  ;;  %v8336_v52 = vld [vmem:[#allocation234_spill] sm:$0xff] }
 0x452   :  { %v3238_v51 = vsel %vm8323_vm11, %v3224_v15, %v7008_v60  ;;  %vm8329_vm11 = vmmov %vm8321_vm1  ;;  %v8337_v9 = vld [vmem:[#allocation130_spill] sm:$0xff] }
 0x453   :  { %v3255_v12 = vmul.f32 %v3238_v51, %v8324_v61  ;;  %vm8335_vm1 = vmmov %vm8325_vm9 }
 0x455   :  { %v7096_v29 = vpop.permute.xlu0 %3103  ;;  %v7098_v6 = vpop.permute.xlu1 %3221  ;;  %3441 = vmatprep.subr.mxu0 %v3255_v12  ;;  %v8332_v12 = vld [vmem:[#allocation232_spill] sm:$0xff] }
 0x456   :  { %v3237_v58 = vsel %vm8325_vm9, %v7098_v6, %v3224_v15  ;;  %v3159_v15 = vsel %vm1135_vm13, %v6491_v49, %v3150_v54 }
 0x457   :  { %v3254_v55 = vmul.f32 %v3237_v58, %v8326_v40  ;;  %v8333_v40 = vld [vmem:[#allocation18_spill] sm:$0xff] }
 0x459   :  { %v7107_v20 = vpop.permute.xlu0 %3060  ;;  %v3193_v62 = vpop.permute.xlu1 %3192  ;;  %3442 = vmatpush2.msra.mxu0 %v3254_v55  ;;  %v3176_v55 = vmul.f32 %v3159_v15, %v8333_v40  ;;  %v8341_v40 = vld [vmem:[#allocation167_spill] sm:$0xff] }
 0x45a   :  { %v3201_v3 = vsel %vm1209_vm12, %v3191_v35, %v3193_v62  ;;  %3444 = vmatmul.mubr.f32.vlgmr.msra.gmra.mxu0 %v7103_v39 }
 0x45b   :  { %v3218_v16 = vmul.f32 %v3201_v3, %v8327_v26  ;;  %3790 = vmatprep.mubr.msk.f32.mxu0 %vm3375_vm8, %v6603_v7  ;;  %v8334_v26 = vld [vmem:[#allocation236_spill] sm:$0xff] }
 0x45c   :  { %v3136_v49 = vmul.f32 %v6556_v53, %v8334_v26  ;;  %v8342_v26 = vld [vmem:[#allocation121_spill] sm:$0xff] }
 0x45d   :  { %v7117_v27 = vpop.permute.xlu0 %3019  ;;  %v7119_v0 = vpop.permute.xlu1 %3270  ;;  %3521 = vmatprep.subr.mxu0 %v3218_v16  ;;  %v3212_v16 = vsel %vm1209_vm12, %v3195_v8, %v6426_v11 }
 0x45e   :  { %v3281_v35 = vsel %vm8329_vm11, %v3269_v25, %v7119_v0  ;;  %3522 = vmatpush1.msra.mxu0 %v3217_v33  ;;  %v3239_v25 = vsel %vm8325_vm9, %v7008_v60, %v3228_v31  ;;  %v3135_v33 = vmul.f32 %v6322_v48, %v8336_v52  ;;  %v3220_v53 = vmul.f32 %v3212_v16, %v5979_v13 }
 0x45f   :  { %v3298_v4 = vmul.f32 %v3281_v35, %v8330_v42  ;;  %v8338_v35 = vld [vmem:[#allocation129_spill] sm:$0xff] }
 0x460   :  { %v3256_v42 = vmul.f32 %v3239_v25, %v8338_v35 }
 0x461   :  { %v3106_v51 = vpop.permute.xlu0 %3105  ;;  %3510 = vmatprep.subr.mxu1 %v3298_v4  ;;  %v3152_v61 = vpop.permute.xlu1 %3151  ;;  %v3202_v4 = vsel %vm1209_vm12, %v3193_v62, %v3195_v8  ;;  %v8339_v8 = vld [vmem:[#allocation242_spill] sm:$0xff]  ;;  %vm8350_vm12 = vcmask 64512  }
 0x462   :  { %v3160_v50 = vsel %vm1135_vm13, %v3150_v54, %v3152_v61  ;;  %3511 = vmatpush2.msra.mxu1 %v3297_v2 }
 0x463   :  { %v3177_v58 = vmul.f32 %v3160_v50, %v8332_v12  ;;  %v8340_v12 = vld [vmem:[#allocation249_spill] sm:$0xff] }
 0x465   :  { %v7132_v43 = vpop.permute.xlu0 %2980  ;;  %v7134_v3 = vpop.permute.xlu1 %3229  ;;  %3523 = vmatprep.subr.mxu0 %v3177_v58 }
 0x466   :  { %v3240_v54 = vsel %vm8335_vm1, %v3228_v31, %v7134_v3  ;;  %3524 = vmatpush1.msra.mxu0 %v3176_v55  ;;  %v3219_v31 = vmul.f32 %v3202_v4, %v5975_v19  ;;  %v3113_v55 = vsel %vm1022_vm14, %v3106_v51, %v8341_v40 }
 0x467   :  { %v3257_v60 = vmul.f32 %v3240_v54, %v8337_v9  ;;  %3525 = vmatprep.subr.mxu0 %v3136_v49  ;;  %v8344_v54 = vld [vmem:[#allocation244_spill] sm:$0xff] }
 0x468   :  { %3526 = vmatpush1.msra.mxu0 %v3135_v33  ;;  %v3137_v52 = vmul.f32 %v6643_v23, %v8344_v54  ;;  %v8345_v33 = vld [vmem:[#allocation24_spill] sm:$0xff] }
 0x469   :  { %v7148_v17 = vpop.permute.xlu0 %2939  ;;  %3512 = vmatprep.subr.mxu1 %v3257_v60  ;;  %v3102_v11 = vpop.permute.xlu1 %3101  ;;  %v3130_v9 = vmul.f32 %v3113_v55, %v8345_v33  ;;  %v8346_v60 = vld [vmem:[#allocation240_spill] sm:$0xff]  ;;  %v8360_v33 = vld [vmem:[#allocation119_spill] sm:$0xff] }
 0x46a   :  { %3513 = vmatpush2.msra.mxu1 %v3256_v42  ;;  %v3110_v48 = vsel %vm1022_vm14, %v6542_v36, %v3102_v11  ;;  %v3111_v2 = vsel %vm1022_vm14, %v3102_v11, %v7096_v29  ;;  %v8347_v42 = vld [vmem:[#allocation80_spill] sm:$0xff] }
 0x46b   :  { %3592 = vmatprep.subr.mxu1 %v3220_v53  ;;  %v3127_v15 = vmul.f32 %v3110_v48, %v5967_v30  ;;  %v3128_v62 = vmul.f32 %v3111_v2, %v8339_v8  ;;  %3515 = vmatmul.mubr.f32.vlgmr.msra.gmra.mxu1 %v7103_v39  ;;  %v8353_v2 = vld [vmem:[#allocation247_spill] sm:$0xff] }
 0x46c   :  { %3593 = vmatpush1.msra.mxu1 %v3219_v31  ;;  %3791 = vmatprep.mubr.msk.f32.mxu1 %vm3375_vm8, %v6603_v7  ;;  %v3069_v7 = vsel %vm948_vm15, %v8342_v26, %v7107_v20  ;;  %v8352_v31 = vld [vmem:[#allocation250_spill] sm:$0xff]  ;;  %vm8384_vm8 = vcmask 596992  }
 0x46d   :  { %v7158_v13 = vpop.permute.xlu0 %2898  ;;  %v3154_v19 = vpop.permute.xlu1 %3153  ;;  %3527 = vmatprep.subr.mxu0 %v3128_v62  ;;  %v3086_v4 = vmul.f32 %v3069_v7, %v8347_v42  ;;  %v8362_v42 = vld [vmem:[#allocation88_spill] sm:$0xff] }
 0x46e   :  { %v3161_v36 = vsel %vm1135_vm13, %v3152_v61, %v3154_v19  ;;  %v3171_v50 = vsel %vm1135_vm13, %v3154_v19, %v6451_v47  ;;  %3528 = vmatpush1.msra.mxu0 %v3127_v15  ;;  %v3112_v61 = vsel %vm1022_vm14, %v7096_v29, %v3106_v51  ;;  %v8343_v47 = vld [vmem:[#allocation241_spill] sm:$0xff]  ;;  %v8348_v29 = vld [vmem:[#allocation155_spill] sm:$0xff]  ;;  %vm8351_vm13 = vmmov %vm8350_vm12  ;;  %v7200_v19 = vsel %vm726_vm0, %v6982_v21, %v7148_v17 }
 0x46f   :  { %v3178_v30 = vmul.f32 %v3161_v36, %v6018_v63  ;;  %v3179_v58 = vmul.f32 %v3171_v50, %v8340_v12  ;;  %v3138_v16 = vmul.f32 %v6306_v38, %v8343_v47  ;;  %v3129_v51 = vmul.f32 %v3112_v61, %v8348_v29  ;;  %v8349_v38 = vld [vmem:[#allocation207_spill] sm:$0xff]  ;;  %v8354_v36 = vld [vmem:[#allocation148_spill] sm:$0xff]  ;;  %v8358_v47 = vld [vmem:[#allocation226_spill] sm:$0xff] }
 0x470   :  { %v7211_v55 = vsel %vm652_vm2, %v6887_v24, %v7158_v13  ;;  %v8357_v21 = vld [vmem:[#allocation231_spill] sm:$0xff]  ;;  %vm8367_vm14 = vmmov %vm8350_vm12 }
 0x471   :  { %v7169_v25 = vpop.permute.xlu0 %2857  ;;  %3594 = vmatprep.subr.mxu1 %v3179_v58  ;;  %v3063_v49 = vpop.permute.xlu1 %3062  ;;  %v8356_v58 = vld [vmem:[#allocation248_spill] sm:$0xff]  ;;  %v2964_v7 = vmul.f32 %v7200_v19, %v8357_v21 }
 0x472   :  { %v3070_v63 = vsel %vm948_vm15, %v7107_v20, %v3063_v49  ;;  %3595 = vmatpush1.msra.mxu1 %v3178_v30  ;;  %v3028_v20 = vsel %vm8350_vm12, %v8349_v38, %v7117_v27  ;;  %v8355_v30 = vld [vmem:[#allocation243_spill] sm:$0xff] }
 0x473   :  { %v3087_v35 = vmul.f32 %v3070_v63, %v8346_v60  ;;  %3596 = vmatprep.subr.mxu1 %v3138_v16  ;;  %v3045_v15 = vmul.f32 %v3028_v20, %v8353_v2  ;;  %v2963_v16 = vmul.f32 %v6994_v28, %v8358_v47  ;;  %v7222_v63 = vsel %vm578_vm3, %v7010_v32, %v7169_v25  ;;  %v8361_v28 = vld [vmem:[#allocation37_spill] sm:$0xff]  ;;  %v8363_v32 = vld [vmem:[#allocation52_spill] sm:$0xff] }
 0x474   :  { %3597 = vmatpush1.msra.mxu1 %v3137_v52  ;;  %v8359_v52 = vld [vmem:[#allocation134_spill] sm:$0xff]  ;;  %v8365_v20 = vld [vmem:[#allocation132_spill] sm:$0xff] }
 0x475   :  { %v7186_v53 = vpop.permute.xlu0 %2816  ;;  %3598 = vmatprep.subr.mxu1 %v3130_v9  ;;  %v3022_v11 = vpop.permute.xlu1 %3021  ;;  %3529 = vmatprep.subr.mxu0 %v3087_v35  ;;  %v2923_v9 = vmul.f32 %v7211_v55, %v8360_v33 }
 0x476   :  { %v3029_v23 = vsel %vm8351_vm13, %v7117_v27, %v3022_v11  ;;  %3530 = vmatpush1.msra.mxu0 %v3086_v4  ;;  %3599 = vmatpush1.msra.mxu1 %v3129_v51  ;;  %v7232_v60 = vsel %vm504_vm4, %v6905_v14, %v7186_v53  ;;  %v8364_v51 = vld [vmem:[#allocation61_spill] sm:$0xff] }
 0x477   :  { %v3046_v48 = vmul.f32 %v3029_v23, %v8352_v31  ;;  %v2881_v38 = vmul.f32 %v7017_v59, %v8364_v51  ;;  %v2882_v23 = vmul.f32 %v7222_v63, %v8365_v20  ;;  %v8366_v31 = vld [vmem:[#allocation26_spill] sm:$0xff]  ;;  %v8382_v51 = vld [vmem:[#allocation131_spill] sm:$0xff] }
 0x479   :  { %v7195_v8 = vpop.permute.xlu0 %2775  ;;  %v2979_v62 = vpop.permute.xlu1 %2978  ;;  %3531 = vmatprep.subr.mxu0 %v3046_v48  ;;  %v2841_v48 = vmul.f32 %v7232_v60, %v8366_v31  ;;  %v8386_v31 = vld [vmem:[#allocation230_spill] sm:$0xff] }
 0x47a   :  { %v2987_v50 = vsel %vm800_vm10, %v8354_v36, %v2979_v62  ;;  %v2988_v27 = vsel %vm800_vm10, %v2979_v62, %v7132_v43  ;;  %3532 = vmatpush1.msra.mxu0 %v3045_v15  ;;  %v7249_v2 = vsel %vm430_vm5, %v7032_v45, %v7195_v8  ;;  %v8368_v15 = vld [vmem:[#allocation44_spill] sm:$0xff]  ;;  %v8370_v36 = vld [vmem:[#allocation145_spill] sm:$0xff] }
 0x47b   :  { %v3004_v12 = vmul.f32 %v2987_v50, %v8355_v30  ;;  %v3005_v40 = vmul.f32 %v2988_v27, %v8356_v58  ;;  %v8371_v27 = vld [vmem:[#allocation251_spill] sm:$0xff]  ;;  %v8373_v58 = vld [vmem:[#allocation32_spill] sm:$0xff] }
 0x47d   :  { %v7213_v26 = vpop.permute.xlu0 %2734  ;;  %v3065_v61 = vpop.permute.xlu1 %3064  ;;  %3533 = vmatprep.subr.mxu0 %v3005_v40  ;;  %v2800_v40 = vmul.f32 %v7249_v2, %v8373_v58 }
 0x47e   :  { %v3071_v54 = vsel %vm948_vm15, %v3063_v49, %v3065_v61  ;;  %v3072_v24 = vsel %vm948_vm15, %v3065_v61, %v8359_v52  ;;  %3534 = vmatpush1.msra.mxu0 %v3004_v12  ;;  %v2922_v49 = vmul.f32 %v6989_v56, %v8363_v32  ;;  %vm8369_vm15 = vmmov %vm8350_vm12  ;;  %v7257_v59 = vsel %vm356_vm6, %v6917_v10, %v7213_v26  ;;  %v8372_v12 = vld [vmem:[#allocation74_spill] sm:$0xff]  ;;  %v8374_v10 = vld [vmem:[#allocation77_spill] sm:$0xff] }
 0x47f   :  { %v3088_v35 = vmul.f32 %v3071_v54, %v8361_v28  ;;  %v3089_v4 = vmul.f32 %v3072_v24, %v8362_v42  ;;  %3535 = vmatprep.subr.mxu0 %v2964_v7  ;;  %v2840_v45 = vmul.f32 %v7024_v44, %v8372_v12  ;;  %v2799_v7 = vmul.f32 %v7039_v18, %v8374_v10  ;;  %v8375_v61 = vld [vmem:[#allocation233_spill] sm:$0xff]  ;;  %v8376_v54 = vld [vmem:[#allocation143_spill] sm:$0xff]  ;;  %v8377_v24 = vld [vmem:[#allocation252_spill] sm:$0xff] }
 0x480   :  { %3536 = vmatpush1.msra.mxu0 %v2963_v16  ;;  %v2759_v47 = vmul.f32 %v7257_v59, %v8375_v61  ;;  %v8379_v18 = vld [vmem:[#allocation91_spill] sm:$0xff]  ;;  %v8391_v12 = vld [vmem:[#allocation84_spill] sm:$0xff]  ;;  %v8394_v10 = vld [vmem:[#allocation38_spill] sm:$0xff] }
 0x481   :  { %v7238_v29 = vpop.permute.xlu0 %2693  ;;  %3600 = vmatprep.subr.mxu1 %v3089_v4  ;;  %v3024_v14 = vpop.permute.xlu1 %3023  ;;  %3537 = vmatprep.subr.mxu0 %v2923_v9  ;;  %v8378_v9 = vld [vmem:[#allocation253_spill] sm:$0xff]  ;;  %v8381_v4 = vld [vmem:[#allocation239_spill] sm:$0xff]  ;;  %v8395_v61 = vld [vmem:[#allocation192_spill] sm:$0xff] }
 0x482   :  { %v3030_v56 = vsel %vm8367_vm14, %v3022_v11, %v3024_v14  ;;  %v3031_v62 = vsel %vm8369_vm15, %v3024_v14, %v8368_v15  ;;  %3538 = vmatpush1.msra.mxu0 %v2922_v49  ;;  %3601 = vmatpush1.msra.mxu1 %v3088_v35  ;;  %v7278_v52 = vsel %vm282_vm7, %v7052_v34, %v7238_v29  ;;  %v8388_v15 = vld [vmem:[#allocation103_spill] sm:$0xff] }
 0x483   :  { %v3047_v50 = vmul.f32 %v3030_v56, %v8370_v36  ;;  %v3048_v30 = vmul.f32 %v3031_v62, %v8371_v27  ;;  %3539 = vmatprep.subr.mxu0 %v2882_v23  ;;  %v2758_v35 = vmul.f32 %v7046_v37, %v8379_v18  ;;  %v2718_v32 = vmul.f32 %v7278_v52, %v8381_v4  ;;  %v8385_v23 = vld [vmem:[#allocation127_spill] sm:$0xff]  ;;  %v8389_v36 = vld [vmem:[#allocation124_spill] sm:$0xff] }
 0x484   :  { %3540 = vmatpush1.msra.mxu0 %v2881_v38  ;;  %v8383_v38 = vld [vmem:[#allocation99_spill] sm:$0xff]  ;;  %v2676_v62 = vmul.f32 %v7066_v1, %v8388_v15  ;;  %v8392_v1 = vld [vmem:[#allocation193_spill] sm:$0xff] }
 0x485   :  { %v7263_v11 = vpop.permute.xlu0 %2652  ;;  %3602 = vmatprep.subr.mxu1 %v3048_v30  ;;  %v2983_v21 = vpop.permute.xlu1 %2982  ;;  %3541 = vmatprep.subr.mxu0 %v2841_v48  ;;  %v2717_v20 = vmul.f32 %v7059_v41, %v8383_v38 }
 0x486   :  { %v2989_v16 = vsel %vm800_vm10, %v7132_v43, %v2983_v21  ;;  %v2990_v44 = vsel %vm800_vm10, %v2983_v21, %v8376_v54  ;;  %3542 = vmatpush1.msra.mxu0 %v2840_v45  ;;  %3603 = vmatpush1.msra.mxu1 %v3047_v50  ;;  %vm8380_vm10 = vcmask 588800   ;;  %v8390_v50 = vld [vmem:[#allocation112_spill] sm:$0xff] }
 0x487   :  { %v3006_v33 = vmul.f32 %v2989_v16, %v8377_v24  ;;  %v3007_v28 = vmul.f32 %v2990_v44, %v8378_v9  ;;  %3543 = vmatprep.subr.mxu0 %v2800_v40  ;;  %v7289_v42 = vsel %vm8380_vm10, %v6938_v22, %v7263_v11  ;;  %v2635_v27 = vmul.f32 %v7075_v57, %v8390_v50  ;;  %v8393_v40 = vld [vmem:[#allocation188_spill] sm:$0xff]  ;;  %v8397_v44 = vld [vmem:[#allocation206_spill] sm:$0xff]  ;;  %v8410_v50 = vld [vmem:[#allocation209_spill] sm:$0xff] }
 0x488   :  { %3544 = vmatpush1.msra.mxu0 %v2799_v7  ;;  %v3371_v57 = vmul.f32 %v7200_v19, %v8395_v61 }
 0x489   :  { %v7284_v43 = vpop.permute.xlu0 %2611  ;;  %3604 = vmatprep.subr.mxu1 %v3007_v28  ;;  %v2942_v34 = vpop.permute.xlu1 %2941  ;;  %3545 = vmatprep.subr.mxu0 %v2759_v47  ;;  %v8399_v28 = vld [vmem:[#allocation202_spill] sm:$0xff] }
 0x48a   :  { %v2948_v49 = vsel %vm726_vm0, %v7148_v17, %v2942_v34  ;;  %v7297_v37 = vsel %vm726_vm0, %v2942_v34, %v8382_v51  ;;  %3546 = vmatpush1.msra.mxu0 %v2758_v35  ;;  %v7304_v22 = vsel %vm8384_vm8, %v6980_v46, %v7284_v43  ;;  %3605 = vmatpush1.msra.mxu1 %v3006_v33  ;;  %v8387_v17 = vld [vmem:[#allocation144_spill] sm:$0xff]  ;;  %v8398_v33 = vld [vmem:[#allocation57_spill] sm:$0xff]  ;;  %v8401_v34 = vld [vmem:[#allocation203_spill] sm:$0xff] }
 0x48b   :  { %v2965_v14 = vmul.f32 %v2948_v49, %v8385_v23  ;;  %v2966_v48 = vmul.f32 %v7297_v37, %v8386_v31  ;;  %v2677_v56 = vmul.f32 %v7289_v42, %v8387_v17  ;;  %3547 = vmatprep.subr.mxu0 %v2718_v32  ;;  %v2636_v46 = vmul.f32 %v7304_v22, %v8389_v36  ;;  %v8400_v35 = vld [vmem:[#allocation200_spill] sm:$0xff]  ;;  %v8402_v32 = vld [vmem:[#allocation93_spill] sm:$0xff]  ;;  %v8409_v36 = vld [vmem:[#allocation211_spill] sm:$0xff] }
 0x48c   :  { %3548 = vmatpush1.msra.mxu0 %v2717_v20  ;;  %v3372_v58 = vmul.f32 %v2948_v49, %v8392_v1  ;;  %v3363_v9 = vmul.f32 %v7211_v55, %v8398_v33  ;;  %v8403_v55 = vld [vmem:[#allocation181_spill] sm:$0xff]  ;;  %vm8418_vm0 = vmmov %vm8380_vm10 }
 0x48d   :  { %3606 = vmatprep.subr.mxu1 %v2966_v48  ;;  %v2901_v41 = vpop.permute.xlu1 %2900  ;;  %3549 = vmatprep.subr.mxu0 %v2677_v56  ;;  %v8404_v20 = vld [vmem:[#allocation197_spill] sm:$0xff]  ;;  %v8406_v48 = vld [vmem:[#allocation199_spill] sm:$0xff] }
 0x48e   :  { %v2907_v30 = vsel %vm652_vm2, %v7158_v13, %v2901_v41  ;;  %v7321_v45 = vsel %vm652_vm2, %v2901_v41, %v8391_v12  ;;  %3550 = vmatpush1.msra.mxu0 %v2676_v62  ;;  %3607 = vmatpush1.msra.mxu1 %v2965_v14  ;;  %v8396_v13 = vld [vmem:[#allocation189_spill] sm:$0xff]  ;;  %v8405_v14 = vld [vmem:[#allocation194_spill] sm:$0xff]  ;;  %v8408_v62 = vld [vmem:[#allocation19_spill] sm:$0xff] }
 0x48f   :  { %v2924_v21 = vmul.f32 %v2907_v30, %v8393_v40  ;;  %v2925_v7 = vmul.f32 %v7321_v45, %v8394_v10  ;;  %3551 = vmatprep.subr.mxu0 %v2636_v46  ;;  %v3364_v16 = vmul.f32 %v2907_v30, %v8396_v13  ;;  %v8411_v30 = vld [vmem:[#allocation213_spill] sm:$0xff]  ;;  %v8416_v13 = vld [vmem:[#allocation208_spill] sm:$0xff]  ;;  %vm8421_vm2 = vmmov %vm8418_vm0 }
 0x490   :  { %3552 = vmatpush1.msra.mxu0 %v2635_v27 }
 0x491   :  { %v2860_v47 = vpop.permute.xlu1 %2859  ;;  %3608 = vmatprep.subr.mxu1 %v2925_v7  ;;  %3563 = vmatprep.subr.mxu0 %v3372_v58  ;;  %v8414_v7 = vld [vmem:[#allocation235_spill] sm:$0xff] }
 0x492   :  { %v2866_v54 = vsel %vm578_vm3, %v7169_v25, %v2860_v47  ;;  %v7334_v24 = vsel %vm578_vm3, %v2860_v47, %v8397_v44  ;;  %3564 = vmatpush2.msra.mxu0 %v3371_v57  ;;  %3609 = vmatpush1.msra.mxu1 %v2924_v21  ;;  %v3355_v25 = vmul.f32 %v7222_v63, %v8402_v32  ;;  %v8407_v63 = vld [vmem:[#allocation198_spill] sm:$0xff]  ;;  %v8413_v21 = vld [vmem:[#allocation223_spill] sm:$0xff]  ;;  %v8415_v57 = vld [vmem:[#allocation41_spill] sm:$0xff] }
 0x493   :  { %v2883_v18 = vmul.f32 %v2866_v54, %v8399_v28  ;;  %v2884_v19 = vmul.f32 %v7334_v24, %v8400_v35  ;;  %v3356_v4 = vmul.f32 %v2866_v54, %v8401_v34  ;;  %3565 = vmatprep.subr.mxu0 %v3364_v16  ;;  %v3347_v56 = vmul.f32 %v7232_v60, %v8407_v63  ;;  %v8412_v60 = vld [vmem:[#allocation212_spill] sm:$0xff]  ;;  %v8417_v16 = vld [vmem:[#allocation205_spill] sm:$0xff]  ;;  %v8423_v34 = vld [vmem:[#allocation238_spill] sm:$0xff] }
 0x494   :  { %3566 = vmatpush2.msra.mxu0 %v3363_v9  ;;  %v3339_v1 = vmul.f32 %v7249_v2, %v8412_v60  ;;  %v3331_v54 = vmul.f32 %v7257_v59, %v8417_v16  ;;  %v8419_v9 = vld [vmem:[#allocation75_spill] sm:$0xff]  ;;  %v8422_v59 = vld [vmem:[#allocation110_spill] sm:$0xff]  ;;  %vm8429_vm3 = vmmov %vm8384_vm8 }
 0x495   :  { %3610 = vmatprep.subr.mxu1 %v2884_v19  ;;  %v2819_v49 = vpop.permute.xlu1 %2818  ;;  %3567 = vmatprep.subr.mxu0 %v3356_v4  ;;  %v8424_v32 = vld [vmem:[#allocation219_spill] sm:$0xff]  ;;  %v8430_v63 = vld [vmem:[#allocation92_spill] sm:$0xff] }
 0x496   :  { %v2825_v51 = vsel %vm504_vm4, %v7186_v53, %v2819_v49  ;;  %v7348_v38 = vsel %vm504_vm4, %v2819_v49, %v8403_v55  ;;  %3611 = vmatpush1.msra.mxu1 %v2883_v18  ;;  %3568 = vmatpush2.msra.mxu0 %v3355_v25  ;;  %v8420_v18 = vld [vmem:[#allocation98_spill] sm:$0xff]  ;;  %vm8431_vm4 = vmmov %vm8429_vm3  ;;  %v8446_v16 = vld [vmem:[#allocation187_spill] sm:$0xff] }
 0x497   :  { %v2842_v23 = vmul.f32 %v2825_v51, %v8404_v20  ;;  %v2843_v31 = vmul.f32 %v7348_v38, %v8405_v14  ;;  %v3348_v17 = vmul.f32 %v2825_v51, %v8406_v48  ;;  %v8425_v25 = vld [vmem:[#allocation218_spill] sm:$0xff]  ;;  %v8426_v51 = vld [vmem:[#allocation215_spill] sm:$0xff]  ;;  %v8427_v20 = vld [vmem:[#allocation216_spill] sm:$0xff] }
 0x498   :  { %v3315_v55 = vmul.f32 %v7289_v42, %v8426_v51  ;;  %v8433_v42 = vld [vmem:[#allocation161_spill] sm:$0xff] }
 0x499   :  { %3612 = vmatprep.subr.mxu1 %v2843_v31  ;;  %v2778_v15 = vpop.permute.xlu1 %2777  ;;  %3569 = vmatprep.subr.mxu0 %v3348_v17  ;;  %v8428_v31 = vld [vmem:[#allocation237_spill] sm:$0xff] }
 0x49a   :  { %v2784_v53 = vsel %vm430_vm5, %v7195_v8, %v2778_v15  ;;  %v7360_v41 = vsel %vm430_vm5, %v2778_v15, %v8408_v62  ;;  %3570 = vmatpush2.msra.mxu0 %v3347_v56  ;;  %3613 = vmatpush1.msra.mxu1 %v2842_v23  ;;  %v2655_v8 = vpop.permute.xlu0 %2654  ;;  %v8434_v62 = vld [vmem:[#allocation111_spill] sm:$0xff]  ;;  %vm8437_vm5 = vmmov %vm8329_vm11  ;;  %v8457_v51 = vld [vmem:[#allocation29_spill] sm:$0xff] }
 0x49b   :  { %v2801_v46 = vmul.f32 %v2784_v53, %v8409_v36  ;;  %v2802_v27 = vmul.f32 %v7360_v41, %v8410_v50  ;;  %v3340_v12 = vmul.f32 %v2784_v53, %v8411_v30  ;;  %v7390_v35 = vsel %vm8421_vm2, %v2655_v8, %v8420_v18  ;;  %vm8448_vm11 = vmmov %vm8335_vm1 }
 0x49c   :  { %v2679_v48 = vmul.f32 %v7390_v35, %v8428_v31  ;;  %v8461_v31 = vld [vmem:[#allocation186_spill] sm:$0xff]  ;;  %vm8469_vm9 = vmmov %vm8437_vm5 }
 0x49d   :  { %3614 = vmatprep.subr.mxu1 %v2802_v27  ;;  %v2737_v58 = vpop.permute.xlu1 %2736  ;;  %3571 = vmatprep.subr.mxu0 %v3340_v12  ;;  %v8436_v27 = vld [vmem:[#allocation56_spill] sm:$0xff] }
 0x49e   :  { %v2743_v40 = vsel %vm356_vm6, %v7213_v26, %v2737_v58  ;;  %v7372_v10 = vsel %vm356_vm6, %v2737_v58, %v8413_v21  ;;  %3572 = vmatpush2.msra.mxu0 %v3339_v1  ;;  %3615 = vmatpush1.msra.mxu1 %v2801_v46  ;;  %v2661_v26 = vsel %vm8418_vm0, %v7263_v11, %v2655_v8  ;;  %v3273_v49 = vpop.permute.xlu0 %3272  ;;  %v8435_v46 = vld [vmem:[#allocation224_spill] sm:$0xff]  ;;  %vm8438_vm6 = vmmov %vm8437_vm5  ;;  %v8439_v58 = vld [vmem:[#allocation174_spill] sm:$0xff] }
 0x49f   :  { %v2760_v61 = vmul.f32 %v2743_v40, %v8414_v7  ;;  %v2761_v47 = vmul.f32 %v7372_v10, %v8415_v57  ;;  %v3332_v2 = vmul.f32 %v2743_v40, %v8416_v13  ;;  %v3316_v23 = vmul.f32 %v2661_v26, %v8427_v20  ;;  %v8440_v8 = vld [vmem:[#allocation69_spill] sm:$0xff]  ;;  %v8441_v21 = vld [vmem:[#allocation191_spill] sm:$0xff] }
 0x4a0   :  { %v3307_v30 = vmul.f32 %v7304_v22, %v8436_v27  ;;  %v3374_v40 = vmul.f32 %v8440_v8, %v8439_v58  ;;  %v3373_v7 = vmul.f32 %v7297_v37, %v8441_v21  ;;  %v8442_v22 = vld [vmem:[#allocation227_spill] sm:$0xff]  ;;  %v8445_v13 = vld [vmem:[#allocation45_spill] sm:$0xff]  ;;  %v8468_v27 = vld [vmem:[#allocation214_spill] sm:$0xff] }
 0x4a1   :  { %3616 = vmatprep.subr.mxu1 %v2761_v47  ;;  %v2696_v44 = vpop.permute.xlu1 %2695  ;;  %3573 = vmatprep.subr.mxu0 %v3332_v2  ;;  %v8443_v57 = vld [vmem:[#allocation15_spill] sm:$0xff] }
 0x4a2   :  { %v2702_v33 = vsel %vm282_vm7, %v7238_v29, %v2696_v44  ;;  %v7386_v28 = vsel %vm282_vm7, %v2696_v44, %v8419_v9  ;;  %3574 = vmatpush2.msra.mxu0 %v3331_v54  ;;  %3617 = vmatpush1.msra.mxu1 %v2760_v61  ;;  %v3323_v29 = vmul.f32 %v7278_v52, %v8425_v25  ;;  %v8432_v52 = vld [vmem:[#allocation151_spill] sm:$0xff]  ;;  %v3232_v60 = vpop.permute.xlu0 %3231  ;;  %vm8447_vm7 = vmmov %vm8335_vm1  ;;  %v8450_v9 = vld [vmem:[#allocation12_spill] sm:$0xff] }
 0x4a3   :  { %v2719_v19 = vmul.f32 %v2702_v33, %v8422_v59  ;;  %v2720_v4 = vmul.f32 %v7386_v28, %v8423_v34  ;;  %v3324_v11 = vmul.f32 %v2702_v33, %v8424_v32  ;;  %v2678_v15 = vmul.f32 %v2661_v26, %v8432_v52  ;;  %v8449_v33 = vld [vmem:[#allocation177_spill] sm:$0xff]  ;;  %vm8472_vm1 = vmmov %vm8437_vm5  ;;  %v8475_v21 = vld [vmem:[#allocation171_spill] sm:$0xff] }
 0x4a4   :  { %v3365_v54 = vmul.f32 %v7321_v45, %v8446_v16  ;;  %v3241_v44 = vsel %vm8447_vm7, %v7134_v3, %v3232_v60  ;;  %v3358_v18 = vmul.f32 %v8450_v9, %v8449_v33  ;;  %v8451_v59 = vld [vmem:[#allocation201_spill] sm:$0xff]  ;;  %v8453_v45 = vld [vmem:[#allocation175_spill] sm:$0xff]  ;;  %v8455_v3 = vld [vmem:[#allocation228_spill] sm:$0xff] }
 0x4a5   :  { %3618 = vmatprep.subr.mxu1 %v2720_v4  ;;  %v2614_v14 = vpop.permute.xlu1 %2613  ;;  %3575 = vmatprep.subr.mxu0 %v3324_v11  ;;  %v8452_v34 = vld [vmem:[#allocation229_spill] sm:$0xff]  ;;  %v3258_v25 = vmul.f32 %v3241_v44, %v8455_v3  ;;  %vm8474_vm12 = vmmov %vm8447_vm7 }
 0x4a6   :  { %v2620_v17 = vsel %vm8429_vm3, %v7284_v43, %v2614_v14  ;;  %v7407_v56 = vsel %vm8431_vm4, %v2614_v14, %v8430_v63  ;;  %3576 = vmatpush2.msra.mxu0 %v3323_v29  ;;  %3619 = vmatpush1.msra.mxu1 %v2719_v19  ;;  %v3282_v43 = vsel %vm8437_vm5, %v7119_v0, %v3273_v49  ;;  %v8444_v0 = vld [vmem:[#allocation170_spill] sm:$0xff]  ;;  %v8454_v32 = vld [vmem:[#allocation221_spill] sm:$0xff]  ;;  %v8456_v29 = vld [vmem:[#allocation196_spill] sm:$0xff] }
 0x4a7   :  { %v2637_v53 = vmul.f32 %v2620_v17, %v8433_v42  ;;  %v2638_v36 = vmul.f32 %v7407_v56, %v8434_v62  ;;  %v3308_v50 = vmul.f32 %v2620_v17, %v8435_v46  ;;  %3577 = vmatprep.subr.mxu0 %v3316_v23  ;;  %3620 = vmatprep.subr.mxu1 %v2679_v48  ;;  %v8460_v14 = vld [vmem:[#allocation176_spill] sm:$0xff]  ;;  %v8463_v63 = vld [vmem:[#allocation185_spill] sm:$0xff]  ;;  %v3277_v42 = vpop.permute.xlu0 %3276  ;;  %vm8476_vm13 = vmmov %vm8447_vm7 }
 0x4a8   :  { %3578 = vmatpush2.msra.mxu0 %v3315_v55  ;;  %3621 = vmatpush1.msra.mxu1 %v2678_v15  ;;  %v3299_v47 = vmul.f32 %v3282_v43, %v8443_v57  ;;  %v3366_v2 = vmul.f32 %v8445_v13, %v8444_v0  ;;  %v3357_v19 = vmul.f32 %v7334_v24, %v8451_v59  ;;  %v8458_v55 = vld [vmem:[#allocation105_spill] sm:$0xff]  ;;  %v8459_v24 = vld [vmem:[#allocation210_spill] sm:$0xff]  ;;  %v8462_v17 = vld [vmem:[#allocation204_spill] sm:$0xff] }
 0x4a9   :  { %v3275_v12 = vpop.permute.xlu1 %3274  ;;  %3579 = vmatprep.subr.mxu0 %v3308_v50  ;;  %3622 = vmatprep.subr.mxu1 %v2638_v36  ;;  %v3350_v11 = vmul.f32 %v8454_v32, %v8453_v45  ;;  %v3342_v20 = vmul.f32 %v8458_v55, %v8457_v51  ;;  %v3341_v23 = vmul.f32 %v7360_v41, %v8459_v24  ;;  %v8464_v52 = vld [vmem:[#allocation117_spill] sm:$0xff]  ;;  %v8466_v41 = vld [vmem:[#allocation179_spill] sm:$0xff]  ;;  %v8470_v43 = vld [vmem:[#allocation184_spill] sm:$0xff] }
 0x4aa   :  { %v3283_v1 = vsel %vm8438_vm6, %v3273_v49, %v3275_v12  ;;  %3580 = vmatpush2.msra.mxu0 %v3307_v30  ;;  %3623 = vmatpush1.msra.mxu1 %v2637_v53  ;;  %v3349_v49 = vmul.f32 %v7348_v38, %v8456_v29  ;;  %v3334_v48 = vmul.f32 %v8461_v31, %v8460_v14  ;;  %v8465_v53 = vld [vmem:[#allocation217_spill] sm:$0xff]  ;;  %v8467_v36 = vld [vmem:[#allocation195_spill] sm:$0xff] }
 0x4ab   :  { %v3300_v61 = vmul.f32 %v3283_v1, %v8442_v22  ;;  %3634 = vmatprep.subr.mxu1 %v3374_v40  ;;  %v3333_v38 = vmul.f32 %v7372_v10, %v8462_v17  ;;  %v3326_v15 = vmul.f32 %v8464_v52, %v8463_v63  ;;  %v3325_v62 = vmul.f32 %v7386_v28, %v8465_v53  ;;  %v8473_v28 = vld [vmem:[#allocation220_spill] sm:$0xff]  ;;  %v3664_v14 = vld [vmem:[%s7489_s6] sm:$0xff] }
 0x4ac   :  { %3635 = vmatpush2.msra.mxu1 %v3373_v7  ;;  %v3318_v46 = vmul.f32 %v8467_v36, %v8466_v41  ;;  %v3317_v30 = vmul.f32 %v7390_v35, %v8468_v27  ;;  %v3294_v10 = vsel %vm8469_vm9, %v3277_v42, %v7088_v5  ;;  %v3284_v58 = vsel %vm8472_vm1, %v3275_v12, %v3277_v42  ;;  %v8477_v5 = vld [vmem:[#allocation190_spill] sm:$0xff]  ;;  %v8479_v12 = vld [vmem:[#allocation245_spill] sm:$0xff] }
 0x4ad   :  { %v3234_v26 = vpop.permute.xlu1 %3233  ;;  %3581 = vmatprep.subr.mxu0 %v3300_v61  ;;  %3636 = vmatprep.subr.mxu1 %v3366_v2  ;;  %v3309_v8 = vmul.f32 %v7407_v56, %v8473_v28  ;;  %v3302_v7 = vmul.f32 %v3294_v10, %v8475_v21  ;;  %v3301_v22 = vmul.f32 %v3284_v58, %v8477_v5  ;;  %v8478_v61 = vld [vmem:[#allocation246_spill] sm:$0xff]  ;;  %v3663_v31 = vld [vmem:[%s7488_s5] sm:$0xff]  ;;  %s3941_s5 = smov [#allocation8]  }
 0x4ae   :  { %v3242_v37 = vsel %vm8448_vm11, %v3232_v60, %v3234_v26  ;;  %3582 = vmatpush2.msra.mxu0 %v3299_v47  ;;  %3637 = vmatpush2.msra.mxu1 %v3365_v54  ;;  %v8471_v60 = vld [vmem:[#allocation67_spill] sm:$0xff]  ;;  %s3761_s6 = sshll.u32 %s3941_s5, 4  ;;  %s3762_s6 = int_to_ptr.vmem [resolvable:$true] %s3761_s6 }
 0x4af   :  { %v3259_v4 = vmul.f32 %v3242_v37, %v8452_v34  ;;  %3638 = vmatprep.subr.mxu1 %v3358_v18  ;;  %v3310_v1 = vmul.f32 %v8471_v60, %v8470_v43  ;;  %s3892_s25 = scalar_lea.vmem %s3762_s6, 1024  ;;  %p3897_p2 = scmp.lt.s32.totalorder %s3762_s6, %s3762_s6 }
 0x4b0   :  { %3639 = vmatpush2.msra.mxu1 %v3357_v19  ;;  %p3893_p1 = scmp.ne.s32.totalorder %s3762_s6, %s3892_s25  ;;  %p3898_p3 = scmp.lt.s32.totalorder %s3892_s25, %s3892_s25 }
 0x4b1   :  { %3583 = vmatprep.subr.mxu0 %v3259_v4  ;;  %3640 = vmatprep.subr.mxu1 %v3350_v11 }
 0x4b2   :  { %3584 = vmatpush2.msra.mxu0 %v3258_v25  ;;  %3641 = vmatpush2.msra.mxu1 %v3349_v49  ;;  %v3236_v50 = vpop.permute.xlu1 %3235  ;;  %p3899_p4 = por %p3898_p3, %p3897_p2 }
 0x4b3   :  { %3586 = vmatmul.mubr.f32.vlgmr.msra.gmra.mxu0 %v7103_v39  ;;  %3642 = vmatprep.subr.mxu1 %v3342_v20  ;;  %v3253_v40 = vsel %vm8474_vm12, %v3236_v50, %v7098_v6  ;;  %v3243_v35 = vsel %vm8476_vm13, %v3234_v26, %v3236_v50 }
 0x4b4   :  { %3643 = vmatpush2.msra.mxu1 %v3341_v23  ;;  %v3261_v57 = vmul.f32 %v3253_v40, %v8478_v61  ;;  %v3260_v47 = vmul.f32 %v3243_v35, %v8479_v12  ;;  %p3900_p5 = pnand %p3899_p4, %p3893_p1 }
 0x4b5   :  { %3644 = vmatprep.subr.mxu1 %v3334_v48 }
 0x4b6   :  { %3645 = vmatpush2.msra.mxu1 %v3333_v38 }
 0x4b7   :  { %3646 = vmatprep.subr.mxu1 %v3326_v15 }
 0x4b8   :  { %3647 = vmatpush2.msra.mxu1 %v3325_v62 }
 0x4b9   :  { %3648 = vmatprep.subr.mxu1 %v3318_v46 }
 0x4ba   :  { %3649 = vmatpush2.msra.mxu1 %v3317_v30 }
 0x4bb   :  { %3650 = vmatprep.subr.mxu1 %v3310_v1 }
 0x4bc   :  { %3651 = vmatpush2.msra.mxu1 %v3309_v8 }
 0x4bd   :  { %3652 = vmatprep.subr.mxu1 %v3302_v7 }
 0x4be   :  { %3653 = vmatpush2.msra.mxu1 %v3301_v22 }
 0x4bf   :  { %3654 = vmatprep.subr.mxu1 %v3261_v57 }
 0x4c0   :  { %3655 = vmatpush2.msra.mxu1 %v3260_v47 }
 0x4c1   :  { %3657 = vmatmul.mubr.f32.vlgmr.msra.gmra.mxu1 %v7103_v39 }
 0x51a   :  { %v3445_v6 = vpop.f32.mrf.mxu0 }
 0x51b   :  { %v3674_v0 = vmul.f32 %v3445_v6, %v3445_v6 }
 0x51c   :  { %v3447_v56 = vpop.f32.mrf.mxu0 }
 0x51d   :  { %v3675_v13 = vmul.f32 %v3447_v56, %v3447_v56  ;;  %v3665_v16 = vadd.f32 %v3447_v56, %v3445_v6 }
 0x51f   :  { %v3682_v54 = vadd.f32 %v3675_v13, %v3674_v0 }
 0x52b   :  { %v3516_v2 = vpop.f32.mrf.mxu1 }
 0x52c   :  { %v3676_v44 = vmul.f32 %v3516_v2, %v3516_v2  ;;  %v3666_v37 = vadd.f32 %v3665_v16, %v3516_v2 }
 0x52d   :  { %v3518_v26 = vpop.f32.mrf.mxu1 }
 0x52e   :  { %v3683_v9 = vadd.f32 %v3682_v54, %v3676_v44  ;;  %v3677_v18 = vmul.f32 %v3518_v26, %v3518_v26  ;;  %v3667_v59 = vadd.f32 %v3666_v37, %v3518_v26 }
 0x530   :  { %v3684_v4 = vadd.f32 %v3683_v9, %v3677_v18 }
 0x573   :  { %v3587_v33 = vpop.f32.mrf.mxu0 }
 0x574   :  { %v3678_v19 = vmul.f32 %v3587_v33, %v3587_v33  ;;  %v3668_v45 = vadd.f32 %v3667_v59, %v3587_v33 }
 0x575   :  { %v3589_v34 = vpop.f32.mrf.mxu0 }
 0x576   :  { %v3685_v32 = vadd.f32 %v3684_v4, %v3678_v19  ;;  %v3679_v39 = vmul.f32 %v3589_v34, %v3589_v34  ;;  %v3669_v11 = vadd.f32 %v3668_v45, %v3589_v34 }
 0x578   :  { %v3686_v25 = vadd.f32 %v3685_v32, %v3679_v39 }
 0x581   :  { %v3658_v3 = vpop.f32.mrf.mxu1 }
 0x582   :  { %v3670_v29 = vadd.f32 %v3669_v11, %v3658_v3  ;;  %v3680_v49 = vmul.f32 %v3658_v3, %v3658_v3 }
 0x583   :  { %v3660_v51 = vpop.f32.mrf.mxu1 }
 0x584   :  { %v3687_v55 = vadd.f32 %v3686_v25, %v3680_v49  ;;  %v3671_v20 = vadd.f32 %v3670_v29, %v3660_v51  ;;  %v3681_v24 = vmul.f32 %v3660_v51, %v3660_v51 }
 0x586   :  { %v3688_v23 = vadd.f32 %v3687_v55, %v3681_v24  ;;  %3672 = vadd.xlane.f32.xlu0 %v3671_v20 }
 0x588   :  { %3689 = vadd.xlane.f32.xlu1 %v3688_v23 }
 0x599   :  { %3728 = vperm.xlu1 %3819, %v3664_v14  }
 0x59c   :  { %3715 = vperm.xlu0 %3818, %v3663_v31  }
 0x60f   :  { %v3673_v48 = vpop.xlane.xlu0 %3672 }
 0x610   :  { %v3691_v17 = vmul.f32 0.0009765625, %v3673_v48 }
 0x611   :  { %v3690_v38 = vpop.xlane.xlu1 %3689 }
 0x612   :  { %v3692_v63 = vmul.f32 0.0009765625, %v3690_v38  ;;  %v3693_v52 = vmul.f32 %v3691_v17, %v3691_v17  ;;  %v3695_v53 = vsub.f32 %v3445_v6, %v3691_v17  ;;  %v3696_v62 = vsub.f32 %v3447_v56, %v3691_v17 }
 0x613   :  { %v3697_v41 = vsub.f32 %v3516_v2, %v3691_v17  ;;  %v3698_v36 = vsub.f32 %v3518_v26, %v3691_v17  ;;  %v3699_v50 = vsub.f32 %v3587_v33, %v3691_v17  ;;  %v3700_v27 = vsub.f32 %v3589_v34, %v3691_v17 }
 0x614   :  { %v3694_v15 = vsub.f32 %v3692_v63, %v3693_v52  ;;  %v3701_v30 = vsub.f32 %v3658_v3, %v3691_v17  ;;  %v3702_v10 = vsub.f32 %v3660_v51, %v3691_v17 }
 0x615   :  { %v3729_v57 = vpop.permute.xlu1 %3728 }
 0x616   :  { %v3703_v42 = vadd.f32 1e-05, %v3694_v15 }
 0x617   :  { %v3716_v7 = vpop.permute.xlu0 %3715 }
 0x618   :  { %3826 = vrsqrt.f32 %v3703_v42 }
 0x625   :  { %v3827_v46 = vpop.eup %3826 }
 0x626   :  { %v3705_v43 = vmul.f32 %v3827_v46, %v3695_v53  ;;  %v3706_v60 = vmul.f32 %v3827_v46, %v3696_v62  ;;  %v3707_v1 = vmul.f32 %v3827_v46, %v3697_v41  ;;  %v3708_v58 = vmul.f32 %v3827_v46, %v3698_v36 }
 0x627   :  { %v3709_v28 = vmul.f32 %v3827_v46, %v3699_v50  ;;  %v3710_v8 = vmul.f32 %v3827_v46, %v3700_v27  ;;  %v3711_v40 = vmul.f32 %v3827_v46, %v3701_v30  ;;  %v3712_v21 = vmul.f32 %v3827_v46, %v3702_v10 }
 0x628   :  { %v3718_v35 = vmul.f32 %v3716_v7, %v3705_v43  ;;  %v3719_v5 = vmul.f32 %v3716_v7, %v3706_v60  ;;  %v3720_v22 = vmul.f32 %v3716_v7, %v3707_v1  ;;  %v3721_v61 = vmul.f32 %v3716_v7, %v3708_v58 }
 0x629   :  { %v3722_v12 = vmul.f32 %v3716_v7, %v3709_v28  ;;  %v3723_v47 = vmul.f32 %v3716_v7, %v3710_v8  ;;  %v3724_v6 = vmul.f32 %v3716_v7, %v3711_v40  ;;  %v3725_v56 = vmul.f32 %v3716_v7, %v3712_v21 }
 0x62a   :  { %v3731_v0 = vadd.f32 %v3729_v57, %v3718_v35  ;;  %v3732_v13 = vadd.f32 %v3729_v57, %v3719_v5  ;;  %v3733_v2 = vadd.f32 %v3729_v57, %v3720_v22  ;;  %v3734_v16 = vadd.f32 %v3729_v57, %v3721_v61 }
 0x62b   :  { %v3735_v54 = vadd.f32 %v3729_v57, %v3722_v12  ;;  %v3736_v44 = vadd.f32 %v3729_v57, %v3723_v47  ;;  %v3737_v26 = vadd.f32 %v3729_v57, %v3724_v6  ;;  %v3738_v37 = vadd.f32 %v3729_v57, %v3725_v56 }
 0x62c   :  { %v3739_v33 = vmax.f32 %v3731_v0, 0.0  ;;  %v3740_v9 = vmax.f32 %v3732_v13, 0.0  ;;  %v3741_v18 = vmax.f32 %v3733_v2, 0.0  ;;  %v3742_v59 = vmax.f32 %v3734_v16, 0.0 }
 0x62d   :  { %v3743_v19 = vmax.f32 %v3735_v54, 0.0  ;;  %v3744_v34 = vmax.f32 %v3736_v44, 0.0  ;;  %v3745_v4 = vmax.f32 %v3737_v26, 0.0  ;;  %v3746_v45 = vmax.f32 %v3738_v37, 0.0 }
 0x62e   :  { %3747 = vst [vmem:[#allocation8] sm:$0xff] %v3739_v33  ;;  %3748 = vst [vmem:[#allocation8 + $0x8] sm:$0xff] %v3740_v9 }
 0x62f   :  { %3749 = vst [vmem:[#allocation8 + $0x10] sm:$0xff] %v3741_v18  ;;  %3750 = vst [vmem:[#allocation8 + $0x18] sm:$0xff] %v3742_v59 }
 0x630   :  { %3752 = vst [vmem:[#allocation8 + $0x20] sm:$0xff] %v3743_v19  ;;  %3753 = vst [vmem:[#allocation8 + $0x28] sm:$0xff] %v3744_v34 }
 0x631   :  { %3754 = vst [vmem:[#allocation8 + $0x30] sm:$0xff] %v3745_v4  ;;  %3755 = vst [vmem:[#allocation8 + $0x38] sm:$0xff] %v3746_v45 }
 0x632   :  { %3903 = shalt.err (!%p3900_p5)
}
 0x633   :  { %s3942_s26 = smov 512   ;;  %s3943_s27 = smov 32  }
 0x634   :  { %3767 = dma.vmem_to_hbm [thread:$0]  %s3762_s6, 1024, %s7491_s8, [#allocation4], %s3942_s26, %s3942_s26, %s3943_s27  }
 0x635   :  { %3916 = dma.done.wait [#allocation4], 1024  }
 0x636   :  { %3917 = vsyncadd [#allocation4], 4294966272 }
 0x637   :  { %3771 = vsyncpa [#allocation3], 1 }
 0x638   :  { %3772 = vsyncpa [#allocation6], 1 }
 0x639   :  { %3773 = vsyncpa [#allocation4], 1 }

</bundles_post_ra>
